<compile_context>
chip_gen: v7x
topology: tpu7x:2x2x1
jax: 0.10.0
libtpu: 0.0.40
codegen_flags: <defaults>
</compile_context>

<pallas_src>
import functools

import jax
import jax.numpy as jnp
from jax import lax
from jax.experimental import pallas as pl
from jax.experimental.pallas import tpu as pltpu


def _round_up(n, m):
    return ((n + m - 1) // m) * m


def _rnn_seq_kernel(xw_ref, h0_ref, wh_ref, ws_ref, bs_ref, wo_ref, bo_ref,
                    out_ref, hout_ref, h_scr, *, d, tc, t_total):
    """One grid step == one chunk of `tc` RNN timesteps for one batch tile.

    grid = (num_batch_blocks, num_time_chunks); the chunk axis (last, marked
    "arbitrary") is the recurrence axis.  Inside a chunk, time runs in a fully
    unrolled fori_loop with h carried as a loop value (no per-step grid
    overhead).  h_scr carries the hidden state (f32) across chunks; weights are
    VMEM-resident (constant index_maps).
    """
    c = pl.program_id(1)

    @pl.when(c == 0)
    def _init():
        h_scr[...] = h0_ref[...].astype(jnp.float32)

    wh = wh_ref[...]
    padded_time = (t_total % tc) != 0  # static: does the last chunk have pad steps?

    def step(i, h):
        # xw_ref already holds x_t @ Wx + b1 (hoisted out of the serial chain),
        # so only the h-dependent matmul is on the critical path.
        h_new = jnp.tanh(
            xw_ref[i]
            + jnp.dot(h, wh, preferred_element_type=jnp.float32)
        )
        # Residual tanh stack: h = tanh(h @ W_i + b_i) + h.  d is small, so the
        # static Python loop is fine; for large d switch to a dynamic fori_loop.
        for j in range(d):
            h_new = jnp.tanh(
                jnp.dot(h_new, ws_ref[j], preferred_element_type=jnp.float32)
                + bs_ref[j]
            ) + h_new
        if padded_time:
            # Skip padded timesteps in the (possibly ragged) last chunk.
            h_new = jnp.where(c * tc + i < t_total, h_new, h)
        return h_new

    h = lax.fori_loop(0, tc, step, h_scr[...], unroll=True)
    h_scr[...] = h

    # Output projection + stores only on the final chunk (off the serial path).
    @pl.when(c == pl.num_programs(1) - 1)
    def _finalize():
        hout_ref[...] = h.astype(hout_ref.dtype)
        out_ref[...] = (
            jnp.dot(h, wo_ref[...], preferred_element_type=jnp.float32) + bo_ref[...]
        ).astype(out_ref.dtype)


def recognition_rnn_sequence(x_seq, h0, params, *, time_chunk=None):
    """Run the RNN over a whole sequence in one fused Pallas kernel.

    x_seq: (T, B, obs_dim), h0: (B, nhidden)
    Returns (out, h) after the final step:
      out: (B, latent_dim), h: (B, nhidden)
    """
    wx, wh, b1, ws, bs, wo, bo = params
    T, B, obs_dim = x_seq.shape
    nhidden = h0.shape[1]
    latent_dim = wo.shape[1]
    d = ws.shape[0]

    # Padded (lane-dense / sublane-aligned) sizes.  One big batch tile (<=128).
    Bp = _round_up(B, 8)
    BB = Bp
    if Bp > 128:
        Bp = _round_up(B, 128)
        BB = 128
    Hp = _round_up(max(nhidden, 128), 128)
    Lp = _round_up(max(latent_dim, 128), 128)

    # Time-chunk size: whole sequence in one chunk when it fits a small VMEM
    # budget (double-buffered xw slab), else stream chunks through the grid.
    if time_chunk is None:
        xw_budget = 4 * 1024 * 1024            # bytes for the xw chunk stream
        per_step = BB * Hp * 4                 # f32 bytes per timestep
        tc = max(1, min(T, xw_budget // (2 * per_step), 32))
    else:
        tc = max(1, min(T, time_chunk))
    n_chunks = -(-T // tc)
    Tp = n_chunks * tc

    f32 = jnp.float32
    # Zero-pad parameters so every matmul operand / store is lane-dense.
    # TODO(synk): cast weights + xw to bf16 once nhidden/T grow (needs looser tol).
    wx_p = jnp.zeros((obs_dim, Hp), f32).at[:, :nhidden].set(wx.astype(f32))
    wh_p = jnp.zeros((Hp, Hp), f32).at[:nhidden, :nhidden].set(wh.astype(f32))
    b1_p = jnp.zeros((1, Hp), f32).at[:, :nhidden].set(b1.astype(f32))
    ws_p = jnp.zeros((d, Hp, Hp), f32).at[:, :nhidden, :nhidden].set(ws.astype(f32))
    bs_p = jnp.zeros((d, 1, Hp), f32).at[:, :, :nhidden].set(bs.astype(f32))
    wo_p = jnp.zeros((Hp, Lp), f32).at[:nhidden, :latent_dim].set(wo.astype(f32))
    bo_p = jnp.zeros((1, Lp), f32).at[:, :latent_dim].set(bo.astype(f32))

    h0_p = jnp.zeros((Bp, Hp), f32).at[:B, :nhidden].set(h0.astype(f32))

    # Hoist the non-recurrent input projection: one large batched matmul
    # (T*B, obs_dim) @ (obs_dim, Hp) instead of T tiny ones on the serial path.
    x_p = jnp.zeros((T, Bp, obs_dim), f32).at[:, :B, :].set(x_seq.astype(f32))
    xw = jnp.einsum("tbo,oh->tbh", x_p, wx_p,
                    preferred_element_type=jnp.float32) + b1_p
    if Tp != T:
        xw = jnp.concatenate(
            [xw, jnp.zeros((Tp - T, Bp, Hp), f32)], axis=0)

    out_p, h_p = pl.pallas_call(
        functools.partial(_rnn_seq_kernel, d=d, tc=tc, t_total=T),
        grid=(Bp // BB, n_chunks),
        in_specs=[
            # x projection: streamed one chunk of timesteps at a time.
            pl.BlockSpec((tc, BB, Hp), lambda b, c: (c, b, 0)),
            # initial hidden state (read once at chunk 0).
            pl.BlockSpec((BB, Hp), lambda b, c: (b, 0)),
            # weights: constant index_map => VMEM-resident for the whole grid.
            pl.BlockSpec((Hp, Hp), lambda b, c: (0, 0)),
            pl.BlockSpec((d, Hp, Hp), lambda b, c: (0, 0, 0)),
            pl.BlockSpec((d, 1, Hp), lambda b, c: (0, 0, 0)),
            pl.BlockSpec((Hp, Lp), lambda b, c: (0, 0)),
            pl.BlockSpec((1, Lp), lambda b, c: (0, 0)),
        ],
        out_specs=[
            # Same block index across chunks => outputs stay resident, written
            # once on the final chunk.
            pl.BlockSpec((BB, Lp), lambda b, c: (b, 0)),
            pl.BlockSpec((BB, Hp), lambda b, c: (b, 0)),
        ],
        out_shape=[
            jax.ShapeDtypeStruct((Bp, Lp), x_seq.dtype),
            jax.ShapeDtypeStruct((Bp, Hp), x_seq.dtype),
        ],
        scratch_shapes=[pltpu.VMEM((BB, Hp), jnp.float32)],
        compiler_params=pltpu.CompilerParams(
            dimension_semantics=("parallel", "arbitrary"),
            vmem_limit_bytes=32 * 1024 * 1024),
    )(xw, h0_p, wh_p, ws_p, bs_p, wo_p, bo_p)

    return out_p[:B, :latent_dim], h_p[:B, :nhidden]


def recognition_rnn_forward(x, h, params):
    """Single-step forward matching the torch module's forward(x, h)."""
    return recognition_rnn_sequence(x[None], h, params)


def recognition_rnn_recognize(dataset, params, rec_num=None):
    """dataset: (B, T, obs_dim). Matches torch recognize(): time-reversed scan."""
    B, T, _ = dataset.shape
    nhidden = params[1].shape[0]  # wh: (nhidden, nhidden)
    rec_num = T if rec_num is None else rec_num
    x_seq = jnp.transpose(dataset[:, :rec_num, :], (1, 0, 2))[::-1]
    h0 = jnp.zeros((B, nhidden), dataset.dtype)
    out, _ = recognition_rnn_sequence(x_seq, h0, params)
    return out


def init_params(key, latent_dim, obs_dim, nhidden, d, dtype=jnp.float32):
    ks = jax.random.split(key, 7)

    def lin(k, fan_in, shape):
        bound = 1.0 / jnp.sqrt(fan_in)
        return jax.random.uniform(k, shape, dtype, -bound, bound)

    # i2h: Linear(obs_dim + nhidden, nhidden), split into Wx / Wh (no in-kernel cat)
    wx = lin(ks[0], obs_dim + nhidden, (obs_dim, nhidden))
    wh = lin(ks[1], obs_dim + nhidden, (nhidden, nhidden))
    b1 = lin(ks[2], obs_dim + nhidden, (1, nhidden))
    # i2hs: d x Linear(nhidden, nhidden)
    ws = lin(ks[3], nhidden, (d, nhidden, nhidden))
    bs = lin(ks[4], nhidden, (d, 1, nhidden))
    # h2o: Linear(nhidden, latent_dim)
    wo = lin(ks[5], nhidden, (nhidden, latent_dim))
    bo = lin(ks[6], nhidden, (1, latent_dim))
    return (wx, wh, b1, ws, bs, wo, bo)


# ---------------- pure-JAX reference ----------------

def reference_step(x, h, params):
    wx, wh, b1, ws, bs, wo, bo = params
    h = jnp.tanh(x @ wx + h @ wh + b1)
    for i in range(ws.shape[0]):
        h = jnp.tanh(h @ ws[i] + bs[i]) + h
    out = h @ wo + bo
    return out, h


def reference_sequence(x_seq, h0, params):
    h = h0
    out = None
    for t in range(x_seq.shape[0]):
        out, h = reference_step(x_seq[t], h, params)
    return out, h


if __name__ == "__main__":
    latent_dim, obs_dim, nhidden, d = 8, 16, 32, 3
    batch, T = 8, 12

    key = jax.random.PRNGKey(0)
    k_x, k_h, k_p = jax.random.split(key, 3)
    x_seq = jax.random.normal(k_x, (T, batch, obs_dim), jnp.float32)
    h0 = jax.random.normal(k_h, (batch, nhidden), jnp.float32)
    params = init_params(k_p, latent_dim, obs_dim, nhidden, d)

    # Fused whole-sequence recurrence (the hot path of RecognitionRNN.recognize).
    out, h_new = jax.jit(recognition_rnn_sequence)(x_seq, h0, params)
    jax.block_until_ready((out, h_new))

    out_ref, h_ref = reference_sequence(x_seq, h0, params)
    assert out.shape == (batch, latent_dim) and h_new.shape == (batch, nhidden)
    assert jnp.allclose(out, out_ref, atol=1e-4, rtol=1e-4), \
        float(jnp.abs(out - out_ref).max())
    assert jnp.allclose(h_new, h_ref, atol=1e-4, rtol=1e-4), \
        float(jnp.abs(h_new - h_ref).max())

    # Also exercise the chunked-time path (ragged last chunk: tc=5, T=12).
    out_c, h_c = jax.jit(
        functools.partial(recognition_rnn_sequence, time_chunk=5)
    )(x_seq, h0, params)
    jax.block_until_ready((out_c, h_c))
    assert jnp.allclose(out_c, out_ref, atol=1e-4, rtol=1e-4)
    assert jnp.allclose(h_c, h_ref, atol=1e-4, rtol=1e-4)

    # Single-step forward (the module's forward()).
    out1, h1 = recognition_rnn_forward(x_seq[0], h0, params)
    jax.block_until_ready((out1, h1))
    out1_ref, h1_ref = reference_step(x_seq[0], h0, params)
    assert jnp.allclose(out1, out1_ref, atol=1e-4, rtol=1e-4)
    assert jnp.allclose(h1, h1_ref, atol=1e-4, rtol=1e-4)

    print("KERNEL_OK")
</pallas_src>

<mosaic_0001>
module attributes {stable_mosaic.version = 11 : i64} {
  func.func @_rnn_seq_kernel(%arg0: i32, %arg1: i32, %arg2: memref<12x8x128xf32, #tpu.memory_space<vmem>>, %arg3: memref<8x128xf32, #tpu.memory_space<vmem>>, %arg4: memref<128x128xf32, #tpu.memory_space<vmem>>, %arg5: memref<3x128x128xf32, #tpu.memory_space<vmem>>, %arg6: memref<3x1x128xf32, #tpu.memory_space<vmem>>, %arg7: memref<128x128xf32, #tpu.memory_space<vmem>>, %arg8: memref<1x128xf32, #tpu.memory_space<vmem>>, %arg9: memref<8x128xf32, #tpu.memory_space<vmem>>, %arg10: memref<8x128xf32, #tpu.memory_space<vmem>>, %arg11: memref<8x128xf32, #tpu.memory_space<vmem>>) attributes {dimension_semantics = [#tpu.dimension_semantics<parallel>, #tpu.dimension_semantics<arbitrary>], iteration_bounds = array<i64: 1, 1>, scalar_prefetch = 0 : i64, scratch_operands = 1 : i64, tpu.core_type = #tpu.core_type<tc>, window_params = [{transform_indices = @transform_0, window_bounds = array<i64: 12, 8, 128>}, {transform_indices = @transform_1, window_bounds = array<i64: 8, 128>}, {pipeline_mode = #tpu.pipeline_mode<synchronous>, transform_indices = @transform_2, window_bounds = array<i64: 128, 128>}, {pipeline_mode = #tpu.pipeline_mode<synchronous>, transform_indices = @transform_3, window_bounds = array<i64: 3, 128, 128>}, {pipeline_mode = #tpu.pipeline_mode<synchronous>, transform_indices = @transform_4, window_bounds = array<i64: 3, 1, 128>}, {pipeline_mode = #tpu.pipeline_mode<synchronous>, transform_indices = @transform_5, window_bounds = array<i64: 128, 128>}, {pipeline_mode = #tpu.pipeline_mode<synchronous>, transform_indices = @transform_6, window_bounds = array<i64: 1, 128>}, {transform_indices = @transform_7, window_bounds = array<i64: 8, 128>}, {transform_indices = @transform_8, window_bounds = array<i64: 8, 128>}]} {
    %c0_i32 = arith.constant 0 : i32
    %0 = arith.cmpi eq, %arg1, %c0_i32 : i32
    %1 = arith.extui %0 : i1 to i32
    %c0_i32_0 = arith.constant 0 : i32
    %2 = arith.cmpi ne, %1, %c0_i32_0 : i32
    scf.if %2 {
      %c0_294 = arith.constant 0 : index
      %c0_295 = arith.constant 0 : index
      %405 = vector.load %arg3[%c0_294, %c0_295] : memref<8x128xf32, #tpu.memory_space<vmem>>, vector<8x128xf32>
      %c0_296 = arith.constant 0 : index
      %c0_297 = arith.constant 0 : index
      %406 = vector.load %arg11[%c0_296, %c0_297] : memref<8x128xf32, #tpu.memory_space<vmem>>, vector<8x128xf32>
      tpu.vector_store %arg11[%c0_296, %c0_297], %405 {strides = array<i32>} : memref<8x128xf32, #tpu.memory_space<vmem>>, vector<8x128xf32>,
    } else {
    }
    %c0 = arith.constant 0 : index
    %c0_1 = arith.constant 0 : index
    %3 = vector.load %arg4[%c0, %c0_1] : memref<128x128xf32, #tpu.memory_space<vmem>>, vector<128x128xf32>
    %c0_2 = arith.constant 0 : index
    %c0_3 = arith.constant 0 : index
    %4 = vector.load %arg11[%c0_2, %c0_3] : memref<8x128xf32, #tpu.memory_space<vmem>>, vector<8x128xf32>
    %c0_i32_4 = arith.constant 0 : i32
    %5 = arith.index_cast %c0_i32_4 : i32 to index
    %c0_5 = arith.constant 0 : index
    %c0_6 = arith.constant 0 : index
    %6 = vector.load %arg2[%5, %c0_5, %c0_6] : memref<12x8x128xf32, #tpu.memory_space<vmem>>, vector<1x8x128xf32>
    %7 = vector.shape_cast %6 : vector<1x8x128xf32> to vector<8x128xf32>
    %cst = arith.constant dense<0.000000e+00> : vector<8x128xf32>
    %8 = tpu.matmul %4, %3, %cst {dimension_numbers = #tpu.dot_dimension_numbers<[1], [0], [0], [1], [0, 0, 1, 1], [], []>} : vector<8x128xf32>, vector<128x128xf32>, vector<8x128xf32> -> vector<8x128xf32>
    %9 = arith.addf %7, %8 : vector<8x128xf32>
    %10 = math.tanh %9 : vector<8x128xf32>
    %c0_7 = arith.constant 0 : index
    %c0_8 = arith.constant 0 : index
    %c0_9 = arith.constant 0 : index
    %11 = vector.load %arg5[%c0_7, %c0_8, %c0_9] : memref<3x128x128xf32, #tpu.memory_space<vmem>>, vector<1x128x128xf32>
    %12 = vector.shape_cast %11 : vector<1x128x128xf32> to vector<128x128xf32>
    %cst_10 = arith.constant dense<0.000000e+00> : vector<8x128xf32>
    %13 = tpu.matmul %10, %12, %cst_10 {dimension_numbers = #tpu.dot_dimension_numbers<[1], [0], [0], [1], [0, 0, 1, 1], [], []>} : vector<8x128xf32>, vector<128x128xf32>, vector<8x128xf32> -> vector<8x128xf32>
    %c0_11 = arith.constant 0 : index
    %c0_12 = arith.constant 0 : index
    %c0_13 = arith.constant 0 : index
    %14 = vector.load %arg6[%c0_11, %c0_12, %c0_13] : memref<3x1x128xf32, #tpu.memory_space<vmem>>, vector<1x1x128xf32>
    %15 = vector.shape_cast %14 : vector<1x1x128xf32> to vector<1x128xf32>
    %16 = vector.broadcast %15 : vector<1x128xf32> to vector<8x128xf32>
    %17 = arith.addf %13, %16 : vector<8x128xf32>
    %18 = math.tanh %17 : vector<8x128xf32>
    %19 = arith.addf %18, %10 : vector<8x128xf32>
    %c1 = arith.constant 1 : index
    %c0_14 = arith.constant 0 : index
    %c0_15 = arith.constant 0 : index
    %20 = vector.load %arg5[%c1, %c0_14, %c0_15] : memref<3x128x128xf32, #tpu.memory_space<vmem>>, vector<1x128x128xf32>
    %21 = vector.shape_cast %20 : vector<1x128x128xf32> to vector<128x128xf32>
    %cst_16 = arith.constant dense<0.000000e+00> : vector<8x128xf32>
    %22 = tpu.matmul %19, %21, %cst_16 {dimension_numbers = #tpu.dot_dimension_numbers<[1], [0], [0], [1], [0, 0, 1, 1], [], []>} : vector<8x128xf32>, vector<128x128xf32>, vector<8x128xf32> -> vector<8x128xf32>
    %c1_17 = arith.constant 1 : index
    %c0_18 = arith.constant 0 : index
    %c0_19 = arith.constant 0 : index
    %23 = vector.load %arg6[%c1_17, %c0_18, %c0_19] : memref<3x1x128xf32, #tpu.memory_space<vmem>>, vector<1x1x128xf32>
    %24 = vector.shape_cast %23 : vector<1x1x128xf32> to vector<1x128xf32>
    %25 = vector.broadcast %24 : vector<1x128xf32> to vector<8x128xf32>
    %26 = arith.addf %22, %25 : vector<8x128xf32>
    %27 = math.tanh %26 : vector<8x128xf32>
    %28 = arith.addf %27, %19 : vector<8x128xf32>
    %c2 = arith.constant 2 : index
    %c0_20 = arith.constant 0 : index
    %c0_21 = arith.constant 0 : index
    %29 = vector.load %arg5[%c2, %c0_20, %c0_21] : memref<3x128x128xf32, #tpu.memory_space<vmem>>, vector<1x128x128xf32>
    %30 = vector.shape_cast %29 : vector<1x128x128xf32> to vector<128x128xf32>
    %cst_22 = arith.constant dense<0.000000e+00> : vector<8x128xf32>
    %31 = tpu.matmul %28, %30, %cst_22 {dimension_numbers = #tpu.dot_dimension_numbers<[1], [0], [0], [1], [0, 0, 1, 1], [], []>} : vector<8x128xf32>, vector<128x128xf32>, vector<8x128xf32> -> vector<8x128xf32>
    %c2_23 = arith.constant 2 : index
    %c0_24 = arith.constant 0 : index
    %c0_25 = arith.constant 0 : index
    %32 = vector.load %arg6[%c2_23, %c0_24, %c0_25] : memref<3x1x128xf32, #tpu.memory_space<vmem>>, vector<1x1x128xf32>
    %33 = vector.shape_cast %32 : vector<1x1x128xf32> to vector<1x128xf32>
    %34 = vector.broadcast %33 : vector<1x128xf32> to vector<8x128xf32>
    %35 = arith.addf %31, %34 : vector<8x128xf32>
    %36 = math.tanh %35 : vector<8x128xf32>
    %37 = arith.addf %36, %28 : vector<8x128xf32>
    %c1_i32 = arith.constant 1 : i32
    %38 = arith.index_cast %c1_i32 : i32 to index
    %c0_26 = arith.constant 0 : index
    %c0_27 = arith.constant 0 : index
    %39 = vector.load %arg2[%38, %c0_26, %c0_27] : memref<12x8x128xf32, #tpu.memory_space<vmem>>, vector<1x8x128xf32>
    %40 = vector.shape_cast %39 : vector<1x8x128xf32> to vector<8x128xf32>
    %cst_28 = arith.constant dense<0.000000e+00> : vector<8x128xf32>
    %41 = tpu.matmul %37, %3, %cst_28 {dimension_numbers = #tpu.dot_dimension_numbers<[1], [0], [0], [1], [0, 0, 1, 1], [], []>} : vector<8x128xf32>, vector<128x128xf32>, vector<8x128xf32> -> vector<8x128xf32>
    %42 = arith.addf %40, %41 : vector<8x128xf32>
    %43 = math.tanh %42 : vector<8x128xf32>
    %c0_29 = arith.constant 0 : index
    %c0_30 = arith.constant 0 : index
    %c0_31 = arith.constant 0 : index
    %44 = vector.load %arg5[%c0_29, %c0_30, %c0_31] : memref<3x128x128xf32, #tpu.memory_space<vmem>>, vector<1x128x128xf32>
    %45 = vector.shape_cast %44 : vector<1x128x128xf32> to vector<128x128xf32>
    %cst_32 = arith.constant dense<0.000000e+00> : vector<8x128xf32>
    %46 = tpu.matmul %43, %45, %cst_32 {dimension_numbers = #tpu.dot_dimension_numbers<[1], [0], [0], [1], [0, 0, 1, 1], [], []>} : vector<8x128xf32>, vector<128x128xf32>, vector<8x128xf32> -> vector<8x128xf32>
    %c0_33 = arith.constant 0 : index
    %c0_34 = arith.constant 0 : index
    %c0_35 = arith.constant 0 : index
    %47 = vector.load %arg6[%c0_33, %c0_34, %c0_35] : memref<3x1x128xf32, #tpu.memory_space<vmem>>, vector<1x1x128xf32>
    %48 = vector.shape_cast %47 : vector<1x1x128xf32> to vector<1x128xf32>
    %49 = vector.broadcast %48 : vector<1x128xf32> to vector<8x128xf32>
    %50 = arith.addf %46, %49 : vector<8x128xf32>
    %51 = math.tanh %50 : vector<8x128xf32>
    %52 = arith.addf %51, %43 : vector<8x128xf32>
    %c1_36 = arith.constant 1 : index
    %c0_37 = arith.constant 0 : index
    %c0_38 = arith.constant 0 : index
    %53 = vector.load %arg5[%c1_36, %c0_37, %c0_38] : memref<3x128x128xf32, #tpu.memory_space<vmem>>, vector<1x128x128xf32>
    %54 = vector.shape_cast %53 : vector<1x128x128xf32> to vector<128x128xf32>
    %cst_39 = arith.constant dense<0.000000e+00> : vector<8x128xf32>
    %55 = tpu.matmul %52, %54, %cst_39 {dimension_numbers = #tpu.dot_dimension_numbers<[1], [0], [0], [1], [0, 0, 1, 1], [], []>} : vector<8x128xf32>, vector<128x128xf32>, vector<8x128xf32> -> vector<8x128xf32>
    %c1_40 = arith.constant 1 : index
    %c0_41 = arith.constant 0 : index
    %c0_42 = arith.constant 0 : index
    %56 = vector.load %arg6[%c1_40, %c0_41, %c0_42] : memref<3x1x128xf32, #tpu.memory_space<vmem>>, vector<1x1x128xf32>
    %57 = vector.shape_cast %56 : vector<1x1x128xf32> to vector<1x128xf32>
    %58 = vector.broadcast %57 : vector<1x128xf32> to vector<8x128xf32>
    %59 = arith.addf %55, %58 : vector<8x128xf32>
    %60 = math.tanh %59 : vector<8x128xf32>
    %61 = arith.addf %60, %52 : vector<8x128xf32>
    %c2_43 = arith.constant 2 : index
    %c0_44 = arith.constant 0 : index
    %c0_45 = arith.constant 0 : index
    %62 = vector.load %arg5[%c2_43, %c0_44, %c0_45] : memref<3x128x128xf32, #tpu.memory_space<vmem>>, vector<1x128x128xf32>
    %63 = vector.shape_cast %62 : vector<1x128x128xf32> to vector<128x128xf32>
    %cst_46 = arith.constant dense<0.000000e+00> : vector<8x128xf32>
    %64 = tpu.matmul %61, %63, %cst_46 {dimension_numbers = #tpu.dot_dimension_numbers<[1], [0], [0], [1], [0, 0, 1, 1], [], []>} : vector<8x128xf32>, vector<128x128xf32>, vector<8x128xf32> -> vector<8x128xf32>
    %c2_47 = arith.constant 2 : index
    %c0_48 = arith.constant 0 : index
    %c0_49 = arith.constant 0 : index
    %65 = vector.load %arg6[%c2_47, %c0_48, %c0_49] : memref<3x1x128xf32, #tpu.memory_space<vmem>>, vector<1x1x128xf32>
    %66 = vector.shape_cast %65 : vector<1x1x128xf32> to vector<1x128xf32>
    %67 = vector.broadcast %66 : vector<1x128xf32> to vector<8x128xf32>
    %68 = arith.addf %64, %67 : vector<8x128xf32>
    %69 = math.tanh %68 : vector<8x128xf32>
    %70 = arith.addf %69, %61 : vector<8x128xf32>
    %c2_i32 = arith.constant 2 : i32
    %71 = arith.index_cast %c2_i32 : i32 to index
    %c0_50 = arith.constant 0 : index
    %c0_51 = arith.constant 0 : index
    %72 = vector.load %arg2[%71, %c0_50, %c0_51] : memref<12x8x128xf32, #tpu.memory_space<vmem>>, vector<1x8x128xf32>
    %73 = vector.shape_cast %72 : vector<1x8x128xf32> to vector<8x128xf32>
    %cst_52 = arith.constant dense<0.000000e+00> : vector<8x128xf32>
    %74 = tpu.matmul %70, %3, %cst_52 {dimension_numbers = #tpu.dot_dimension_numbers<[1], [0], [0], [1], [0, 0, 1, 1], [], []>} : vector<8x128xf32>, vector<128x128xf32>, vector<8x128xf32> -> vector<8x128xf32>
    %75 = arith.addf %73, %74 : vector<8x128xf32>
    %76 = math.tanh %75 : vector<8x128xf32>
    %c0_53 = arith.constant 0 : index
    %c0_54 = arith.constant 0 : index
    %c0_55 = arith.constant 0 : index
    %77 = vector.load %arg5[%c0_53, %c0_54, %c0_55] : memref<3x128x128xf32, #tpu.memory_space<vmem>>, vector<1x128x128xf32>
    %78 = vector.shape_cast %77 : vector<1x128x128xf32> to vector<128x128xf32>
    %cst_56 = arith.constant dense<0.000000e+00> : vector<8x128xf32>
    %79 = tpu.matmul %76, %78, %cst_56 {dimension_numbers = #tpu.dot_dimension_numbers<[1], [0], [0], [1], [0, 0, 1, 1], [], []>} : vector<8x128xf32>, vector<128x128xf32>, vector<8x128xf32> -> vector<8x128xf32>
    %c0_57 = arith.constant 0 : index
    %c0_58 = arith.constant 0 : index
    %c0_59 = arith.constant 0 : index
    %80 = vector.load %arg6[%c0_57, %c0_58, %c0_59] : memref<3x1x128xf32, #tpu.memory_space<vmem>>, vector<1x1x128xf32>
    %81 = vector.shape_cast %80 : vector<1x1x128xf32> to vector<1x128xf32>
    %82 = vector.broadcast %81 : vector<1x128xf32> to vector<8x128xf32>
    %83 = arith.addf %79, %82 : vector<8x128xf32>
    %84 = math.tanh %83 : vector<8x128xf32>
    %85 = arith.addf %84, %76 : vector<8x128xf32>
    %c1_60 = arith.constant 1 : index
    %c0_61 = arith.constant 0 : index
    %c0_62 = arith.constant 0 : index
    %86 = vector.load %arg5[%c1_60, %c0_61, %c0_62] : memref<3x128x128xf32, #tpu.memory_space<vmem>>, vector<1x128x128xf32>
    %87 = vector.shape_cast %86 : vector<1x128x128xf32> to vector<128x128xf32>
    %cst_63 = arith.constant dense<0.000000e+00> : vector<8x128xf32>
    %88 = tpu.matmul %85, %87, %cst_63 {dimension_numbers = #tpu.dot_dimension_numbers<[1], [0], [0], [1], [0, 0, 1, 1], [], []>} : vector<8x128xf32>, vector<128x128xf32>, vector<8x128xf32> -> vector<8x128xf32>
    %c1_64 = arith.constant 1 : index
    %c0_65 = arith.constant 0 : index
    %c0_66 = arith.constant 0 : index
    %89 = vector.load %arg6[%c1_64, %c0_65, %c0_66] : memref<3x1x128xf32, #tpu.memory_space<vmem>>, vector<1x1x128xf32>
    %90 = vector.shape_cast %89 : vector<1x1x128xf32> to vector<1x128xf32>
    %91 = vector.broadcast %90 : vector<1x128xf32> to vector<8x128xf32>
    %92 = arith.addf %88, %91 : vector<8x128xf32>
    %93 = math.tanh %92 : vector<8x128xf32>
    %94 = arith.addf %93, %85 : vector<8x128xf32>
    %c2_67 = arith.constant 2 : index
    %c0_68 = arith.constant 0 : index
    %c0_69 = arith.constant 0 : index
    %95 = vector.load %arg5[%c2_67, %c0_68, %c0_69] : memref<3x128x128xf32, #tpu.memory_space<vmem>>, vector<1x128x128xf32>
    %96 = vector.shape_cast %95 : vector<1x128x128xf32> to vector<128x128xf32>
    %cst_70 = arith.constant dense<0.000000e+00> : vector<8x128xf32>
    %97 = tpu.matmul %94, %96, %cst_70 {dimension_numbers = #tpu.dot_dimension_numbers<[1], [0], [0], [1], [0, 0, 1, 1], [], []>} : vector<8x128xf32>, vector<128x128xf32>, vector<8x128xf32> -> vector<8x128xf32>
    %c2_71 = arith.constant 2 : index
    %c0_72 = arith.constant 0 : index
    %c0_73 = arith.constant 0 : index
    %98 = vector.load %arg6[%c2_71, %c0_72, %c0_73] : memref<3x1x128xf32, #tpu.memory_space<vmem>>, vector<1x1x128xf32>
    %99 = vector.shape_cast %98 : vector<1x1x128xf32> to vector<1x128xf32>
    %100 = vector.broadcast %99 : vector<1x128xf32> to vector<8x128xf32>
    %101 = arith.addf %97, %100 : vector<8x128xf32>
    %102 = math.tanh %101 : vector<8x128xf32>
    %103 = arith.addf %102, %94 : vector<8x128xf32>
    %c3_i32 = arith.constant 3 : i32
    %104 = arith.index_cast %c3_i32 : i32 to index
    %c0_74 = arith.constant 0 : index
    %c0_75 = arith.constant 0 : index
    %105 = vector.load %arg2[%104, %c0_74, %c0_75] : memref<12x8x128xf32, #tpu.memory_space<vmem>>, vector<1x8x128xf32>
    %106 = vector.shape_cast %105 : vector<1x8x128xf32> to vector<8x128xf32>
    %cst_76 = arith.constant dense<0.000000e+00> : vector<8x128xf32>
    %107 = tpu.matmul %103, %3, %cst_76 {dimension_numbers = #tpu.dot_dimension_numbers<[1], [0], [0], [1], [0, 0, 1, 1], [], []>} : vector<8x128xf32>, vector<128x128xf32>, vector<8x128xf32> -> vector<8x128xf32>
    %108 = arith.addf %106, %107 : vector<8x128xf32>
    %109 = math.tanh %108 : vector<8x128xf32>
    %c0_77 = arith.constant 0 : index
    %c0_78 = arith.constant 0 : index
    %c0_79 = arith.constant 0 : index
    %110 = vector.load %arg5[%c0_77, %c0_78, %c0_79] : memref<3x128x128xf32, #tpu.memory_space<vmem>>, vector<1x128x128xf32>
    %111 = vector.shape_cast %110 : vector<1x128x128xf32> to vector<128x128xf32>
    %cst_80 = arith.constant dense<0.000000e+00> : vector<8x128xf32>
    %112 = tpu.matmul %109, %111, %cst_80 {dimension_numbers = #tpu.dot_dimension_numbers<[1], [0], [0], [1], [0, 0, 1, 1], [], []>} : vector<8x128xf32>, vector<128x128xf32>, vector<8x128xf32> -> vector<8x128xf32>
    %c0_81 = arith.constant 0 : index
    %c0_82 = arith.constant 0 : index
    %c0_83 = arith.constant 0 : index
    %113 = vector.load %arg6[%c0_81, %c0_82, %c0_83] : memref<3x1x128xf32, #tpu.memory_space<vmem>>, vector<1x1x128xf32>
    %114 = vector.shape_cast %113 : vector<1x1x128xf32> to vector<1x128xf32>
    %115 = vector.broadcast %114 : vector<1x128xf32> to vector<8x128xf32>
    %116 = arith.addf %112, %115 : vector<8x128xf32>
    %117 = math.tanh %116 : vector<8x128xf32>
    %118 = arith.addf %117, %109 : vector<8x128xf32>
    %c1_84 = arith.constant 1 : index
    %c0_85 = arith.constant 0 : index
    %c0_86 = arith.constant 0 : index
    %119 = vector.load %arg5[%c1_84, %c0_85, %c0_86] : memref<3x128x128xf32, #tpu.memory_space<vmem>>, vector<1x128x128xf32>
    %120 = vector.shape_cast %119 : vector<1x128x128xf32> to vector<128x128xf32>
    %cst_87 = arith.constant dense<0.000000e+00> : vector<8x128xf32>
    %121 = tpu.matmul %118, %120, %cst_87 {dimension_numbers = #tpu.dot_dimension_numbers<[1], [0], [0], [1], [0, 0, 1, 1], [], []>} : vector<8x128xf32>, vector<128x128xf32>, vector<8x128xf32> -> vector<8x128xf32>
    %c1_88 = arith.constant 1 : index
    %c0_89 = arith.constant 0 : index
    %c0_90 = arith.constant 0 : index
    %122 = vector.load %arg6[%c1_88, %c0_89, %c0_90] : memref<3x1x128xf32, #tpu.memory_space<vmem>>, vector<1x1x128xf32>
    %123 = vector.shape_cast %122 : vector<1x1x128xf32> to vector<1x128xf32>
    %124 = vector.broadcast %123 : vector<1x128xf32> to vector<8x128xf32>
    %125 = arith.addf %121, %124 : vector<8x128xf32>
    %126 = math.tanh %125 : vector<8x128xf32>
    %127 = arith.addf %126, %118 : vector<8x128xf32>
    %c2_91 = arith.constant 2 : index
    %c0_92 = arith.constant 0 : index
    %c0_93 = arith.constant 0 : index
    %128 = vector.load %arg5[%c2_91, %c0_92, %c0_93] : memref<3x128x128xf32, #tpu.memory_space<vmem>>, vector<1x128x128xf32>
    %129 = vector.shape_cast %128 : vector<1x128x128xf32> to vector<128x128xf32>
    %cst_94 = arith.constant dense<0.000000e+00> : vector<8x128xf32>
    %130 = tpu.matmul %127, %129, %cst_94 {dimension_numbers = #tpu.dot_dimension_numbers<[1], [0], [0], [1], [0, 0, 1, 1], [], []>} : vector<8x128xf32>, vector<128x128xf32>, vector<8x128xf32> -> vector<8x128xf32>
    %c2_95 = arith.constant 2 : index
    %c0_96 = arith.constant 0 : index
    %c0_97 = arith.constant 0 : index
    %131 = vector.load %arg6[%c2_95, %c0_96, %c0_97] : memref<3x1x128xf32, #tpu.memory_space<vmem>>, vector<1x1x128xf32>
    %132 = vector.shape_cast %131 : vector<1x1x128xf32> to vector<1x128xf32>
    %133 = vector.broadcast %132 : vector<1x128xf32> to vector<8x128xf32>
    %134 = arith.addf %130, %133 : vector<8x128xf32>
    %135 = math.tanh %134 : vector<8x128xf32>
    %136 = arith.addf %135, %127 : vector<8x128xf32>
    %c4_i32 = arith.constant 4 : i32
    %137 = arith.index_cast %c4_i32 : i32 to index
    %c0_98 = arith.constant 0 : index
    %c0_99 = arith.constant 0 : index
    %138 = vector.load %arg2[%137, %c0_98, %c0_99] : memref<12x8x128xf32, #tpu.memory_space<vmem>>, vector<1x8x128xf32>
    %139 = vector.shape_cast %138 : vector<1x8x128xf32> to vector<8x128xf32>
    %cst_100 = arith.constant dense<0.000000e+00> : vector<8x128xf32>
    %140 = tpu.matmul %136, %3, %cst_100 {dimension_numbers = #tpu.dot_dimension_numbers<[1], [0], [0], [1], [0, 0, 1, 1], [], []>} : vector<8x128xf32>, vector<128x128xf32>, vector<8x128xf32> -> vector<8x128xf32>
    %141 = arith.addf %139, %140 : vector<8x128xf32>
    %142 = math.tanh %141 : vector<8x128xf32>
    %c0_101 = arith.constant 0 : index
    %c0_102 = arith.constant 0 : index
    %c0_103 = arith.constant 0 : index
    %143 = vector.load %arg5[%c0_101, %c0_102, %c0_103] : memref<3x128x128xf32, #tpu.memory_space<vmem>>, vector<1x128x128xf32>
    %144 = vector.shape_cast %143 : vector<1x128x128xf32> to vector<128x128xf32>
    %cst_104 = arith.constant dense<0.000000e+00> : vector<8x128xf32>
    %145 = tpu.matmul %142, %144, %cst_104 {dimension_numbers = #tpu.dot_dimension_numbers<[1], [0], [0], [1], [0, 0, 1, 1], [], []>} : vector<8x128xf32>, vector<128x128xf32>, vector<8x128xf32> -> vector<8x128xf32>
    %c0_105 = arith.constant 0 : index
    %c0_106 = arith.constant 0 : index
    %c0_107 = arith.constant 0 : index
    %146 = vector.load %arg6[%c0_105, %c0_106, %c0_107] : memref<3x1x128xf32, #tpu.memory_space<vmem>>, vector<1x1x128xf32>
    %147 = vector.shape_cast %146 : vector<1x1x128xf32> to vector<1x128xf32>
    %148 = vector.broadcast %147 : vector<1x128xf32> to vector<8x128xf32>
    %149 = arith.addf %145, %148 : vector<8x128xf32>
    %150 = math.tanh %149 : vector<8x128xf32>
    %151 = arith.addf %150, %142 : vector<8x128xf32>
    %c1_108 = arith.constant 1 : index
    %c0_109 = arith.constant 0 : index
    %c0_110 = arith.constant 0 : index
    %152 = vector.load %arg5[%c1_108, %c0_109, %c0_110] : memref<3x128x128xf32, #tpu.memory_space<vmem>>, vector<1x128x128xf32>
    %153 = vector.shape_cast %152 : vector<1x128x128xf32> to vector<128x128xf32>
    %cst_111 = arith.constant dense<0.000000e+00> : vector<8x128xf32>
    %154 = tpu.matmul %151, %153, %cst_111 {dimension_numbers = #tpu.dot_dimension_numbers<[1], [0], [0], [1], [0, 0, 1, 1], [], []>} : vector<8x128xf32>, vector<128x128xf32>, vector<8x128xf32> -> vector<8x128xf32>
    %c1_112 = arith.constant 1 : index
    %c0_113 = arith.constant 0 : index
    %c0_114 = arith.constant 0 : index
    %155 = vector.load %arg6[%c1_112, %c0_113, %c0_114] : memref<3x1x128xf32, #tpu.memory_space<vmem>>, vector<1x1x128xf32>
    %156 = vector.shape_cast %155 : vector<1x1x128xf32> to vector<1x128xf32>
    %157 = vector.broadcast %156 : vector<1x128xf32> to vector<8x128xf32>
    %158 = arith.addf %154, %157 : vector<8x128xf32>
    %159 = math.tanh %158 : vector<8x128xf32>
    %160 = arith.addf %159, %151 : vector<8x128xf32>
    %c2_115 = arith.constant 2 : index
    %c0_116 = arith.constant 0 : index
    %c0_117 = arith.constant 0 : index
    %161 = vector.load %arg5[%c2_115, %c0_116, %c0_117] : memref<3x128x128xf32, #tpu.memory_space<vmem>>, vector<1x128x128xf32>
    %162 = vector.shape_cast %161 : vector<1x128x128xf32> to vector<128x128xf32>
    %cst_118 = arith.constant dense<0.000000e+00> : vector<8x128xf32>
    %163 = tpu.matmul %160, %162, %cst_118 {dimension_numbers = #tpu.dot_dimension_numbers<[1], [0], [0], [1], [0, 0, 1, 1], [], []>} : vector<8x128xf32>, vector<128x128xf32>, vector<8x128xf32> -> vector<8x128xf32>
    %c2_119 = arith.constant 2 : index
    %c0_120 = arith.constant 0 : index
    %c0_121 = arith.constant 0 : index
    %164 = vector.load %arg6[%c2_119, %c0_120, %c0_121] : memref<3x1x128xf32, #tpu.memory_space<vmem>>, vector<1x1x128xf32>
    %165 = vector.shape_cast %164 : vector<1x1x128xf32> to vector<1x128xf32>
    %166 = vector.broadcast %165 : vector<1x128xf32> to vector<8x128xf32>
    %167 = arith.addf %163, %166 : vector<8x128xf32>
    %168 = math.tanh %167 : vector<8x128xf32>
    %169 = arith.addf %168, %160 : vector<8x128xf32>
    %c5_i32 = arith.constant 5 : i32
    %170 = arith.index_cast %c5_i32 : i32 to index
    %c0_122 = arith.constant 0 : index
    %c0_123 = arith.constant 0 : index
    %171 = vector.load %arg2[%170, %c0_122, %c0_123] : memref<12x8x128xf32, #tpu.memory_space<vmem>>, vector<1x8x128xf32>
    %172 = vector.shape_cast %171 : vector<1x8x128xf32> to vector<8x128xf32>
    %cst_124 = arith.constant dense<0.000000e+00> : vector<8x128xf32>
    %173 = tpu.matmul %169, %3, %cst_124 {dimension_numbers = #tpu.dot_dimension_numbers<[1], [0], [0], [1], [0, 0, 1, 1], [], []>} : vector<8x128xf32>, vector<128x128xf32>, vector<8x128xf32> -> vector<8x128xf32>
    %174 = arith.addf %172, %173 : vector<8x128xf32>
    %175 = math.tanh %174 : vector<8x128xf32>
    %c0_125 = arith.constant 0 : index
    %c0_126 = arith.constant 0 : index
    %c0_127 = arith.constant 0 : index
    %176 = vector.load %arg5[%c0_125, %c0_126, %c0_127] : memref<3x128x128xf32, #tpu.memory_space<vmem>>, vector<1x128x128xf32>
    %177 = vector.shape_cast %176 : vector<1x128x128xf32> to vector<128x128xf32>
    %cst_128 = arith.constant dense<0.000000e+00> : vector<8x128xf32>
    %178 = tpu.matmul %175, %177, %cst_128 {dimension_numbers = #tpu.dot_dimension_numbers<[1], [0], [0], [1], [0, 0, 1, 1], [], []>} : vector<8x128xf32>, vector<128x128xf32>, vector<8x128xf32> -> vector<8x128xf32>
    %c0_129 = arith.constant 0 : index
    %c0_130 = arith.constant 0 : index
    %c0_131 = arith.constant 0 : index
    %179 = vector.load %arg6[%c0_129, %c0_130, %c0_131] : memref<3x1x128xf32, #tpu.memory_space<vmem>>, vector<1x1x128xf32>
    %180 = vector.shape_cast %179 : vector<1x1x128xf32> to vector<1x128xf32>
    %181 = vector.broadcast %180 : vector<1x128xf32> to vector<8x128xf32>
    %182 = arith.addf %178, %181 : vector<8x128xf32>
    %183 = math.tanh %182 : vector<8x128xf32>
    %184 = arith.addf %183, %175 : vector<8x128xf32>
    %c1_132 = arith.constant 1 : index
    %c0_133 = arith.constant 0 : index
    %c0_134 = arith.constant 0 : index
    %185 = vector.load %arg5[%c1_132, %c0_133, %c0_134] : memref<3x128x128xf32, #tpu.memory_space<vmem>>, vector<1x128x128xf32>
    %186 = vector.shape_cast %185 : vector<1x128x128xf32> to vector<128x128xf32>
    %cst_135 = arith.constant dense<0.000000e+00> : vector<8x128xf32>
    %187 = tpu.matmul %184, %186, %cst_135 {dimension_numbers = #tpu.dot_dimension_numbers<[1], [0], [0], [1], [0, 0, 1, 1], [], []>} : vector<8x128xf32>, vector<128x128xf32>, vector<8x128xf32> -> vector<8x128xf32>
    %c1_136 = arith.constant 1 : index
    %c0_137 = arith.constant 0 : index
    %c0_138 = arith.constant 0 : index
    %188 = vector.load %arg6[%c1_136, %c0_137, %c0_138] : memref<3x1x128xf32, #tpu.memory_space<vmem>>, vector<1x1x128xf32>
    %189 = vector.shape_cast %188 : vector<1x1x128xf32> to vector<1x128xf32>
    %190 = vector.broadcast %189 : vector<1x128xf32> to vector<8x128xf32>
    %191 = arith.addf %187, %190 : vector<8x128xf32>
    %192 = math.tanh %191 : vector<8x128xf32>
    %193 = arith.addf %192, %184 : vector<8x128xf32>
    %c2_139 = arith.constant 2 : index
    %c0_140 = arith.constant 0 : index
    %c0_141 = arith.constant 0 : index
    %194 = vector.load %arg5[%c2_139, %c0_140, %c0_141] : memref<3x128x128xf32, #tpu.memory_space<vmem>>, vector<1x128x128xf32>
    %195 = vector.shape_cast %194 : vector<1x128x128xf32> to vector<128x128xf32>
    %cst_142 = arith.constant dense<0.000000e+00> : vector<8x128xf32>
    %196 = tpu.matmul %193, %195, %cst_142 {dimension_numbers = #tpu.dot_dimension_numbers<[1], [0], [0], [1], [0, 0, 1, 1], [], []>} : vector<8x128xf32>, vector<128x128xf32>, vector<8x128xf32> -> vector<8x128xf32>
    %c2_143 = arith.constant 2 : index
    %c0_144 = arith.constant 0 : index
    %c0_145 = arith.constant 0 : index
    %197 = vector.load %arg6[%c2_143, %c0_144, %c0_145] : memref<3x1x128xf32, #tpu.memory_space<vmem>>, vector<1x1x128xf32>
    %198 = vector.shape_cast %197 : vector<1x1x128xf32> to vector<1x128xf32>
    %199 = vector.broadcast %198 : vector<1x128xf32> to vector<8x128xf32>
    %200 = arith.addf %196, %199 : vector<8x128xf32>
    %201 = math.tanh %200 : vector<8x128xf32>
    %202 = arith.addf %201, %193 : vector<8x128xf32>
    %c6_i32 = arith.constant 6 : i32
    %203 = arith.index_cast %c6_i32 : i32 to index
    %c0_146 = arith.constant 0 : index
    %c0_147 = arith.constant 0 : index
    %204 = vector.load %arg2[%203, %c0_146, %c0_147] : memref<12x8x128xf32, #tpu.memory_space<vmem>>, vector<1x8x128xf32>
    %205 = vector.shape_cast %204 : vector<1x8x128xf32> to vector<8x128xf32>
    %cst_148 = arith.constant dense<0.000000e+00> : vector<8x128xf32>
    %206 = tpu.matmul %202, %3, %cst_148 {dimension_numbers = #tpu.dot_dimension_numbers<[1], [0], [0], [1], [0, 0, 1, 1], [], []>} : vector<8x128xf32>, vector<128x128xf32>, vector<8x128xf32> -> vector<8x128xf32>
    %207 = arith.addf %205, %206 : vector<8x128xf32>
    %208 = math.tanh %207 : vector<8x128xf32>
    %c0_149 = arith.constant 0 : index
    %c0_150 = arith.constant 0 : index
    %c0_151 = arith.constant 0 : index
    %209 = vector.load %arg5[%c0_149, %c0_150, %c0_151] : memref<3x128x128xf32, #tpu.memory_space<vmem>>, vector<1x128x128xf32>
    %210 = vector.shape_cast %209 : vector<1x128x128xf32> to vector<128x128xf32>
    %cst_152 = arith.constant dense<0.000000e+00> : vector<8x128xf32>
    %211 = tpu.matmul %208, %210, %cst_152 {dimension_numbers = #tpu.dot_dimension_numbers<[1], [0], [0], [1], [0, 0, 1, 1], [], []>} : vector<8x128xf32>, vector<128x128xf32>, vector<8x128xf32> -> vector<8x128xf32>
    %c0_153 = arith.constant 0 : index
    %c0_154 = arith.constant 0 : index
    %c0_155 = arith.constant 0 : index
    %212 = vector.load %arg6[%c0_153, %c0_154, %c0_155] : memref<3x1x128xf32, #tpu.memory_space<vmem>>, vector<1x1x128xf32>
    %213 = vector.shape_cast %212 : vector<1x1x128xf32> to vector<1x128xf32>
    %214 = vector.broadcast %213 : vector<1x128xf32> to vector<8x128xf32>
    %215 = arith.addf %211, %214 : vector<8x128xf32>
    %216 = math.tanh %215 : vector<8x128xf32>
    %217 = arith.addf %216, %208 : vector<8x128xf32>
    %c1_156 = arith.constant 1 : index
    %c0_157 = arith.constant 0 : index
    %c0_158 = arith.constant 0 : index
    %218 = vector.load %arg5[%c1_156, %c0_157, %c0_158] : memref<3x128x128xf32, #tpu.memory_space<vmem>>, vector<1x128x128xf32>
    %219 = vector.shape_cast %218 : vector<1x128x128xf32> to vector<128x128xf32>
    %cst_159 = arith.constant dense<0.000000e+00> : vector<8x128xf32>
    %220 = tpu.matmul %217, %219, %cst_159 {dimension_numbers = #tpu.dot_dimension_numbers<[1], [0], [0], [1], [0, 0, 1, 1], [], []>} : vector<8x128xf32>, vector<128x128xf32>, vector<8x128xf32> -> vector<8x128xf32>
    %c1_160 = arith.constant 1 : index
    %c0_161 = arith.constant 0 : index
    %c0_162 = arith.constant 0 : index
    %221 = vector.load %arg6[%c1_160, %c0_161, %c0_162] : memref<3x1x128xf32, #tpu.memory_space<vmem>>, vector<1x1x128xf32>
    %222 = vector.shape_cast %221 : vector<1x1x128xf32> to vector<1x128xf32>
    %223 = vector.broadcast %222 : vector<1x128xf32> to vector<8x128xf32>
    %224 = arith.addf %220, %223 : vector<8x128xf32>
    %225 = math.tanh %224 : vector<8x128xf32>
    %226 = arith.addf %225, %217 : vector<8x128xf32>
    %c2_163 = arith.constant 2 : index
    %c0_164 = arith.constant 0 : index
    %c0_165 = arith.constant 0 : index
    %227 = vector.load %arg5[%c2_163, %c0_164, %c0_165] : memref<3x128x128xf32, #tpu.memory_space<vmem>>, vector<1x128x128xf32>
    %228 = vector.shape_cast %227 : vector<1x128x128xf32> to vector<128x128xf32>
    %cst_166 = arith.constant dense<0.000000e+00> : vector<8x128xf32>
    %229 = tpu.matmul %226, %228, %cst_166 {dimension_numbers = #tpu.dot_dimension_numbers<[1], [0], [0], [1], [0, 0, 1, 1], [], []>} : vector<8x128xf32>, vector<128x128xf32>, vector<8x128xf32> -> vector<8x128xf32>
    %c2_167 = arith.constant 2 : index
    %c0_168 = arith.constant 0 : index
    %c0_169 = arith.constant 0 : index
    %230 = vector.load %arg6[%c2_167, %c0_168, %c0_169] : memref<3x1x128xf32, #tpu.memory_space<vmem>>, vector<1x1x128xf32>
    %231 = vector.shape_cast %230 : vector<1x1x128xf32> to vector<1x128xf32>
    %232 = vector.broadcast %231 : vector<1x128xf32> to vector<8x128xf32>
    %233 = arith.addf %229, %232 : vector<8x128xf32>
    %234 = math.tanh %233 : vector<8x128xf32>
    %235 = arith.addf %234, %226 : vector<8x128xf32>
    %c7_i32 = arith.constant 7 : i32
    %236 = arith.index_cast %c7_i32 : i32 to index
    %c0_170 = arith.constant 0 : index
    %c0_171 = arith.constant 0 : index
    %237 = vector.load %arg2[%236, %c0_170, %c0_171] : memref<12x8x128xf32, #tpu.memory_space<vmem>>, vector<1x8x128xf32>
    %238 = vector.shape_cast %237 : vector<1x8x128xf32> to vector<8x128xf32>
    %cst_172 = arith.constant dense<0.000000e+00> : vector<8x128xf32>
    %239 = tpu.matmul %235, %3, %cst_172 {dimension_numbers = #tpu.dot_dimension_numbers<[1], [0], [0], [1], [0, 0, 1, 1], [], []>} : vector<8x128xf32>, vector<128x128xf32>, vector<8x128xf32> -> vector<8x128xf32>
    %240 = arith.addf %238, %239 : vector<8x128xf32>
    %241 = math.tanh %240 : vector<8x128xf32>
    %c0_173 = arith.constant 0 : index
    %c0_174 = arith.constant 0 : index
    %c0_175 = arith.constant 0 : index
    %242 = vector.load %arg5[%c0_173, %c0_174, %c0_175] : memref<3x128x128xf32, #tpu.memory_space<vmem>>, vector<1x128x128xf32>
    %243 = vector.shape_cast %242 : vector<1x128x128xf32> to vector<128x128xf32>
    %cst_176 = arith.constant dense<0.000000e+00> : vector<8x128xf32>
    %244 = tpu.matmul %241, %243, %cst_176 {dimension_numbers = #tpu.dot_dimension_numbers<[1], [0], [0], [1], [0, 0, 1, 1], [], []>} : vector<8x128xf32>, vector<128x128xf32>, vector<8x128xf32> -> vector<8x128xf32>
    %c0_177 = arith.constant 0 : index
    %c0_178 = arith.constant 0 : index
    %c0_179 = arith.constant 0 : index
    %245 = vector.load %arg6[%c0_177, %c0_178, %c0_179] : memref<3x1x128xf32, #tpu.memory_space<vmem>>, vector<1x1x128xf32>
    %246 = vector.shape_cast %245 : vector<1x1x128xf32> to vector<1x128xf32>
    %247 = vector.broadcast %246 : vector<1x128xf32> to vector<8x128xf32>
    %248 = arith.addf %244, %247 : vector<8x128xf32>
    %249 = math.tanh %248 : vector<8x128xf32>
    %250 = arith.addf %249, %241 : vector<8x128xf32>
    %c1_180 = arith.constant 1 : index
    %c0_181 = arith.constant 0 : index
    %c0_182 = arith.constant 0 : index
    %251 = vector.load %arg5[%c1_180, %c0_181, %c0_182] : memref<3x128x128xf32, #tpu.memory_space<vmem>>, vector<1x128x128xf32>
    %252 = vector.shape_cast %251 : vector<1x128x128xf32> to vector<128x128xf32>
    %cst_183 = arith.constant dense<0.000000e+00> : vector<8x128xf32>
    %253 = tpu.matmul %250, %252, %cst_183 {dimension_numbers = #tpu.dot_dimension_numbers<[1], [0], [0], [1], [0, 0, 1, 1], [], []>} : vector<8x128xf32>, vector<128x128xf32>, vector<8x128xf32> -> vector<8x128xf32>
    %c1_184 = arith.constant 1 : index
    %c0_185 = arith.constant 0 : index
    %c0_186 = arith.constant 0 : index
    %254 = vector.load %arg6[%c1_184, %c0_185, %c0_186] : memref<3x1x128xf32, #tpu.memory_space<vmem>>, vector<1x1x128xf32>
    %255 = vector.shape_cast %254 : vector<1x1x128xf32> to vector<1x128xf32>
    %256 = vector.broadcast %255 : vector<1x128xf32> to vector<8x128xf32>
    %257 = arith.addf %253, %256 : vector<8x128xf32>
    %258 = math.tanh %257 : vector<8x128xf32>
    %259 = arith.addf %258, %250 : vector<8x128xf32>
    %c2_187 = arith.constant 2 : index
    %c0_188 = arith.constant 0 : index
    %c0_189 = arith.constant 0 : index
    %260 = vector.load %arg5[%c2_187, %c0_188, %c0_189] : memref<3x128x128xf32, #tpu.memory_space<vmem>>, vector<1x128x128xf32>
    %261 = vector.shape_cast %260 : vector<1x128x128xf32> to vector<128x128xf32>
    %cst_190 = arith.constant dense<0.000000e+00> : vector<8x128xf32>
    %262 = tpu.matmul %259, %261, %cst_190 {dimension_numbers = #tpu.dot_dimension_numbers<[1], [0], [0], [1], [0, 0, 1, 1], [], []>} : vector<8x128xf32>, vector<128x128xf32>, vector<8x128xf32> -> vector<8x128xf32>
    %c2_191 = arith.constant 2 : index
    %c0_192 = arith.constant 0 : index
    %c0_193 = arith.constant 0 : index
    %263 = vector.load %arg6[%c2_191, %c0_192, %c0_193] : memref<3x1x128xf32, #tpu.memory_space<vmem>>, vector<1x1x128xf32>
    %264 = vector.shape_cast %263 : vector<1x1x128xf32> to vector<1x128xf32>
    %265 = vector.broadcast %264 : vector<1x128xf32> to vector<8x128xf32>
    %266 = arith.addf %262, %265 : vector<8x128xf32>
    %267 = math.tanh %266 : vector<8x128xf32>
    %268 = arith.addf %267, %259 : vector<8x128xf32>
    %c8_i32 = arith.constant 8 : i32
    %269 = arith.index_cast %c8_i32 : i32 to index
    %c0_194 = arith.constant 0 : index
    %c0_195 = arith.constant 0 : index
    %270 = vector.load %arg2[%269, %c0_194, %c0_195] : memref<12x8x128xf32, #tpu.memory_space<vmem>>, vector<1x8x128xf32>
    %271 = vector.shape_cast %270 : vector<1x8x128xf32> to vector<8x128xf32>
    %cst_196 = arith.constant dense<0.000000e+00> : vector<8x128xf32>
    %272 = tpu.matmul %268, %3, %cst_196 {dimension_numbers = #tpu.dot_dimension_numbers<[1], [0], [0], [1], [0, 0, 1, 1], [], []>} : vector<8x128xf32>, vector<128x128xf32>, vector<8x128xf32> -> vector<8x128xf32>
    %273 = arith.addf %271, %272 : vector<8x128xf32>
    %274 = math.tanh %273 : vector<8x128xf32>
    %c0_197 = arith.constant 0 : index
    %c0_198 = arith.constant 0 : index
    %c0_199 = arith.constant 0 : index
    %275 = vector.load %arg5[%c0_197, %c0_198, %c0_199] : memref<3x128x128xf32, #tpu.memory_space<vmem>>, vector<1x128x128xf32>
    %276 = vector.shape_cast %275 : vector<1x128x128xf32> to vector<128x128xf32>
    %cst_200 = arith.constant dense<0.000000e+00> : vector<8x128xf32>
    %277 = tpu.matmul %274, %276, %cst_200 {dimension_numbers = #tpu.dot_dimension_numbers<[1], [0], [0], [1], [0, 0, 1, 1], [], []>} : vector<8x128xf32>, vector<128x128xf32>, vector<8x128xf32> -> vector<8x128xf32>
    %c0_201 = arith.constant 0 : index
    %c0_202 = arith.constant 0 : index
    %c0_203 = arith.constant 0 : index
    %278 = vector.load %arg6[%c0_201, %c0_202, %c0_203] : memref<3x1x128xf32, #tpu.memory_space<vmem>>, vector<1x1x128xf32>
    %279 = vector.shape_cast %278 : vector<1x1x128xf32> to vector<1x128xf32>
    %280 = vector.broadcast %279 : vector<1x128xf32> to vector<8x128xf32>
    %281 = arith.addf %277, %280 : vector<8x128xf32>
    %282 = math.tanh %281 : vector<8x128xf32>
    %283 = arith.addf %282, %274 : vector<8x128xf32>
    %c1_204 = arith.constant 1 : index
    %c0_205 = arith.constant 0 : index
    %c0_206 = arith.constant 0 : index
    %284 = vector.load %arg5[%c1_204, %c0_205, %c0_206] : memref<3x128x128xf32, #tpu.memory_space<vmem>>, vector<1x128x128xf32>
    %285 = vector.shape_cast %284 : vector<1x128x128xf32> to vector<128x128xf32>
    %cst_207 = arith.constant dense<0.000000e+00> : vector<8x128xf32>
    %286 = tpu.matmul %283, %285, %cst_207 {dimension_numbers = #tpu.dot_dimension_numbers<[1], [0], [0], [1], [0, 0, 1, 1], [], []>} : vector<8x128xf32>, vector<128x128xf32>, vector<8x128xf32> -> vector<8x128xf32>
    %c1_208 = arith.constant 1 : index
    %c0_209 = arith.constant 0 : index
    %c0_210 = arith.constant 0 : index
    %287 = vector.load %arg6[%c1_208, %c0_209, %c0_210] : memref<3x1x128xf32, #tpu.memory_space<vmem>>, vector<1x1x128xf32>
    %288 = vector.shape_cast %287 : vector<1x1x128xf32> to vector<1x128xf32>
    %289 = vector.broadcast %288 : vector<1x128xf32> to vector<8x128xf32>
    %290 = arith.addf %286, %289 : vector<8x128xf32>
    %291 = math.tanh %290 : vector<8x128xf32>
    %292 = arith.addf %291, %283 : vector<8x128xf32>
    %c2_211 = arith.constant 2 : index
    %c0_212 = arith.constant 0 : index
    %c0_213 = arith.constant 0 : index
    %293 = vector.load %arg5[%c2_211, %c0_212, %c0_213] : memref<3x128x128xf32, #tpu.memory_space<vmem>>, vector<1x128x128xf32>
    %294 = vector.shape_cast %293 : vector<1x128x128xf32> to vector<128x128xf32>
    %cst_214 = arith.constant dense<0.000000e+00> : vector<8x128xf32>
    %295 = tpu.matmul %292, %294, %cst_214 {dimension_numbers = #tpu.dot_dimension_numbers<[1], [0], [0], [1], [0, 0, 1, 1], [], []>} : vector<8x128xf32>, vector<128x128xf32>, vector<8x128xf32> -> vector<8x128xf32>
    %c2_215 = arith.constant 2 : index
    %c0_216 = arith.constant 0 : index
    %c0_217 = arith.constant 0 : index
    %296 = vector.load %arg6[%c2_215, %c0_216, %c0_217] : memref<3x1x128xf32, #tpu.memory_space<vmem>>, vector<1x1x128xf32>
    %297 = vector.shape_cast %296 : vector<1x1x128xf32> to vector<1x128xf32>
    %298 = vector.broadcast %297 : vector<1x128xf32> to vector<8x128xf32>
    %299 = arith.addf %295, %298 : vector<8x128xf32>
    %300 = math.tanh %299 : vector<8x128xf32>
    %301 = arith.addf %300, %292 : vector<8x128xf32>
    %c9_i32 = arith.constant 9 : i32
    %302 = arith.index_cast %c9_i32 : i32 to index
    %c0_218 = arith.constant 0 : index
    %c0_219 = arith.constant 0 : index
    %303 = vector.load %arg2[%302, %c0_218, %c0_219] : memref<12x8x128xf32, #tpu.memory_space<vmem>>, vector<1x8x128xf32>
    %304 = vector.shape_cast %303 : vector<1x8x128xf32> to vector<8x128xf32>
    %cst_220 = arith.constant dense<0.000000e+00> : vector<8x128xf32>
    %305 = tpu.matmul %301, %3, %cst_220 {dimension_numbers = #tpu.dot_dimension_numbers<[1], [0], [0], [1], [0, 0, 1, 1], [], []>} : vector<8x128xf32>, vector<128x128xf32>, vector<8x128xf32> -> vector<8x128xf32>
    %306 = arith.addf %304, %305 : vector<8x128xf32>
    %307 = math.tanh %306 : vector<8x128xf32>
    %c0_221 = arith.constant 0 : index
    %c0_222 = arith.constant 0 : index
    %c0_223 = arith.constant 0 : index
    %308 = vector.load %arg5[%c0_221, %c0_222, %c0_223] : memref<3x128x128xf32, #tpu.memory_space<vmem>>, vector<1x128x128xf32>
    %309 = vector.shape_cast %308 : vector<1x128x128xf32> to vector<128x128xf32>
    %cst_224 = arith.constant dense<0.000000e+00> : vector<8x128xf32>
    %310 = tpu.matmul %307, %309, %cst_224 {dimension_numbers = #tpu.dot_dimension_numbers<[1], [0], [0], [1], [0, 0, 1, 1], [], []>} : vector<8x128xf32>, vector<128x128xf32>, vector<8x128xf32> -> vector<8x128xf32>
    %c0_225 = arith.constant 0 : index
    %c0_226 = arith.constant 0 : index
    %c0_227 = arith.constant 0 : index
    %311 = vector.load %arg6[%c0_225, %c0_226, %c0_227] : memref<3x1x128xf32, #tpu.memory_space<vmem>>, vector<1x1x128xf32>
    %312 = vector.shape_cast %311 : vector<1x1x128xf32> to vector<1x128xf32>
    %313 = vector.broadcast %312 : vector<1x128xf32> to vector<8x128xf32>
    %314 = arith.addf %310, %313 : vector<8x128xf32>
    %315 = math.tanh %314 : vector<8x128xf32>
    %316 = arith.addf %315, %307 : vector<8x128xf32>
    %c1_228 = arith.constant 1 : index
    %c0_229 = arith.constant 0 : index
    %c0_230 = arith.constant 0 : index
    %317 = vector.load %arg5[%c1_228, %c0_229, %c0_230] : memref<3x128x128xf32, #tpu.memory_space<vmem>>, vector<1x128x128xf32>
    %318 = vector.shape_cast %317 : vector<1x128x128xf32> to vector<128x128xf32>
    %cst_231 = arith.constant dense<0.000000e+00> : vector<8x128xf32>
    %319 = tpu.matmul %316, %318, %cst_231 {dimension_numbers = #tpu.dot_dimension_numbers<[1], [0], [0], [1], [0, 0, 1, 1], [], []>} : vector<8x128xf32>, vector<128x128xf32>, vector<8x128xf32> -> vector<8x128xf32>
    %c1_232 = arith.constant 1 : index
    %c0_233 = arith.constant 0 : index
    %c0_234 = arith.constant 0 : index
    %320 = vector.load %arg6[%c1_232, %c0_233, %c0_234] : memref<3x1x128xf32, #tpu.memory_space<vmem>>, vector<1x1x128xf32>
    %321 = vector.shape_cast %320 : vector<1x1x128xf32> to vector<1x128xf32>
    %322 = vector.broadcast %321 : vector<1x128xf32> to vector<8x128xf32>
    %323 = arith.addf %319, %322 : vector<8x128xf32>
    %324 = math.tanh %323 : vector<8x128xf32>
    %325 = arith.addf %324, %316 : vector<8x128xf32>
    %c2_235 = arith.constant 2 : index
    %c0_236 = arith.constant 0 : index
    %c0_237 = arith.constant 0 : index
    %326 = vector.load %arg5[%c2_235, %c0_236, %c0_237] : memref<3x128x128xf32, #tpu.memory_space<vmem>>, vector<1x128x128xf32>
    %327 = vector.shape_cast %326 : vector<1x128x128xf32> to vector<128x128xf32>
    %cst_238 = arith.constant dense<0.000000e+00> : vector<8x128xf32>
    %328 = tpu.matmul %325, %327, %cst_238 {dimension_numbers = #tpu.dot_dimension_numbers<[1], [0], [0], [1], [0, 0, 1, 1], [], []>} : vector<8x128xf32>, vector<128x128xf32>, vector<8x128xf32> -> vector<8x128xf32>
    %c2_239 = arith.constant 2 : index
    %c0_240 = arith.constant 0 : index
    %c0_241 = arith.constant 0 : index
    %329 = vector.load %arg6[%c2_239, %c0_240, %c0_241] : memref<3x1x128xf32, #tpu.memory_space<vmem>>, vector<1x1x128xf32>
    %330 = vector.shape_cast %329 : vector<1x1x128xf32> to vector<1x128xf32>
    %331 = vector.broadcast %330 : vector<1x128xf32> to vector<8x128xf32>
    %332 = arith.addf %328, %331 : vector<8x128xf32>
    %333 = math.tanh %332 : vector<8x128xf32>
    %334 = arith.addf %333, %325 : vector<8x128xf32>
    %c10_i32 = arith.constant 10 : i32
    %335 = arith.index_cast %c10_i32 : i32 to index
    %c0_242 = arith.constant 0 : index
    %c0_243 = arith.constant 0 : index
    %336 = vector.load %arg2[%335, %c0_242, %c0_243] : memref<12x8x128xf32, #tpu.memory_space<vmem>>, vector<1x8x128xf32>
    %337 = vector.shape_cast %336 : vector<1x8x128xf32> to vector<8x128xf32>
    %cst_244 = arith.constant dense<0.000000e+00> : vector<8x128xf32>
    %338 = tpu.matmul %334, %3, %cst_244 {dimension_numbers = #tpu.dot_dimension_numbers<[1], [0], [0], [1], [0, 0, 1, 1], [], []>} : vector<8x128xf32>, vector<128x128xf32>, vector<8x128xf32> -> vector<8x128xf32>
    %339 = arith.addf %337, %338 : vector<8x128xf32>
    %340 = math.tanh %339 : vector<8x128xf32>
    %c0_245 = arith.constant 0 : index
    %c0_246 = arith.constant 0 : index
    %c0_247 = arith.constant 0 : index
    %341 = vector.load %arg5[%c0_245, %c0_246, %c0_247] : memref<3x128x128xf32, #tpu.memory_space<vmem>>, vector<1x128x128xf32>
    %342 = vector.shape_cast %341 : vector<1x128x128xf32> to vector<128x128xf32>
    %cst_248 = arith.constant dense<0.000000e+00> : vector<8x128xf32>
    %343 = tpu.matmul %340, %342, %cst_248 {dimension_numbers = #tpu.dot_dimension_numbers<[1], [0], [0], [1], [0, 0, 1, 1], [], []>} : vector<8x128xf32>, vector<128x128xf32>, vector<8x128xf32> -> vector<8x128xf32>
    %c0_249 = arith.constant 0 : index
    %c0_250 = arith.constant 0 : index
    %c0_251 = arith.constant 0 : index
    %344 = vector.load %arg6[%c0_249, %c0_250, %c0_251] : memref<3x1x128xf32, #tpu.memory_space<vmem>>, vector<1x1x128xf32>
    %345 = vector.shape_cast %344 : vector<1x1x128xf32> to vector<1x128xf32>
    %346 = vector.broadcast %345 : vector<1x128xf32> to vector<8x128xf32>
    %347 = arith.addf %343, %346 : vector<8x128xf32>
    %348 = math.tanh %347 : vector<8x128xf32>
    %349 = arith.addf %348, %340 : vector<8x128xf32>
    %c1_252 = arith.constant 1 : index
    %c0_253 = arith.constant 0 : index
    %c0_254 = arith.constant 0 : index
    %350 = vector.load %arg5[%c1_252, %c0_253, %c0_254] : memref<3x128x128xf32, #tpu.memory_space<vmem>>, vector<1x128x128xf32>
    %351 = vector.shape_cast %350 : vector<1x128x128xf32> to vector<128x128xf32>
    %cst_255 = arith.constant dense<0.000000e+00> : vector<8x128xf32>
    %352 = tpu.matmul %349, %351, %cst_255 {dimension_numbers = #tpu.dot_dimension_numbers<[1], [0], [0], [1], [0, 0, 1, 1], [], []>} : vector<8x128xf32>, vector<128x128xf32>, vector<8x128xf32> -> vector<8x128xf32>
    %c1_256 = arith.constant 1 : index
    %c0_257 = arith.constant 0 : index
    %c0_258 = arith.constant 0 : index
    %353 = vector.load %arg6[%c1_256, %c0_257, %c0_258] : memref<3x1x128xf32, #tpu.memory_space<vmem>>, vector<1x1x128xf32>
    %354 = vector.shape_cast %353 : vector<1x1x128xf32> to vector<1x128xf32>
    %355 = vector.broadcast %354 : vector<1x128xf32> to vector<8x128xf32>
    %356 = arith.addf %352, %355 : vector<8x128xf32>
    %357 = math.tanh %356 : vector<8x128xf32>
    %358 = arith.addf %357, %349 : vector<8x128xf32>
    %c2_259 = arith.constant 2 : index
    %c0_260 = arith.constant 0 : index
    %c0_261 = arith.constant 0 : index
    %359 = vector.load %arg5[%c2_259, %c0_260, %c0_261] : memref<3x128x128xf32, #tpu.memory_space<vmem>>, vector<1x128x128xf32>
    %360 = vector.shape_cast %359 : vector<1x128x128xf32> to vector<128x128xf32>
    %cst_262 = arith.constant dense<0.000000e+00> : vector<8x128xf32>
    %361 = tpu.matmul %358, %360, %cst_262 {dimension_numbers = #tpu.dot_dimension_numbers<[1], [0], [0], [1], [0, 0, 1, 1], [], []>} : vector<8x128xf32>, vector<128x128xf32>, vector<8x128xf32> -> vector<8x128xf32>
    %c2_263 = arith.constant 2 : index
    %c0_264 = arith.constant 0 : index
    %c0_265 = arith.constant 0 : index
    %362 = vector.load %arg6[%c2_263, %c0_264, %c0_265] : memref<3x1x128xf32, #tpu.memory_space<vmem>>, vector<1x1x128xf32>
    %363 = vector.shape_cast %362 : vector<1x1x128xf32> to vector<1x128xf32>
    %364 = vector.broadcast %363 : vector<1x128xf32> to vector<8x128xf32>
    %365 = arith.addf %361, %364 : vector<8x128xf32>
    %366 = math.tanh %365 : vector<8x128xf32>
    %367 = arith.addf %366, %358 : vector<8x128xf32>
    %c11_i32 = arith.constant 11 : i32
    %368 = arith.index_cast %c11_i32 : i32 to index
    %c0_266 = arith.constant 0 : index
    %c0_267 = arith.constant 0 : index
    %369 = vector.load %arg2[%368, %c0_266, %c0_267] : memref<12x8x128xf32, #tpu.memory_space<vmem>>, vector<1x8x128xf32>
    %370 = vector.shape_cast %369 : vector<1x8x128xf32> to vector<8x128xf32>
    %cst_268 = arith.constant dense<0.000000e+00> : vector<8x128xf32>
    %371 = tpu.matmul %367, %3, %cst_268 {dimension_numbers = #tpu.dot_dimension_numbers<[1], [0], [0], [1], [0, 0, 1, 1], [], []>} : vector<8x128xf32>, vector<128x128xf32>, vector<8x128xf32> -> vector<8x128xf32>
    %372 = arith.addf %370, %371 : vector<8x128xf32>
    %373 = math.tanh %372 : vector<8x128xf32>
    %c0_269 = arith.constant 0 : index
    %c0_270 = arith.constant 0 : index
    %c0_271 = arith.constant 0 : index
    %374 = vector.load %arg5[%c0_269, %c0_270, %c0_271] : memref<3x128x128xf32, #tpu.memory_space<vmem>>, vector<1x128x128xf32>
    %375 = vector.shape_cast %374 : vector<1x128x128xf32> to vector<128x128xf32>
    %cst_272 = arith.constant dense<0.000000e+00> : vector<8x128xf32>
    %376 = tpu.matmul %373, %375, %cst_272 {dimension_numbers = #tpu.dot_dimension_numbers<[1], [0], [0], [1], [0, 0, 1, 1], [], []>} : vector<8x128xf32>, vector<128x128xf32>, vector<8x128xf32> -> vector<8x128xf32>
    %c0_273 = arith.constant 0 : index
    %c0_274 = arith.constant 0 : index
    %c0_275 = arith.constant 0 : index
    %377 = vector.load %arg6[%c0_273, %c0_274, %c0_275] : memref<3x1x128xf32, #tpu.memory_space<vmem>>, vector<1x1x128xf32>
    %378 = vector.shape_cast %377 : vector<1x1x128xf32> to vector<1x128xf32>
    %379 = vector.broadcast %378 : vector<1x128xf32> to vector<8x128xf32>
    %380 = arith.addf %376, %379 : vector<8x128xf32>
    %381 = math.tanh %380 : vector<8x128xf32>
    %382 = arith.addf %381, %373 : vector<8x128xf32>
    %c1_276 = arith.constant 1 : index
    %c0_277 = arith.constant 0 : index
    %c0_278 = arith.constant 0 : index
    %383 = vector.load %arg5[%c1_276, %c0_277, %c0_278] : memref<3x128x128xf32, #tpu.memory_space<vmem>>, vector<1x128x128xf32>
    %384 = vector.shape_cast %383 : vector<1x128x128xf32> to vector<128x128xf32>
    %cst_279 = arith.constant dense<0.000000e+00> : vector<8x128xf32>
    %385 = tpu.matmul %382, %384, %cst_279 {dimension_numbers = #tpu.dot_dimension_numbers<[1], [0], [0], [1], [0, 0, 1, 1], [], []>} : vector<8x128xf32>, vector<128x128xf32>, vector<8x128xf32> -> vector<8x128xf32>
    %c1_280 = arith.constant 1 : index
    %c0_281 = arith.constant 0 : index
    %c0_282 = arith.constant 0 : index
    %386 = vector.load %arg6[%c1_280, %c0_281, %c0_282] : memref<3x1x128xf32, #tpu.memory_space<vmem>>, vector<1x1x128xf32>
    %387 = vector.shape_cast %386 : vector<1x1x128xf32> to vector<1x128xf32>
    %388 = vector.broadcast %387 : vector<1x128xf32> to vector<8x128xf32>
    %389 = arith.addf %385, %388 : vector<8x128xf32>
    %390 = math.tanh %389 : vector<8x128xf32>
    %391 = arith.addf %390, %382 : vector<8x128xf32>
    %c2_283 = arith.constant 2 : index
    %c0_284 = arith.constant 0 : index
    %c0_285 = arith.constant 0 : index
    %392 = vector.load %arg5[%c2_283, %c0_284, %c0_285] : memref<3x128x128xf32, #tpu.memory_space<vmem>>, vector<1x128x128xf32>
    %393 = vector.shape_cast %392 : vector<1x128x128xf32> to vector<128x128xf32>
    %cst_286 = arith.constant dense<0.000000e+00> : vector<8x128xf32>
    %394 = tpu.matmul %391, %393, %cst_286 {dimension_numbers = #tpu.dot_dimension_numbers<[1], [0], [0], [1], [0, 0, 1, 1], [], []>} : vector<8x128xf32>, vector<128x128xf32>, vector<8x128xf32> -> vector<8x128xf32>
    %c2_287 = arith.constant 2 : index
    %c0_288 = arith.constant 0 : index
    %c0_289 = arith.constant 0 : index
    %395 = vector.load %arg6[%c2_287, %c0_288, %c0_289] : memref<3x1x128xf32, #tpu.memory_space<vmem>>, vector<1x1x128xf32>
    %396 = vector.shape_cast %395 : vector<1x1x128xf32> to vector<1x128xf32>
    %397 = vector.broadcast %396 : vector<1x128xf32> to vector<8x128xf32>
    %398 = arith.addf %394, %397 : vector<8x128xf32>
    %399 = math.tanh %398 : vector<8x128xf32>
    %400 = arith.addf %399, %391 : vector<8x128xf32>
    %c12_i32 = arith.constant 12 : i32
    %c0_290 = arith.constant 0 : index
    %c0_291 = arith.constant 0 : index
    %401 = vector.load %arg11[%c0_290, %c0_291] : memref<8x128xf32, #tpu.memory_space<vmem>>, vector<8x128xf32>
    tpu.vector_store %arg11[%c0_290, %c0_291], %400 {strides = array<i32>} : memref<8x128xf32, #tpu.memory_space<vmem>>, vector<8x128xf32>,
    %c0_i32_292 = arith.constant 0 : i32
    %402 = arith.cmpi eq, %arg1, %c0_i32_292 : i32
    %403 = arith.extui %402 : i1 to i32
    %c0_i32_293 = arith.constant 0 : i32
    %404 = arith.cmpi ne, %403, %c0_i32_293 : i32
    scf.if %404 {
      %c0_294 = arith.constant 0 : index
      %c0_295 = arith.constant 0 : index
      %405 = vector.load %arg10[%c0_294, %c0_295] : memref<8x128xf32, #tpu.memory_space<vmem>>, vector<8x128xf32>
      tpu.vector_store %arg10[%c0_294, %c0_295], %400 {strides = array<i32>} : memref<8x128xf32, #tpu.memory_space<vmem>>, vector<8x128xf32>,
      %c0_296 = arith.constant 0 : index
      %c0_297 = arith.constant 0 : index
      %406 = vector.load %arg7[%c0_296, %c0_297] : memref<128x128xf32, #tpu.memory_space<vmem>>, vector<128x128xf32>
      %cst_298 = arith.constant dense<0.000000e+00> : vector<8x128xf32>
      %407 = tpu.matmul %400, %406, %cst_298 {dimension_numbers = #tpu.dot_dimension_numbers<[1], [0], [0], [1], [0, 0, 1, 1], [], []>} : vector<8x128xf32>, vector<128x128xf32>, vector<8x128xf32> -> vector<8x128xf32>
      %c0_299 = arith.constant 0 : index
      %c0_300 = arith.constant 0 : index
      %408 = vector.load %arg8[%c0_299, %c0_300] : memref<1x128xf32, #tpu.memory_space<vmem>>, vector<1x128xf32>
      %409 = vector.broadcast %408 : vector<1x128xf32> to vector<8x128xf32>
      %410 = arith.addf %407, %409 : vector<8x128xf32>
      %c0_301 = arith.constant 0 : index
      %c0_302 = arith.constant 0 : index
      %411 = vector.load %arg9[%c0_301, %c0_302] : memref<8x128xf32, #tpu.memory_space<vmem>>, vector<8x128xf32>
      tpu.vector_store %arg9[%c0_301, %c0_302], %410 {strides = array<i32>} : memref<8x128xf32, #tpu.memory_space<vmem>>, vector<8x128xf32>,
    } else {
    }
    return
  }
  func.func @transform_0(%arg0: i32, %arg1: i32) -> (i32, i32, i32) {
    %c0_i32 = arith.constant 0 : i32
    %c0_i32_0 = arith.constant 0 : i32
    return %arg1, %arg0, %c0_i32 : i32, i32, i32
  }
  func.func @transform_1(%arg0: i32, %arg1: i32) -> (i32, i32) {
    %c0_i32 = arith.constant 0 : i32
    %c0_i32_0 = arith.constant 0 : i32
    return %arg0, %c0_i32 : i32, i32
  }
  func.func @transform_2(%arg0: i32, %arg1: i32) -> (i32, i32) {
    %c0_i32 = arith.constant 0 : i32
    %c0_i32_0 = arith.constant 0 : i32
    %c0_i32_1 = arith.constant 0 : i32
    return %c0_i32, %c0_i32_0 : i32, i32
  }
  func.func @transform_3(%arg0: i32, %arg1: i32) -> (i32, i32, i32) {
    %c0_i32 = arith.constant 0 : i32
    %c0_i32_0 = arith.constant 0 : i32
    %c0_i32_1 = arith.constant 0 : i32
    %c0_i32_2 = arith.constant 0 : i32
    return %c0_i32, %c0_i32_0, %c0_i32_1 : i32, i32, i32
  }
  func.func @transform_4(%arg0: i32, %arg1: i32) -> (i32, i32, i32) {
    %c0_i32 = arith.constant 0 : i32
    %c0_i32_0 = arith.constant 0 : i32
    %c0_i32_1 = arith.constant 0 : i32
    %c0_i32_2 = arith.constant 0 : i32
    return %c0_i32, %c0_i32_0, %c0_i32_1 : i32, i32, i32
  }
  func.func @transform_5(%arg0: i32, %arg1: i32) -> (i32, i32) {
    %c0_i32 = arith.constant 0 : i32
    %c0_i32_0 = arith.constant 0 : i32
    %c0_i32_1 = arith.constant 0 : i32
    return %c0_i32, %c0_i32_0 : i32, i32
  }
  func.func @transform_6(%arg0: i32, %arg1: i32) -> (i32, i32) {
    %c0_i32 = arith.constant 0 : i32
    %c0_i32_0 = arith.constant 0 : i32
    %c0_i32_1 = arith.constant 0 : i32
    return %c0_i32, %c0_i32_0 : i32, i32
  }
  func.func @transform_7(%arg0: i32, %arg1: i32) -> (i32, i32) {
    %c0_i32 = arith.constant 0 : i32
    %c0_i32_0 = arith.constant 0 : i32
    return %arg0, %c0_i32 : i32, i32
  }
  func.func @transform_8(%arg0: i32, %arg1: i32) -> (i32, i32) {
    %c0_i32 = arith.constant 0 : i32
    %c0_i32_0 = arith.constant 0 : i32
    return %arg0, %c0_i32 : i32, i32
  }
}

</mosaic_0001>

<bundles_post_ra>
// kernel: recognition_rnn_sequence.1
= control target key start
LH: loop header
LB: loop body
LE: loop exit
PB: predicated region body
PF: predicated region fallthrough
CT: control target
= control target key end

     0   :  { %14 = vsyncpa [#allocation4], 0  ;;  %v7657_v3 = vmov 0.0|0.0   ;;  %vm7658_vm0 = vmmov 0   ;;  %v7659_v6 = vmov 0.0   ;;  %s9017_s0 = inlined_call_operand.vmem [shape: f32[12,8,128], index: 0, kind: input, shape index: {}]   ;;  %s9018_s1 = inlined_call_operand.vmem [shape: f32[8,128], index: 1, kind: input, shape index: {}]   ;;  %s9019_s2 = inlined_call_operand.vmem [shape: f32[128,128], index: 2, kind: input, shape index: {}]   ;;  %s9020_s3 = inlined_call_operand.vmem [shape: f32[3,128,128], index: 3, kind: input, shape index: {}]   ;;  %s9021_s4 = inlined_call_operand.vmem [shape: f32[3,1,128], index: 4, kind: input, shape index: {}]   ;;  %s9022_s5 = inlined_call_operand.vmem [shape: f32[128,128], index: 5, kind: input, shape index: {}]   ;;  %s9023_s6 = inlined_call_operand.vmem [shape: f32[1,128], index: 6, kind: input, shape index: {}]   ;;  %s9024_s7 = inlined_call_operand.hbm [shape: f32[8,128], index: 7, kind: output, shape index: {0}]   ;;  %s9025_s8 = inlined_call_operand.hbm [shape: f32[8,128], index: 8, kind: output, shape index: {1}]  }
   0x1   :  { %v36_v0 = vld [vmem:[%s9019_s2] sm:$0xff]  ;;  %v37_v1 = vld [vmem:[%s9019_s2 + $0x8] sm:$0xff]  ;;  %v38_v2 = vld [vmem:[%s9019_s2 + $0x10] sm:$0xff]  ;;  %6329 = vmatprep.subr.bf16.mxu0 %v7657_v3  ;;  %4646 = vmatprep.mubr.msk.f32.mxu0 %vm7658_vm0, %v7659_v6 }
   0x2   :  { %v7717_v4 = vpack.c.bf16 %v37_v1, %v36_v0  ;;  %v39_v5 = vld [vmem:[%s9019_s2 + $0x18] sm:$0xff]  ;;  %6353 = vmatprep.subr.bf16.mxu1 %v7657_v3  ;;  %4681 = vmatprep.mubr.msk.f32.mxu1 %vm7658_vm0, %v7659_v6  ;;  %v40_v8 = vld [vmem:[%s9019_s2 + $0x20] sm:$0xff]  ;;  %v41_v9 = vld [vmem:[%s9019_s2 + $0x28] sm:$0xff] }
   0x3   :  { %v7728_v7 = vpack.c.bf16 %v39_v5, %v38_v2  ;;  %v126_v10 = vld [vmem:[%s9020_s3] sm:$0xff]  ;;  %v127_v11 = vld [vmem:[%s9020_s3 + $0x8] sm:$0xff]  ;;  %v128_v12 = vld [vmem:[%s9020_s3 + $0x10] sm:$0xff]  ;;  %v7750_v14 = vpack.c.bf16 %v41_v9, %v40_v8 }
   0x4   :  { %6331 = vmatpush3.bf16.msra.mxu0 %v7717_v4  ;;  %v129_v13 = vld [vmem:[%s9020_s3 + $0x18] sm:$0xff]  ;;  %v7752_v15 = vpack.c.bf16 %v127_v11, %v126_v10  ;;  %v42_v16 = vld [vmem:[%s9019_s2 + $0x30] sm:$0xff] }
   0x5   :  { %6332 = vmatprep.subr.bf16.mxu0 %v7657_v3  ;;  %v43_v17 = vld [vmem:[%s9019_s2 + $0x38] sm:$0xff]  ;;  %v7762_v18 = vpack.c.bf16 %v129_v13, %v128_v12 }
   0x6   :  { %6355 = vmatpush3.bf16.msra.mxu1 %v7752_v15 }
   0x8   :  { %6334 = vmatpush3.bf16.msra.mxu0 %v7728_v7 }
   0x9   :  { %6335 = vmatprep.subr.bf16.mxu0 %v7657_v3 }
   0xa   :  { %15 = vsyncpa [#allocation6], 0  ;;  %6356 = vmatprep.subr.bf16.mxu1 %v7657_v3  ;;  %v130_v19 = vld [vmem:[%s9020_s3 + $0x20] sm:$0xff]  ;;  %v131_v20 = vld [vmem:[%s9020_s3 + $0x28] sm:$0xff]  ;;  %v7772_v21 = vpack.c.bf16 %v43_v17, %v42_v16  ;;  %s7660_s30 = smov [#allocation5]  }
   0xb   :  { %v44_v22 = vld [vmem:[%s9019_s2 + $0x40] sm:$0xff]  ;;  %v45_v23 = vld [vmem:[%s9019_s2 + $0x48] sm:$0xff]  ;;  %6358 = vmatpush3.bf16.msra.mxu1 %v7762_v18  ;;  %v7782_v24 = vpack.c.bf16 %v131_v20, %v130_v19  ;;  %v132_v25 = vld [vmem:[%s9020_s3 + $0x30] sm:$0xff]  ;;  %s3720_s9 = sshll.u32 %s7660_s30, 4  ;;  %s3721_s9 = int_to_ptr.vmem [resolvable:$true] %s3720_s9 }
   0xc   :  { %6337 = vmatpush3.bf16.msra.mxu0 %v7750_v14  ;;  %6359 = vmatprep.subr.bf16.mxu1 %v7657_v3  ;;  %v133_v26 = vld [vmem:[%s9020_s3 + $0x38] sm:$0xff]  ;;  %v7792_v27 = vpack.c.bf16 %v45_v23, %v44_v22  ;;  %v46_v28 = vld [vmem:[%s9019_s2 + $0x50] sm:$0xff]  ;;  %v134_v31 = vld [vmem:[%s9020_s3 + $0x40] sm:$0xff]  ;;  %s7609_s10 = scalar_lea.vmem %s3721_s9, 128  ;;  %p7614_p1 = scmp.lt.s32.totalorder %s3721_s9, %s3721_s9 }
   0xd   :  { %6338 = vmatprep.subr.bf16.mxu0 %v7657_v3  ;;  %v47_v29 = vld [vmem:[%s9019_s2 + $0x58] sm:$0xff]  ;;  %v7802_v30 = vpack.c.bf16 %v133_v26, %v132_v25  ;;  %v135_v32 = vld [vmem:[%s9020_s3 + $0x48] sm:$0xff]  ;;  %v48_v34 = vld [vmem:[%s9019_s2 + $0x60] sm:$0xff]  ;;  %p7610_p0 = scmp.ne.s32.totalorder %s3721_s9, %s7609_s10  ;;  %p7615_p2 = scmp.lt.s32.totalorder %s7609_s10, %s7609_s10 }
   0xe   :  { %v7812_v33 = vpack.c.bf16 %v47_v29, %v46_v28  ;;  %v49_v35 = vld [vmem:[%s9019_s2 + $0x68] sm:$0xff]  ;;  %v7822_v36 = vpack.c.bf16 %v135_v32, %v134_v31  ;;  %v50_v38 = vld [vmem:[%s9019_s2 + $0x70] sm:$0xff]  ;;  %v51_v39 = vld [vmem:[%s9019_s2 + $0x78] sm:$0xff] }
   0xf   :  { %6361 = vmatpush3.bf16.msra.mxu1 %v7782_v24  ;;  %v7826_v37 = vpack.c.bf16 %v49_v35, %v48_v34  ;;  %v7838_v40 = vpack.c.bf16 %v51_v39, %v50_v38  ;;  %v34_v41 = vld [vmem:[%s9018_s1] sm:$0xff]  ;;  %v136_v42 = vld [vmem:[%s9020_s3 + $0x50] sm:$0xff]  ;;  %v137_v43 = vld [vmem:[%s9020_s3 + $0x58] sm:$0xff]  ;;  %p7616_p3 = por %p7615_p2, %p7614_p1 }
  0x10   :  { %6340 = vmatpush3.bf16.msra.mxu0 %v7772_v21  ;;  %6362 = vmatprep.subr.bf16.mxu1 %v7657_v3  ;;  %v7854_v44 = vpack.c.bf16 %v137_v43, %v136_v42  ;;  %v138_v45 = vld [vmem:[%s9020_s3 + $0x60] sm:$0xff]  ;;  %v139_v46 = vld [vmem:[%s9020_s3 + $0x68] sm:$0xff]  ;;  %v140_v48 = vld [vmem:[%s9020_s3 + $0x70] sm:$0xff] }
  0x11   :  { %6341 = vmatprep.subr.bf16.mxu0 %v7657_v3  ;;  %v7864_v47 = vpack.c.bf16 %v139_v46, %v138_v45  ;;  %v141_v49 = vld [vmem:[%s9020_s3 + $0x78] sm:$0xff]  ;;  %v3733_v51 = vld [vmem:[%s9020_s3 + $0x80] sm:$0xff]  ;;  %v3734_v52 = vld [vmem:[%s9020_s3 + $0x88] sm:$0xff]  ;;  %p7617_p4 = pnand %p7616_p3, %p7610_p0 }
  0x12   :  { %v7873_v50 = vpack.c.bf16 %v141_v49, %v140_v48  ;;  %v3735_v53 = vld [vmem:[%s9020_s3 + $0x90] sm:$0xff]  ;;  %v7887_v54 = vpack.c.bf16 %v3734_v52, %v3733_v51  ;;  %v3736_v55 = vld [vmem:[%s9020_s3 + $0x98] sm:$0xff]  ;;  %v3737_v57 = vld [vmem:[%s9020_s3 + $0xa0] sm:$0xff] }
  0x13   :  { %6364 = vmatpush3.bf16.msra.mxu1 %v7802_v30  ;;  %v7893_v56 = vpack.c.bf16 %v3736_v55, %v3735_v53  ;;  %v3738_v58 = vld [vmem:[%s9020_s3 + $0xa8] sm:$0xff]  ;;  %v3739_v60 = vld [vmem:[%s9020_s3 + $0xb0] sm:$0xff]  ;;  %v3740_v61 = vld [vmem:[%s9020_s3 + $0xb8] sm:$0xff] }
  0x14   :  { %6343 = vmatpush3.bf16.msra.mxu0 %v7792_v27  ;;  %6365 = vmatprep.subr.bf16.mxu1 %v7657_v3  ;;  %v7903_v59 = vpack.c.bf16 %v3738_v58, %v3737_v57  ;;  %v7913_v62 = vpack.c.bf16 %v3740_v61, %v3739_v60  ;;  %v53_v63 = vld [vmem:[%s9017_s0] sm:$0xff]  ;;  %v3742_v9 = vld [vmem:[%s9020_s3 + $0xc8] sm:$0xff]  ;;  %v3743_v11 = vld [vmem:[%s9020_s3 + $0xd0] sm:$0xff] }
  0x15   :  { %6344 = vmatprep.subr.bf16.mxu0 %v7657_v3  ;;  %v3741_v8 = vld [vmem:[%s9020_s3 + $0xc0] sm:$0xff]  ;;  %v3744_v12 = vld [vmem:[%s9020_s3 + $0xd8] sm:$0xff]  ;;  %v3746_v17 = vld [vmem:[%s9020_s3 + $0xe8] sm:$0xff] }
  0x16   :  { %v7929_v10 = vpack.c.bf16 %v3742_v9, %v3741_v8  ;;  %v7939_v13 = vpack.c.bf16 %v3744_v12, %v3743_v11  ;;  %v3745_v16 = vld [vmem:[%s9020_s3 + $0xe0] sm:$0xff]  ;;  %v3747_v20 = vld [vmem:[%s9020_s3 + $0xf0] sm:$0xff]  ;;  %v3748_v22 = vld [vmem:[%s9020_s3 + $0xf8] sm:$0xff] }
  0x17   :  { %6367 = vmatpush3.bf16.msra.mxu1 %v7822_v36  ;;  %v7948_v19 = vpack.c.bf16 %v3746_v17, %v3745_v16  ;;  %v7958_v23 = vpack.c.bf16 %v3748_v22, %v3747_v20  ;;  %v3751_v25 = vld [vmem:[%s9020_s3 + $0x100] sm:$0xff]  ;;  %v3752_v26 = vld [vmem:[%s9020_s3 + $0x108] sm:$0xff]  ;;  %v3753_v28 = vld [vmem:[%s9020_s3 + $0x110] sm:$0xff] }
  0x18   :  { %6346 = vmatpush3.bf16.msra.mxu0 %v7812_v33  ;;  %6368 = vmatprep.subr.bf16.mxu1 %v7657_v3  ;;  %v7972_v29 = vpack.c.bf16 %v3752_v26, %v3751_v25  ;;  %v3754_v31 = vld [vmem:[%s9020_s3 + $0x118] sm:$0xff]  ;;  %v3755_v34 = vld [vmem:[%s9020_s3 + $0x120] sm:$0xff]  ;;  %v3756_v35 = vld [vmem:[%s9020_s3 + $0x128] sm:$0xff] }
  0x19   :  { %6347 = vmatprep.subr.bf16.mxu0 %v7657_v3  ;;  %v7978_v32 = vpack.c.bf16 %v3754_v31, %v3753_v28  ;;  %v7988_v38 = vpack.c.bf16 %v3756_v35, %v3755_v34  ;;  %v3757_v39 = vld [vmem:[%s9020_s3 + $0x130] sm:$0xff]  ;;  %v8006_v43 = vld [vmem:[%s9021_s4] ss:$0 sm:$0xff]  ;;  %v3760_v53 = vld [vmem:[%s9020_s3 + $0x148] sm:$0xff] }
  0x1a   :  { %v3759_v52 = vld [vmem:[%s9020_s3 + $0x140] sm:$0xff]  ;;  %v3761_v57 = vld [vmem:[%s9020_s3 + $0x150] sm:$0xff]  ;;  %v3762_v58 = vld [vmem:[%s9020_s3 + $0x158] sm:$0xff] }
  0x1b   :  { %6370 = vmatpush3.bf16.msra.mxu1 %v7854_v44  ;;  %v8033_v55 = vpack.c.bf16 %v3760_v53, %v3759_v52  ;;  %v8043_v60 = vpack.c.bf16 %v3762_v58, %v3761_v57  ;;  %v3763_v61 = vld [vmem:[%s9020_s3 + $0x160] sm:$0xff]  ;;  %v3769_v34 = vld [vmem:[%s9017_s0 + $0x8] sm:$0xff] }
  0x1c   :  { %6349 = vmatpush3.bf16.msra.mxu0 %v7826_v37  ;;  %6371 = vmatprep.subr.bf16.mxu1 %v7657_v3  ;;  %v8070_v8 = vld [vmem:[%s9021_s4 + $0x1] ss:$0 sm:$0xff]  ;;  %v8094_v20 = vld [vmem:[%s9021_s4 + $0x2] ss:$0 sm:$0xff] }
  0x1d   :  { %6350 = vmatprep.subr.bf16.mxu0 %v7657_v3 }
  0x1f   :  { %6373 = vmatpush3.bf16.msra.mxu1 %v7864_v47 }
  0x20   :  { %6352 = vmatpush3.bf16.msra.mxu0 %v7838_v40  ;;  %6374 = vmatprep.subr.bf16.mxu1 %v7657_v3 }
  0x21   :  { %6377 = vmatprep.subr.bf16.mxu0 %v7657_v3 }
  0x23   :  { %4647 = vmatmul.mubr.f32.vlgmr.msra.gmra.mrb[0].mxu0 %v34_v41  ;;  %6376 = vmatpush3.bf16.msra.mxu1 %v7873_v50  ;;  %v3758_v41 = vld [vmem:[%s9020_s3 + $0x138] sm:$0xff] }
  0x24   :  { %4716 = vmatprep.mubr.msk.f32.mxu0 %vm7658_vm0, %v7659_v6  ;;  %6401 = vmatprep.subr.bf16.mxu1 %v7657_v3  ;;  %v7998_v42 = vpack.c.bf16 %v3758_v41, %v3757_v39 }
  0x25   :  { %6379 = vmatpush3.bf16.msra.mxu0 %v7887_v54 }
  0x26   :  { %6380 = vmatprep.subr.bf16.mxu0 %v7657_v3 }
  0x29   :  { %6382 = vmatpush3.bf16.msra.mxu0 %v7893_v56 }
  0x2a   :  { %6383 = vmatprep.subr.bf16.mxu0 %v7657_v3 }
  0x2d   :  { %6385 = vmatpush3.bf16.msra.mxu0 %v7903_v59 }
  0x2e   :  { %6386 = vmatprep.subr.bf16.mxu0 %v7657_v3 }
  0x31   :  { %6388 = vmatpush3.bf16.msra.mxu0 %v7913_v62 }
  0x32   :  { %6389 = vmatprep.subr.bf16.mxu0 %v7657_v3 }
  0x35   :  { %6391 = vmatpush3.bf16.msra.mxu0 %v7929_v10 }
  0x36   :  { %6392 = vmatprep.subr.bf16.mxu0 %v7657_v3 }
  0x39   :  { %6394 = vmatpush3.bf16.msra.mxu0 %v7939_v13 }
  0x3a   :  { %6395 = vmatprep.subr.bf16.mxu0 %v7657_v3 }
  0x3d   :  { %6397 = vmatpush3.bf16.msra.mxu0 %v7948_v19 }
  0x3e   :  { %6398 = vmatprep.subr.bf16.mxu0 %v7657_v3 }
  0x41   :  { %6400 = vmatpush3.bf16.msra.mxu0 %v7958_v23 }
  0x42   :  { %6425 = vmatprep.subr.bf16.mxu0 %v7657_v3 }
  0xf6   :  { %v120_v0 = vpop.f32.mrb[0].mxu0 }
  0xf7   :  { %v124_v1 = vadd.f32 %v120_v0, %v53_v63  ;;  %v4648_v2 = vpop.f32.mrb[1].mxu0  ;;  %v3764_v63 = vld [vmem:[%s9020_s3 + $0x168] sm:$0xff] }
  0xf8   :  { %v8052_v0 = vpack.c.bf16 %v3764_v63, %v3763_v61  ;;  %v3766_v2 = vld [vmem:[%s9020_s3 + $0x178] sm:$0xff] }
  0xf9   :  { %7510 = vtanh.f32 %v124_v1  ;;  %v3765_v1 = vld [vmem:[%s9020_s3 + $0x170] sm:$0xff] }
 0x103   :  { %v7511_v5 = vpop.eup %7510 }
 0x104   :  { %4682 = vmatmul.mubr.f32.vlgmr.msra.gmra.mrb[0].mxu1 %v7511_v5 }
 0x105   :  { %4751 = vmatprep.mubr.msk.f32.mxu1 %vm7658_vm0, %v7659_v6  ;;  %6403 = vmatpush3.bf16.msra.mxu1 %v7972_v29 }
 0x106   :  { %6404 = vmatprep.subr.bf16.mxu1 %v7657_v3 }
 0x109   :  { %6406 = vmatpush3.bf16.msra.mxu1 %v7978_v32 }
 0x10a   :  { %6407 = vmatprep.subr.bf16.mxu1 %v7657_v3 }
 0x10d   :  { %6409 = vmatpush3.bf16.msra.mxu1 %v7988_v38 }
 0x10e   :  { %6410 = vmatprep.subr.bf16.mxu1 %v7657_v3 }
 0x111   :  { %6412 = vmatpush3.bf16.msra.mxu1 %v7998_v42 }
 0x112   :  { %6413 = vmatprep.subr.bf16.mxu1 %v7657_v3 }
 0x115   :  { %6415 = vmatpush3.bf16.msra.mxu1 %v8033_v55 }
 0x116   :  { %6416 = vmatprep.subr.bf16.mxu1 %v7657_v3 }
 0x119   :  { %6418 = vmatpush3.bf16.msra.mxu1 %v8043_v60 }
 0x11a   :  { %6419 = vmatprep.subr.bf16.mxu1 %v7657_v3 }
 0x11d   :  { %6421 = vmatpush3.bf16.msra.mxu1 %v8052_v0 }
 0x11e   :  { %6422 = vmatprep.subr.bf16.mxu1 %v7657_v3 }
 0x1d7   :  { %v215_v45 = vpop.f32.mrb[0].mxu1 }
 0x1d8   :  { %v216_v46 = vadd.f32 %v8006_v43, %v215_v45  ;;  %v4683_v48 = vpop.f32.mrb[1].mxu1 }
 0x1da   :  { %7512 = vtanh.f32 %v216_v46 }
 0x1e4   :  { %v7513_v49 = vpop.eup %7512 }
 0x1e5   :  { %v220_v51 = vadd.f32 %v7513_v49, %v7511_v5  ;;  %v8062_v5 = vpack.c.bf16 %v3766_v2, %v3765_v1 }
 0x1e7   :  { %4717 = vmatmul.mubr.f32.vlgmr.msra.gmra.mrb[2].mxu0 %v220_v51  ;;  %6424 = vmatpush3.bf16.msra.mxu1 %v8062_v5 }
 0x1e8   :  { %6427 = vmatpush3.bf16.msra.mxu0 %v7717_v4  ;;  %4786 = vmatprep.mubr.msk.f32.mxu0 %vm7658_vm0, %v7659_v6 }
 0x1e9   :  { %6428 = vmatprep.subr.bf16.mxu0 %v7657_v3  ;;  %6449 = vmatprep.subr.bf16.mxu1 %v7657_v3 }
 0x1ec   :  { %6430 = vmatpush3.bf16.msra.mxu0 %v7728_v7 }
 0x1ed   :  { %6431 = vmatprep.subr.bf16.mxu0 %v7657_v3 }
 0x1f0   :  { %6433 = vmatpush3.bf16.msra.mxu0 %v7750_v14 }
 0x1f1   :  { %6434 = vmatprep.subr.bf16.mxu0 %v7657_v3 }
 0x1f4   :  { %6436 = vmatpush3.bf16.msra.mxu0 %v7772_v21 }
 0x1f5   :  { %6437 = vmatprep.subr.bf16.mxu0 %v7657_v3 }
 0x1f8   :  { %6439 = vmatpush3.bf16.msra.mxu0 %v7792_v27 }
 0x1f9   :  { %6440 = vmatprep.subr.bf16.mxu0 %v7657_v3 }
 0x1fc   :  { %6442 = vmatpush3.bf16.msra.mxu0 %v7812_v33 }
 0x1fd   :  { %6443 = vmatprep.subr.bf16.mxu0 %v7657_v3 }
 0x200   :  { %6445 = vmatpush3.bf16.msra.mxu0 %v7826_v37 }
 0x201   :  { %6446 = vmatprep.subr.bf16.mxu0 %v7657_v3 }
 0x204   :  { %6448 = vmatpush3.bf16.msra.mxu0 %v7838_v40 }
 0x205   :  { %6473 = vmatprep.subr.bf16.mxu0 %v7657_v3 }
 0x2ba   :  { %v312_v9 = vpop.f32.mrb[2].mxu0 }
 0x2bb   :  { %v313_v11 = vadd.f32 %v8070_v8, %v312_v9  ;;  %v4718_v12 = vpop.f32.mrb[3].mxu0 }
 0x2bd   :  { %7514 = vtanh.f32 %v313_v11 }
 0x2c7   :  { %v7515_v16 = vpop.eup %7514 }
 0x2c8   :  { %v317_v17 = vadd.f32 %v7515_v16, %v220_v51  ;;  %v3770_v16 = vld [vmem:[%s9017_s0 + $0x10] sm:$0xff] }
 0x2ca   :  { %4752 = vmatmul.mubr.f32.vlgmr.msra.gmra.mrb[2].mxu1 %v317_v17 }
 0x2cb   :  { %6451 = vmatpush3.bf16.msra.mxu1 %v7752_v15  ;;  %4821 = vmatprep.mubr.msk.f32.mxu1 %vm7658_vm0, %v7659_v6 }
 0x2cc   :  { %6452 = vmatprep.subr.bf16.mxu1 %v7657_v3 }
 0x2cf   :  { %6454 = vmatpush3.bf16.msra.mxu1 %v7762_v18 }
 0x2d0   :  { %6455 = vmatprep.subr.bf16.mxu1 %v7657_v3 }
 0x2d3   :  { %6457 = vmatpush3.bf16.msra.mxu1 %v7782_v24 }
 0x2d4   :  { %6458 = vmatprep.subr.bf16.mxu1 %v7657_v3 }
 0x2d7   :  { %6460 = vmatpush3.bf16.msra.mxu1 %v7802_v30 }
 0x2d8   :  { %6461 = vmatprep.subr.bf16.mxu1 %v7657_v3 }
 0x2db   :  { %6463 = vmatpush3.bf16.msra.mxu1 %v7822_v36 }
 0x2dc   :  { %6464 = vmatprep.subr.bf16.mxu1 %v7657_v3 }
 0x2df   :  { %6466 = vmatpush3.bf16.msra.mxu1 %v7854_v44 }
 0x2e0   :  { %6467 = vmatprep.subr.bf16.mxu1 %v7657_v3 }
 0x2e3   :  { %6469 = vmatpush3.bf16.msra.mxu1 %v7864_v47 }
 0x2e4   :  { %6470 = vmatprep.subr.bf16.mxu1 %v7657_v3 }
 0x2e7   :  { %6472 = vmatpush3.bf16.msra.mxu1 %v7873_v50 }
 0x2e8   :  { %6497 = vmatprep.subr.bf16.mxu1 %v7657_v3 }
 0x39d   :  { %v409_v22 = vpop.f32.mrb[2].mxu1 }
 0x39e   :  { %v410_v25 = vadd.f32 %v8094_v20, %v409_v22  ;;  %v4753_v26 = vpop.f32.mrb[3].mxu1 }
 0x3a0   :  { %7516 = vtanh.f32 %v410_v25 }
 0x3aa   :  { %v7517_v28 = vpop.eup %7516 }
 0x3ab   :  { %v414_v31 = vadd.f32 %v7517_v28, %v317_v17 }
 0x3ad   :  { %4787 = vmatmul.mubr.f32.vlgmr.msra.gmra.mrb[4].mxu0 %v414_v31 }
 0x3ae   :  { %6475 = vmatpush3.bf16.msra.mxu0 %v7887_v54  ;;  %4856 = vmatprep.mubr.msk.f32.mxu0 %vm7658_vm0, %v7659_v6 }
 0x3af   :  { %6476 = vmatprep.subr.bf16.mxu0 %v7657_v3 }
 0x3b2   :  { %6478 = vmatpush3.bf16.msra.mxu0 %v7893_v56 }
 0x3b3   :  { %6479 = vmatprep.subr.bf16.mxu0 %v7657_v3 }
 0x3b6   :  { %6481 = vmatpush3.bf16.msra.mxu0 %v7903_v59 }
 0x3b7   :  { %6482 = vmatprep.subr.bf16.mxu0 %v7657_v3 }
 0x3ba   :  { %6484 = vmatpush3.bf16.msra.mxu0 %v7913_v62 }
 0x3bb   :  { %6485 = vmatprep.subr.bf16.mxu0 %v7657_v3 }
 0x3be   :  { %6487 = vmatpush3.bf16.msra.mxu0 %v7929_v10 }
 0x3bf   :  { %6488 = vmatprep.subr.bf16.mxu0 %v7657_v3 }
 0x3c2   :  { %6490 = vmatpush3.bf16.msra.mxu0 %v7939_v13 }
 0x3c3   :  { %6491 = vmatprep.subr.bf16.mxu0 %v7657_v3 }
 0x3c6   :  { %6493 = vmatpush3.bf16.msra.mxu0 %v7948_v19 }
 0x3c7   :  { %6494 = vmatprep.subr.bf16.mxu0 %v7657_v3 }
 0x3ca   :  { %6496 = vmatpush3.bf16.msra.mxu0 %v7958_v23 }
 0x3cb   :  { %6521 = vmatprep.subr.bf16.mxu0 %v7657_v3 }
 0x480   :  { %v483_v35 = vpop.f32.mrb[4].mxu0 }
 0x481   :  { %v487_v39 = vadd.f32 %v3769_v34, %v483_v35  ;;  %v4788_v41 = vpop.f32.mrb[5].mxu0 }
 0x483   :  { %7518 = vtanh.f32 %v487_v39 }
 0x48d   :  { %v7519_v45 = vpop.eup %7518 }
 0x48e   :  { %4822 = vmatmul.mubr.f32.vlgmr.msra.gmra.mrb[4].mxu1 %v7519_v45 }
 0x48f   :  { %6499 = vmatpush3.bf16.msra.mxu1 %v7972_v29  ;;  %4891 = vmatprep.mubr.msk.f32.mxu1 %vm7658_vm0, %v7659_v6 }
 0x490   :  { %6500 = vmatprep.subr.bf16.mxu1 %v7657_v3 }
 0x493   :  { %6502 = vmatpush3.bf16.msra.mxu1 %v7978_v32 }
 0x494   :  { %6503 = vmatprep.subr.bf16.mxu1 %v7657_v3 }
 0x497   :  { %6505 = vmatpush3.bf16.msra.mxu1 %v7988_v38 }
 0x498   :  { %6506 = vmatprep.subr.bf16.mxu1 %v7657_v3 }
 0x49b   :  { %6508 = vmatpush3.bf16.msra.mxu1 %v7998_v42 }
 0x49c   :  { %6509 = vmatprep.subr.bf16.mxu1 %v7657_v3 }
 0x49f   :  { %6511 = vmatpush3.bf16.msra.mxu1 %v8033_v55 }
 0x4a0   :  { %6512 = vmatprep.subr.bf16.mxu1 %v7657_v3 }
 0x4a3   :  { %6514 = vmatpush3.bf16.msra.mxu1 %v8043_v60 }
 0x4a4   :  { %6515 = vmatprep.subr.bf16.mxu1 %v7657_v3 }
 0x4a7   :  { %6517 = vmatpush3.bf16.msra.mxu1 %v8052_v0 }
 0x4a8   :  { %6518 = vmatprep.subr.bf16.mxu1 %v7657_v3 }
 0x4ab   :  { %6520 = vmatpush3.bf16.msra.mxu1 %v8062_v5 }
 0x4ac   :  { %6545 = vmatprep.subr.bf16.mxu1 %v7657_v3 }
 0x561   :  { %v555_v46 = vpop.f32.mrb[4].mxu1 }
 0x562   :  { %v556_v48 = vadd.f32 %v8006_v43, %v555_v46  ;;  %v4823_v49 = vpop.f32.mrb[5].mxu1 }
 0x564   :  { %7520 = vtanh.f32 %v556_v48 }
 0x56e   :  { %v7521_v51 = vpop.eup %7520 }
 0x56f   :  { %v560_v52 = vadd.f32 %v7521_v51, %v7519_v45 }
 0x571   :  { %4857 = vmatmul.mubr.f32.vlgmr.msra.gmra.mrb[6].mxu0 %v560_v52 }
 0x572   :  { %6523 = vmatpush3.bf16.msra.mxu0 %v7717_v4  ;;  %4926 = vmatprep.mubr.msk.f32.mxu0 %vm7658_vm0, %v7659_v6 }
 0x573   :  { %6524 = vmatprep.subr.bf16.mxu0 %v7657_v3 }
 0x576   :  { %6526 = vmatpush3.bf16.msra.mxu0 %v7728_v7 }
 0x577   :  { %6527 = vmatprep.subr.bf16.mxu0 %v7657_v3 }
 0x57a   :  { %6529 = vmatpush3.bf16.msra.mxu0 %v7750_v14 }
 0x57b   :  { %6530 = vmatprep.subr.bf16.mxu0 %v7657_v3 }
 0x57e   :  { %6532 = vmatpush3.bf16.msra.mxu0 %v7772_v21 }
 0x57f   :  { %6533 = vmatprep.subr.bf16.mxu0 %v7657_v3 }
 0x582   :  { %6535 = vmatpush3.bf16.msra.mxu0 %v7792_v27 }
 0x583   :  { %6536 = vmatprep.subr.bf16.mxu0 %v7657_v3 }
 0x586   :  { %6538 = vmatpush3.bf16.msra.mxu0 %v7812_v33 }
 0x587   :  { %6539 = vmatprep.subr.bf16.mxu0 %v7657_v3 }
 0x58a   :  { %6541 = vmatpush3.bf16.msra.mxu0 %v7826_v37 }
 0x58b   :  { %6542 = vmatprep.subr.bf16.mxu0 %v7657_v3 }
 0x58e   :  { %6544 = vmatpush3.bf16.msra.mxu0 %v7838_v40 }
 0x58f   :  { %6569 = vmatprep.subr.bf16.mxu0 %v7657_v3 }
 0x644   :  { %v627_v53 = vpop.f32.mrb[6].mxu0 }
 0x645   :  { %v628_v57 = vadd.f32 %v8070_v8, %v627_v53  ;;  %v4858_v58 = vpop.f32.mrb[7].mxu0 }
 0x647   :  { %7522 = vtanh.f32 %v628_v57 }
 0x651   :  { %v7523_v61 = vpop.eup %7522 }
 0x652   :  { %v632_v63 = vadd.f32 %v7523_v61, %v560_v52  ;;  %v3771_v61 = vld [vmem:[%s9017_s0 + $0x18] sm:$0xff] }
 0x654   :  { %4892 = vmatmul.mubr.f32.vlgmr.msra.gmra.mrb[6].mxu1 %v632_v63 }
 0x655   :  { %6547 = vmatpush3.bf16.msra.mxu1 %v7752_v15  ;;  %4961 = vmatprep.mubr.msk.f32.mxu1 %vm7658_vm0, %v7659_v6 }
 0x656   :  { %6548 = vmatprep.subr.bf16.mxu1 %v7657_v3 }
 0x659   :  { %6550 = vmatpush3.bf16.msra.mxu1 %v7762_v18 }
 0x65a   :  { %6551 = vmatprep.subr.bf16.mxu1 %v7657_v3 }
 0x65d   :  { %6553 = vmatpush3.bf16.msra.mxu1 %v7782_v24 }
 0x65e   :  { %6554 = vmatprep.subr.bf16.mxu1 %v7657_v3 }
 0x661   :  { %6556 = vmatpush3.bf16.msra.mxu1 %v7802_v30 }
 0x662   :  { %6557 = vmatprep.subr.bf16.mxu1 %v7657_v3 }
 0x665   :  { %6559 = vmatpush3.bf16.msra.mxu1 %v7822_v36 }
 0x666   :  { %6560 = vmatprep.subr.bf16.mxu1 %v7657_v3 }
 0x669   :  { %6562 = vmatpush3.bf16.msra.mxu1 %v7854_v44 }
 0x66a   :  { %6563 = vmatprep.subr.bf16.mxu1 %v7657_v3 }
 0x66d   :  { %6565 = vmatpush3.bf16.msra.mxu1 %v7864_v47 }
 0x66e   :  { %6566 = vmatprep.subr.bf16.mxu1 %v7657_v3 }
 0x671   :  { %6568 = vmatpush3.bf16.msra.mxu1 %v7873_v50 }
 0x672   :  { %6593 = vmatprep.subr.bf16.mxu1 %v7657_v3 }
 0x727   :  { %v699_v1 = vpop.f32.mrb[6].mxu1 }
 0x728   :  { %v700_v2 = vadd.f32 %v8094_v20, %v699_v1  ;;  %v4893_v9 = vpop.f32.mrb[7].mxu1 }
 0x72a   :  { %7524 = vtanh.f32 %v700_v2 }
 0x734   :  { %v7525_v11 = vpop.eup %7524 }
 0x735   :  { %v704_v12 = vadd.f32 %v7525_v11, %v632_v63 }
 0x737   :  { %4927 = vmatmul.mubr.f32.vlgmr.msra.gmra.mrb[8].mxu0 %v704_v12 }
 0x738   :  { %6571 = vmatpush3.bf16.msra.mxu0 %v7887_v54  ;;  %4996 = vmatprep.mubr.msk.f32.mxu0 %vm7658_vm0, %v7659_v6 }
 0x739   :  { %6572 = vmatprep.subr.bf16.mxu0 %v7657_v3 }
 0x73c   :  { %6574 = vmatpush3.bf16.msra.mxu0 %v7893_v56 }
 0x73d   :  { %6575 = vmatprep.subr.bf16.mxu0 %v7657_v3 }
 0x740   :  { %6577 = vmatpush3.bf16.msra.mxu0 %v7903_v59 }
 0x741   :  { %6578 = vmatprep.subr.bf16.mxu0 %v7657_v3 }
 0x744   :  { %6580 = vmatpush3.bf16.msra.mxu0 %v7913_v62 }
 0x745   :  { %6581 = vmatprep.subr.bf16.mxu0 %v7657_v3 }
 0x748   :  { %6583 = vmatpush3.bf16.msra.mxu0 %v7929_v10 }
 0x749   :  { %6584 = vmatprep.subr.bf16.mxu0 %v7657_v3 }
 0x74c   :  { %6586 = vmatpush3.bf16.msra.mxu0 %v7939_v13 }
 0x74d   :  { %6587 = vmatprep.subr.bf16.mxu0 %v7657_v3 }
 0x750   :  { %6589 = vmatpush3.bf16.msra.mxu0 %v7948_v19 }
 0x751   :  { %6590 = vmatprep.subr.bf16.mxu0 %v7657_v3 }
 0x754   :  { %6592 = vmatpush3.bf16.msra.mxu0 %v7958_v23 }
 0x755   :  { %6617 = vmatprep.subr.bf16.mxu0 %v7657_v3 }
 0x80a   :  { %v773_v17 = vpop.f32.mrb[8].mxu0 }
 0x80b   :  { %v777_v22 = vadd.f32 %v3770_v16, %v773_v17  ;;  %v4928_v25 = vpop.f32.mrb[9].mxu0 }
 0x80d   :  { %7526 = vtanh.f32 %v777_v22 }
 0x817   :  { %v7527_v26 = vpop.eup %7526 }
 0x818   :  { %4962 = vmatmul.mubr.f32.vlgmr.msra.gmra.mrb[8].mxu1 %v7527_v26 }
 0x819   :  { %6595 = vmatpush3.bf16.msra.mxu1 %v7972_v29  ;;  %5031 = vmatprep.mubr.msk.f32.mxu1 %vm7658_vm0, %v7659_v6 }
 0x81a   :  { %6596 = vmatprep.subr.bf16.mxu1 %v7657_v3 }
 0x81d   :  { %6598 = vmatpush3.bf16.msra.mxu1 %v7978_v32 }
 0x81e   :  { %6599 = vmatprep.subr.bf16.mxu1 %v7657_v3 }
 0x821   :  { %6601 = vmatpush3.bf16.msra.mxu1 %v7988_v38 }
 0x822   :  { %6602 = vmatprep.subr.bf16.mxu1 %v7657_v3 }
 0x825   :  { %6604 = vmatpush3.bf16.msra.mxu1 %v7998_v42 }
 0x826   :  { %6605 = vmatprep.subr.bf16.mxu1 %v7657_v3 }
 0x829   :  { %6607 = vmatpush3.bf16.msra.mxu1 %v8033_v55 }
 0x82a   :  { %6608 = vmatprep.subr.bf16.mxu1 %v7657_v3 }
 0x82d   :  { %6610 = vmatpush3.bf16.msra.mxu1 %v8043_v60 }
 0x82e   :  { %6611 = vmatprep.subr.bf16.mxu1 %v7657_v3 }
 0x831   :  { %6613 = vmatpush3.bf16.msra.mxu1 %v8052_v0 }
 0x832   :  { %6614 = vmatprep.subr.bf16.mxu1 %v7657_v3 }
 0x835   :  { %6616 = vmatpush3.bf16.msra.mxu1 %v8062_v5 }
 0x836   :  { %6641 = vmatprep.subr.bf16.mxu1 %v7657_v3 }
 0x8eb   :  { %v845_v28 = vpop.f32.mrb[8].mxu1 }
 0x8ec   :  { %v846_v31 = vadd.f32 %v8006_v43, %v845_v28  ;;  %v4963_v34 = vpop.f32.mrb[9].mxu1 }
 0x8ee   :  { %7528 = vtanh.f32 %v846_v31 }
 0x8f8   :  { %v7529_v35 = vpop.eup %7528 }
 0x8f9   :  { %v850_v39 = vadd.f32 %v7529_v35, %v7527_v26 }
 0x8fb   :  { %4997 = vmatmul.mubr.f32.vlgmr.msra.gmra.mrb[10].mxu0 %v850_v39 }
 0x8fc   :  { %6619 = vmatpush3.bf16.msra.mxu0 %v7717_v4  ;;  %5066 = vmatprep.mubr.msk.f32.mxu0 %vm7658_vm0, %v7659_v6 }
 0x8fd   :  { %6620 = vmatprep.subr.bf16.mxu0 %v7657_v3 }
 0x900   :  { %6622 = vmatpush3.bf16.msra.mxu0 %v7728_v7 }
 0x901   :  { %6623 = vmatprep.subr.bf16.mxu0 %v7657_v3 }
 0x904   :  { %6625 = vmatpush3.bf16.msra.mxu0 %v7750_v14 }
 0x905   :  { %6626 = vmatprep.subr.bf16.mxu0 %v7657_v3 }
 0x908   :  { %6628 = vmatpush3.bf16.msra.mxu0 %v7772_v21 }
 0x909   :  { %6629 = vmatprep.subr.bf16.mxu0 %v7657_v3 }
 0x90c   :  { %6631 = vmatpush3.bf16.msra.mxu0 %v7792_v27 }
 0x90d   :  { %6632 = vmatprep.subr.bf16.mxu0 %v7657_v3 }
 0x910   :  { %6634 = vmatpush3.bf16.msra.mxu0 %v7812_v33 }
 0x911   :  { %6635 = vmatprep.subr.bf16.mxu0 %v7657_v3 }
 0x914   :  { %6637 = vmatpush3.bf16.msra.mxu0 %v7826_v37 }
 0x915   :  { %6638 = vmatprep.subr.bf16.mxu0 %v7657_v3 }
 0x918   :  { %6640 = vmatpush3.bf16.msra.mxu0 %v7838_v40 }
 0x919   :  { %6665 = vmatprep.subr.bf16.mxu0 %v7657_v3 }
 0x9ce   :  { %v917_v41 = vpop.f32.mrb[10].mxu0 }
 0x9cf   :  { %v918_v45 = vadd.f32 %v8070_v8, %v917_v41  ;;  %v4998_v46 = vpop.f32.mrb[11].mxu0 }
 0x9d1   :  { %7530 = vtanh.f32 %v918_v45 }
 0x9db   :  { %v7531_v48 = vpop.eup %7530 }
 0x9dc   :  { %v922_v49 = vadd.f32 %v7531_v48, %v850_v39  ;;  %v3772_v48 = vld [vmem:[%s9017_s0 + $0x20] sm:$0xff] }
 0x9de   :  { %5032 = vmatmul.mubr.f32.vlgmr.msra.gmra.mrb[10].mxu1 %v922_v49 }
 0x9df   :  { %6643 = vmatpush3.bf16.msra.mxu1 %v7752_v15  ;;  %5101 = vmatprep.mubr.msk.f32.mxu1 %vm7658_vm0, %v7659_v6 }
 0x9e0   :  { %6644 = vmatprep.subr.bf16.mxu1 %v7657_v3 }
 0x9e3   :  { %6646 = vmatpush3.bf16.msra.mxu1 %v7762_v18 }
 0x9e4   :  { %6647 = vmatprep.subr.bf16.mxu1 %v7657_v3 }
 0x9e7   :  { %6649 = vmatpush3.bf16.msra.mxu1 %v7782_v24 }
 0x9e8   :  { %6650 = vmatprep.subr.bf16.mxu1 %v7657_v3 }
 0x9eb   :  { %6652 = vmatpush3.bf16.msra.mxu1 %v7802_v30 }
 0x9ec   :  { %6653 = vmatprep.subr.bf16.mxu1 %v7657_v3 }
 0x9ef   :  { %6655 = vmatpush3.bf16.msra.mxu1 %v7822_v36 }
 0x9f0   :  { %6656 = vmatprep.subr.bf16.mxu1 %v7657_v3 }
 0x9f3   :  { %6658 = vmatpush3.bf16.msra.mxu1 %v7854_v44 }
 0x9f4   :  { %6659 = vmatprep.subr.bf16.mxu1 %v7657_v3 }
 0x9f7   :  { %6661 = vmatpush3.bf16.msra.mxu1 %v7864_v47 }
 0x9f8   :  { %6662 = vmatprep.subr.bf16.mxu1 %v7657_v3 }
 0x9fb   :  { %6664 = vmatpush3.bf16.msra.mxu1 %v7873_v50 }
 0x9fc   :  { %6689 = vmatprep.subr.bf16.mxu1 %v7657_v3 }
 0xab1   :  { %v989_v51 = vpop.f32.mrb[10].mxu1 }
 0xab2   :  { %v990_v52 = vadd.f32 %v8094_v20, %v989_v51  ;;  %v5033_v53 = vpop.f32.mrb[11].mxu1 }
 0xab4   :  { %7532 = vtanh.f32 %v990_v52 }
 0xabe   :  { %v7533_v57 = vpop.eup %7532 }
 0xabf   :  { %v994_v58 = vadd.f32 %v7533_v57, %v922_v49 }
 0xac1   :  { %5067 = vmatmul.mubr.f32.vlgmr.msra.gmra.mrb[12].mxu0 %v994_v58 }
 0xac2   :  { %6667 = vmatpush3.bf16.msra.mxu0 %v7887_v54  ;;  %5136 = vmatprep.mubr.msk.f32.mxu0 %vm7658_vm0, %v7659_v6 }
 0xac3   :  { %6668 = vmatprep.subr.bf16.mxu0 %v7657_v3 }
 0xac6   :  { %6670 = vmatpush3.bf16.msra.mxu0 %v7893_v56 }
 0xac7   :  { %6671 = vmatprep.subr.bf16.mxu0 %v7657_v3 }
 0xaca   :  { %6673 = vmatpush3.bf16.msra.mxu0 %v7903_v59 }
 0xacb   :  { %6674 = vmatprep.subr.bf16.mxu0 %v7657_v3 }
 0xace   :  { %6676 = vmatpush3.bf16.msra.mxu0 %v7913_v62 }
 0xacf   :  { %6677 = vmatprep.subr.bf16.mxu0 %v7657_v3 }
 0xad2   :  { %6679 = vmatpush3.bf16.msra.mxu0 %v7929_v10 }
 0xad3   :  { %6680 = vmatprep.subr.bf16.mxu0 %v7657_v3 }
 0xad6   :  { %6682 = vmatpush3.bf16.msra.mxu0 %v7939_v13 }
 0xad7   :  { %6683 = vmatprep.subr.bf16.mxu0 %v7657_v3 }
 0xada   :  { %6685 = vmatpush3.bf16.msra.mxu0 %v7948_v19 }
 0xadb   :  { %6686 = vmatprep.subr.bf16.mxu0 %v7657_v3 }
 0xade   :  { %6688 = vmatpush3.bf16.msra.mxu0 %v7958_v23 }
 0xadf   :  { %6713 = vmatprep.subr.bf16.mxu0 %v7657_v3 }
 0xb94   :  { %v1063_v63 = vpop.f32.mrb[12].mxu0 }
 0xb95   :  { %v1067_v1 = vadd.f32 %v3771_v61, %v1063_v63  ;;  %v5068_v2 = vpop.f32.mrb[13].mxu0 }
 0xb97   :  { %7534 = vtanh.f32 %v1067_v1 }
 0xba1   :  { %v7535_v9 = vpop.eup %7534 }
 0xba2   :  { %5102 = vmatmul.mubr.f32.vlgmr.msra.gmra.mrb[12].mxu1 %v7535_v9 }
 0xba3   :  { %6691 = vmatpush3.bf16.msra.mxu1 %v7972_v29  ;;  %5171 = vmatprep.mubr.msk.f32.mxu1 %vm7658_vm0, %v7659_v6 }
 0xba4   :  { %6692 = vmatprep.subr.bf16.mxu1 %v7657_v3 }
 0xba7   :  { %6694 = vmatpush3.bf16.msra.mxu1 %v7978_v32 }
 0xba8   :  { %6695 = vmatprep.subr.bf16.mxu1 %v7657_v3 }
 0xbab   :  { %6697 = vmatpush3.bf16.msra.mxu1 %v7988_v38 }
 0xbac   :  { %6698 = vmatprep.subr.bf16.mxu1 %v7657_v3 }
 0xbaf   :  { %6700 = vmatpush3.bf16.msra.mxu1 %v7998_v42 }
 0xbb0   :  { %6701 = vmatprep.subr.bf16.mxu1 %v7657_v3 }
 0xbb3   :  { %6703 = vmatpush3.bf16.msra.mxu1 %v8033_v55 }
 0xbb4   :  { %6704 = vmatprep.subr.bf16.mxu1 %v7657_v3 }
 0xbb7   :  { %6706 = vmatpush3.bf16.msra.mxu1 %v8043_v60 }
 0xbb8   :  { %6707 = vmatprep.subr.bf16.mxu1 %v7657_v3 }
 0xbbb   :  { %6709 = vmatpush3.bf16.msra.mxu1 %v8052_v0 }
 0xbbc   :  { %6710 = vmatprep.subr.bf16.mxu1 %v7657_v3 }
 0xbbf   :  { %6712 = vmatpush3.bf16.msra.mxu1 %v8062_v5 }
 0xbc0   :  { %6737 = vmatprep.subr.bf16.mxu1 %v7657_v3 }
 0xc75   :  { %v1135_v11 = vpop.f32.mrb[12].mxu1 }
 0xc76   :  { %v1136_v12 = vadd.f32 %v8006_v43, %v1135_v11  ;;  %v5103_v16 = vpop.f32.mrb[13].mxu1 }
 0xc78   :  { %7536 = vtanh.f32 %v1136_v12 }
 0xc82   :  { %v7537_v17 = vpop.eup %7536 }
 0xc83   :  { %v1140_v22 = vadd.f32 %v7537_v17, %v7535_v9 }
 0xc85   :  { %5137 = vmatmul.mubr.f32.vlgmr.msra.gmra.mrb[14].mxu0 %v1140_v22 }
 0xc86   :  { %6715 = vmatpush3.bf16.msra.mxu0 %v7717_v4  ;;  %5206 = vmatprep.mubr.msk.f32.mxu0 %vm7658_vm0, %v7659_v6 }
 0xc87   :  { %6716 = vmatprep.subr.bf16.mxu0 %v7657_v3 }
 0xc8a   :  { %6718 = vmatpush3.bf16.msra.mxu0 %v7728_v7 }
 0xc8b   :  { %6719 = vmatprep.subr.bf16.mxu0 %v7657_v3 }
 0xc8e   :  { %6721 = vmatpush3.bf16.msra.mxu0 %v7750_v14 }
 0xc8f   :  { %6722 = vmatprep.subr.bf16.mxu0 %v7657_v3 }
 0xc92   :  { %6724 = vmatpush3.bf16.msra.mxu0 %v7772_v21 }
 0xc93   :  { %6725 = vmatprep.subr.bf16.mxu0 %v7657_v3 }
 0xc96   :  { %6727 = vmatpush3.bf16.msra.mxu0 %v7792_v27 }
 0xc97   :  { %6728 = vmatprep.subr.bf16.mxu0 %v7657_v3 }
 0xc9a   :  { %6730 = vmatpush3.bf16.msra.mxu0 %v7812_v33 }
 0xc9b   :  { %6731 = vmatprep.subr.bf16.mxu0 %v7657_v3 }
 0xc9e   :  { %6733 = vmatpush3.bf16.msra.mxu0 %v7826_v37 }
 0xc9f   :  { %6734 = vmatprep.subr.bf16.mxu0 %v7657_v3 }
 0xca2   :  { %6736 = vmatpush3.bf16.msra.mxu0 %v7838_v40 }
 0xca3   :  { %6761 = vmatprep.subr.bf16.mxu0 %v7657_v3 }
 0xd58   :  { %v1207_v25 = vpop.f32.mrb[14].mxu0 }
 0xd59   :  { %v1208_v26 = vadd.f32 %v8070_v8, %v1207_v25  ;;  %v5138_v28 = vpop.f32.mrb[15].mxu0 }
 0xd5b   :  { %7538 = vtanh.f32 %v1208_v26 }
 0xd65   :  { %v7539_v31 = vpop.eup %7538 }
 0xd66   :  { %v1212_v34 = vadd.f32 %v7539_v31, %v1140_v22  ;;  %v3773_v31 = vld [vmem:[%s9017_s0 + $0x28] sm:$0xff] }
 0xd68   :  { %5172 = vmatmul.mubr.f32.vlgmr.msra.gmra.mrb[14].mxu1 %v1212_v34 }
 0xd69   :  { %6739 = vmatpush3.bf16.msra.mxu1 %v7752_v15  ;;  %5241 = vmatprep.mubr.msk.f32.mxu1 %vm7658_vm0, %v7659_v6 }
 0xd6a   :  { %6740 = vmatprep.subr.bf16.mxu1 %v7657_v3 }
 0xd6d   :  { %6742 = vmatpush3.bf16.msra.mxu1 %v7762_v18 }
 0xd6e   :  { %6743 = vmatprep.subr.bf16.mxu1 %v7657_v3 }
 0xd71   :  { %6745 = vmatpush3.bf16.msra.mxu1 %v7782_v24 }
 0xd72   :  { %6746 = vmatprep.subr.bf16.mxu1 %v7657_v3 }
 0xd75   :  { %6748 = vmatpush3.bf16.msra.mxu1 %v7802_v30 }
 0xd76   :  { %6749 = vmatprep.subr.bf16.mxu1 %v7657_v3 }
 0xd79   :  { %6751 = vmatpush3.bf16.msra.mxu1 %v7822_v36 }
 0xd7a   :  { %6752 = vmatprep.subr.bf16.mxu1 %v7657_v3 }
 0xd7d   :  { %6754 = vmatpush3.bf16.msra.mxu1 %v7854_v44 }
 0xd7e   :  { %6755 = vmatprep.subr.bf16.mxu1 %v7657_v3 }
 0xd81   :  { %6757 = vmatpush3.bf16.msra.mxu1 %v7864_v47 }
 0xd82   :  { %6758 = vmatprep.subr.bf16.mxu1 %v7657_v3 }
 0xd85   :  { %6760 = vmatpush3.bf16.msra.mxu1 %v7873_v50 }
 0xd86   :  { %6785 = vmatprep.subr.bf16.mxu1 %v7657_v3 }
 0xe3b   :  { %v1279_v35 = vpop.f32.mrb[14].mxu1 }
 0xe3c   :  { %v1280_v39 = vadd.f32 %v8094_v20, %v1279_v35  ;;  %v5173_v41 = vpop.f32.mrb[15].mxu1 }
 0xe3e   :  { %7540 = vtanh.f32 %v1280_v39 }
 0xe48   :  { %v7541_v45 = vpop.eup %7540 }
 0xe49   :  { %v1284_v46 = vadd.f32 %v7541_v45, %v1212_v34 }
 0xe4b   :  { %5207 = vmatmul.mubr.f32.vlgmr.msra.gmra.mrb[16].mxu0 %v1284_v46 }
 0xe4c   :  { %6763 = vmatpush3.bf16.msra.mxu0 %v7887_v54  ;;  %5276 = vmatprep.mubr.msk.f32.mxu0 %vm7658_vm0, %v7659_v6 }
 0xe4d   :  { %6764 = vmatprep.subr.bf16.mxu0 %v7657_v3 }
 0xe50   :  { %6766 = vmatpush3.bf16.msra.mxu0 %v7893_v56 }
 0xe51   :  { %6767 = vmatprep.subr.bf16.mxu0 %v7657_v3 }
 0xe54   :  { %6769 = vmatpush3.bf16.msra.mxu0 %v7903_v59 }
 0xe55   :  { %6770 = vmatprep.subr.bf16.mxu0 %v7657_v3 }
 0xe58   :  { %6772 = vmatpush3.bf16.msra.mxu0 %v7913_v62 }
 0xe59   :  { %6773 = vmatprep.subr.bf16.mxu0 %v7657_v3 }
 0xe5c   :  { %6775 = vmatpush3.bf16.msra.mxu0 %v7929_v10 }
 0xe5d   :  { %6776 = vmatprep.subr.bf16.mxu0 %v7657_v3 }
 0xe60   :  { %6778 = vmatpush3.bf16.msra.mxu0 %v7939_v13 }
 0xe61   :  { %6779 = vmatprep.subr.bf16.mxu0 %v7657_v3 }
 0xe64   :  { %6781 = vmatpush3.bf16.msra.mxu0 %v7948_v19 }
 0xe65   :  { %6782 = vmatprep.subr.bf16.mxu0 %v7657_v3 }
 0xe68   :  { %6784 = vmatpush3.bf16.msra.mxu0 %v7958_v23 }
 0xe69   :  { %6809 = vmatprep.subr.bf16.mxu0 %v7657_v3 }
 0xf1e   :  { %v1353_v49 = vpop.f32.mrb[16].mxu0 }
 0xf1f   :  { %v1357_v51 = vadd.f32 %v3772_v48, %v1353_v49  ;;  %v5208_v52 = vpop.f32.mrb[17].mxu0 }
 0xf21   :  { %7542 = vtanh.f32 %v1357_v51 }
 0xf2b   :  { %v7543_v53 = vpop.eup %7542 }
 0xf2c   :  { %5242 = vmatmul.mubr.f32.vlgmr.msra.gmra.mrb[16].mxu1 %v7543_v53 }
 0xf2d   :  { %6787 = vmatpush3.bf16.msra.mxu1 %v7972_v29  ;;  %5311 = vmatprep.mubr.msk.f32.mxu1 %vm7658_vm0, %v7659_v6 }
 0xf2e   :  { %6788 = vmatprep.subr.bf16.mxu1 %v7657_v3 }
 0xf31   :  { %6790 = vmatpush3.bf16.msra.mxu1 %v7978_v32 }
 0xf32   :  { %6791 = vmatprep.subr.bf16.mxu1 %v7657_v3 }
 0xf35   :  { %6793 = vmatpush3.bf16.msra.mxu1 %v7988_v38 }
 0xf36   :  { %6794 = vmatprep.subr.bf16.mxu1 %v7657_v3 }
 0xf39   :  { %6796 = vmatpush3.bf16.msra.mxu1 %v7998_v42 }
 0xf3a   :  { %6797 = vmatprep.subr.bf16.mxu1 %v7657_v3 }
 0xf3d   :  { %6799 = vmatpush3.bf16.msra.mxu1 %v8033_v55 }
 0xf3e   :  { %6800 = vmatprep.subr.bf16.mxu1 %v7657_v3 }
 0xf41   :  { %6802 = vmatpush3.bf16.msra.mxu1 %v8043_v60 }
 0xf42   :  { %6803 = vmatprep.subr.bf16.mxu1 %v7657_v3 }
 0xf45   :  { %6805 = vmatpush3.bf16.msra.mxu1 %v8052_v0 }
 0xf46   :  { %6806 = vmatprep.subr.bf16.mxu1 %v7657_v3 }
 0xf49   :  { %6808 = vmatpush3.bf16.msra.mxu1 %v8062_v5 }
 0xf4a   :  { %6833 = vmatprep.subr.bf16.mxu1 %v7657_v3 }
 0xfff   :  { %v1425_v57 = vpop.f32.mrb[16].mxu1 }
0x1000   :  { %v1426_v58 = vadd.f32 %v8006_v43, %v1425_v57  ;;  %v5243_v61 = vpop.f32.mrb[17].mxu1 }
0x1002   :  { %7544 = vtanh.f32 %v1426_v58 }
0x100c   :  { %v7545_v63 = vpop.eup %7544 }
0x100d   :  { %v1430_v1 = vadd.f32 %v7545_v63, %v7543_v53 }
0x100f   :  { %5277 = vmatmul.mubr.f32.vlgmr.msra.gmra.mrb[18].mxu0 %v1430_v1 }
0x1010   :  { %6811 = vmatpush3.bf16.msra.mxu0 %v7717_v4  ;;  %5346 = vmatprep.mubr.msk.f32.mxu0 %vm7658_vm0, %v7659_v6 }
0x1011   :  { %6812 = vmatprep.subr.bf16.mxu0 %v7657_v3 }
0x1014   :  { %6814 = vmatpush3.bf16.msra.mxu0 %v7728_v7 }
0x1015   :  { %6815 = vmatprep.subr.bf16.mxu0 %v7657_v3 }
0x1018   :  { %6817 = vmatpush3.bf16.msra.mxu0 %v7750_v14 }
0x1019   :  { %6818 = vmatprep.subr.bf16.mxu0 %v7657_v3 }
0x101c   :  { %6820 = vmatpush3.bf16.msra.mxu0 %v7772_v21 }
0x101d   :  { %6821 = vmatprep.subr.bf16.mxu0 %v7657_v3 }
0x1020   :  { %6823 = vmatpush3.bf16.msra.mxu0 %v7792_v27 }
0x1021   :  { %6824 = vmatprep.subr.bf16.mxu0 %v7657_v3 }
0x1024   :  { %6826 = vmatpush3.bf16.msra.mxu0 %v7812_v33 }
0x1025   :  { %6827 = vmatprep.subr.bf16.mxu0 %v7657_v3 }
0x1028   :  { %6829 = vmatpush3.bf16.msra.mxu0 %v7826_v37 }
0x1029   :  { %6830 = vmatprep.subr.bf16.mxu0 %v7657_v3 }
0x102c   :  { %6832 = vmatpush3.bf16.msra.mxu0 %v7838_v40 }
0x102d   :  { %6857 = vmatprep.subr.bf16.mxu0 %v7657_v3 }
0x10e2   :  { %v1497_v2 = vpop.f32.mrb[18].mxu0 }
0x10e3   :  { %v1498_v9 = vadd.f32 %v8070_v8, %v1497_v2  ;;  %v5278_v11 = vpop.f32.mrb[19].mxu0 }
0x10e5   :  { %7546 = vtanh.f32 %v1498_v9 }
0x10ef   :  { %v7547_v12 = vpop.eup %7546 }
0x10f0   :  { %v1502_v16 = vadd.f32 %v7547_v12, %v1430_v1 }
0x10f2   :  { %5312 = vmatmul.mubr.f32.vlgmr.msra.gmra.mrb[18].mxu1 %v1502_v16 }
0x10f3   :  { %6835 = vmatpush3.bf16.msra.mxu1 %v7752_v15  ;;  %5381 = vmatprep.mubr.msk.f32.mxu1 %vm7658_vm0, %v7659_v6 }
0x10f4   :  { %6836 = vmatprep.subr.bf16.mxu1 %v7657_v3 }
0x10f7   :  { %6838 = vmatpush3.bf16.msra.mxu1 %v7762_v18 }
0x10f8   :  { %6839 = vmatprep.subr.bf16.mxu1 %v7657_v3 }
0x10fb   :  { %6841 = vmatpush3.bf16.msra.mxu1 %v7782_v24 }
0x10fc   :  { %6842 = vmatprep.subr.bf16.mxu1 %v7657_v3 }
0x10ff   :  { %6844 = vmatpush3.bf16.msra.mxu1 %v7802_v30 }
0x1100   :  { %6845 = vmatprep.subr.bf16.mxu1 %v7657_v3 }
0x1103   :  { %6847 = vmatpush3.bf16.msra.mxu1 %v7822_v36 }
0x1104   :  { %6848 = vmatprep.subr.bf16.mxu1 %v7657_v3 }
0x1107   :  { %6850 = vmatpush3.bf16.msra.mxu1 %v7854_v44 }
0x1108   :  { %6851 = vmatprep.subr.bf16.mxu1 %v7657_v3 }
0x110b   :  { %6853 = vmatpush3.bf16.msra.mxu1 %v7864_v47 }
0x110c   :  { %6854 = vmatprep.subr.bf16.mxu1 %v7657_v3 }
0x110f   :  { %6856 = vmatpush3.bf16.msra.mxu1 %v7873_v50 }
0x1110   :  { %6881 = vmatprep.subr.bf16.mxu1 %v7657_v3 }
0x11c5   :  { %v1569_v17 = vpop.f32.mrb[18].mxu1 }
0x11c6   :  { %v1570_v22 = vadd.f32 %v8094_v20, %v1569_v17  ;;  %v5313_v25 = vpop.f32.mrb[19].mxu1 }
0x11c8   :  { %7548 = vtanh.f32 %v1570_v22  ;;  %v8529_v22 = vld [vmem:[%s9021_s4] ss:$0 sm:$0xff] }
0x11d2   :  { %v7549_v26 = vpop.eup %7548 }
0x11d3   :  { %v1574_v28 = vadd.f32 %v7549_v26, %v1502_v16 }
0x11d5   :  { %5347 = vmatmul.mubr.f32.vlgmr.msra.gmra.mrb[20].mxu0 %v1574_v28 }
0x11d6   :  { %6859 = vmatpush3.bf16.msra.mxu0 %v7887_v54  ;;  %5416 = vmatprep.mubr.msk.f32.mxu0 %vm7658_vm0, %v7659_v6 }
0x11d7   :  { %6860 = vmatprep.subr.bf16.mxu0 %v7657_v3 }
0x11da   :  { %6862 = vmatpush3.bf16.msra.mxu0 %v7893_v56 }
0x11db   :  { %6863 = vmatprep.subr.bf16.mxu0 %v7657_v3 }
0x11de   :  { %6865 = vmatpush3.bf16.msra.mxu0 %v7903_v59 }
0x11df   :  { %6866 = vmatprep.subr.bf16.mxu0 %v7657_v3 }
0x11e2   :  { %6868 = vmatpush3.bf16.msra.mxu0 %v7913_v62 }
0x11e3   :  { %6869 = vmatprep.subr.bf16.mxu0 %v7657_v3 }
0x11e6   :  { %6871 = vmatpush3.bf16.msra.mxu0 %v7929_v10 }
0x11e7   :  { %6872 = vmatprep.subr.bf16.mxu0 %v7657_v3 }
0x11ea   :  { %6874 = vmatpush3.bf16.msra.mxu0 %v7939_v13 }
0x11eb   :  { %6875 = vmatprep.subr.bf16.mxu0 %v7657_v3 }
0x11ee   :  { %6877 = vmatpush3.bf16.msra.mxu0 %v7948_v19 }
0x11ef   :  { %6878 = vmatprep.subr.bf16.mxu0 %v7657_v3 }
0x11f2   :  { %6880 = vmatpush3.bf16.msra.mxu0 %v7958_v23 }
0x11f3   :  { %6905 = vmatprep.subr.bf16.mxu0 %v7657_v3 }
0x12a8   :  { %v1643_v34 = vpop.f32.mrb[20].mxu0 }
0x12a9   :  { %v1647_v35 = vadd.f32 %v3773_v31, %v1643_v34  ;;  %v5348_v39 = vpop.f32.mrb[21].mxu0 }
0x12ab   :  { %7550 = vtanh.f32 %v1647_v35  ;;  %v8553_v35 = vld [vmem:[%s9021_s4 + $0x1] ss:$0 sm:$0xff] }
0x12b5   :  { %v7551_v41 = vpop.eup %7550 }
0x12b6   :  { %5382 = vmatmul.mubr.f32.vlgmr.msra.gmra.mrb[20].mxu1 %v7551_v41 }
0x12b7   :  { %6883 = vmatpush3.bf16.msra.mxu1 %v7972_v29  ;;  %5451 = vmatprep.mubr.msk.f32.mxu1 %vm7658_vm0, %v7659_v6 }
0x12b8   :  { %6884 = vmatprep.subr.bf16.mxu1 %v7657_v3 }
0x12bb   :  { %6886 = vmatpush3.bf16.msra.mxu1 %v7978_v32 }
0x12bc   :  { %6887 = vmatprep.subr.bf16.mxu1 %v7657_v3 }
0x12bf   :  { %6889 = vmatpush3.bf16.msra.mxu1 %v7988_v38 }
0x12c0   :  { %6890 = vmatprep.subr.bf16.mxu1 %v7657_v3 }
0x12c3   :  { %6892 = vmatpush3.bf16.msra.mxu1 %v7998_v42 }
0x12c4   :  { %6893 = vmatprep.subr.bf16.mxu1 %v7657_v3 }
0x12c7   :  { %6895 = vmatpush3.bf16.msra.mxu1 %v8033_v55 }
0x12c8   :  { %6896 = vmatprep.subr.bf16.mxu1 %v7657_v3 }
0x12cb   :  { %6898 = vmatpush3.bf16.msra.mxu1 %v8043_v60 }
0x12cc   :  { %6899 = vmatprep.subr.bf16.mxu1 %v7657_v3 }
0x12cf   :  { %6901 = vmatpush3.bf16.msra.mxu1 %v8052_v0 }
0x12d0   :  { %6902 = vmatprep.subr.bf16.mxu1 %v7657_v3 }
0x12d3   :  { %6904 = vmatpush3.bf16.msra.mxu1 %v8062_v5 }
0x12d4   :  { %6929 = vmatprep.subr.bf16.mxu1 %v7657_v3 }
0x1389   :  { %v1715_v45 = vpop.f32.mrb[20].mxu1 }
0x138a   :  { %v1716_v46 = vadd.f32 %v8006_v43, %v1715_v45  ;;  %v5383_v48 = vpop.f32.mrb[21].mxu1 }
0x138c   :  { %7552 = vtanh.f32 %v1716_v46 }
0x1396   :  { %v7553_v49 = vpop.eup %7552 }
0x1397   :  { %v1720_v51 = vadd.f32 %v7553_v49, %v7551_v41  ;;  %v8577_v49 = vld [vmem:[%s9021_s4 + $0x2] ss:$0 sm:$0xff] }
0x1399   :  { %5417 = vmatmul.mubr.f32.vlgmr.msra.gmra.mrb[22].mxu0 %v1720_v51 }
0x139a   :  { %6907 = vmatpush3.bf16.msra.mxu0 %v7717_v4  ;;  %5486 = vmatprep.mubr.msk.f32.mxu0 %vm7658_vm0, %v7659_v6 }
0x139b   :  { %6908 = vmatprep.subr.bf16.mxu0 %v7657_v3 }
0x139e   :  { %6910 = vmatpush3.bf16.msra.mxu0 %v7728_v7 }
0x139f   :  { %6911 = vmatprep.subr.bf16.mxu0 %v7657_v3 }
0x13a2   :  { %6913 = vmatpush3.bf16.msra.mxu0 %v7750_v14 }
0x13a3   :  { %6914 = vmatprep.subr.bf16.mxu0 %v7657_v3 }
0x13a6   :  { %6916 = vmatpush3.bf16.msra.mxu0 %v7772_v21 }
0x13a7   :  { %6917 = vmatprep.subr.bf16.mxu0 %v7657_v3 }
0x13aa   :  { %6919 = vmatpush3.bf16.msra.mxu0 %v7792_v27 }
0x13ab   :  { %6920 = vmatprep.subr.bf16.mxu0 %v7657_v3 }
0x13ae   :  { %6922 = vmatpush3.bf16.msra.mxu0 %v7812_v33 }
0x13af   :  { %6923 = vmatprep.subr.bf16.mxu0 %v7657_v3 }
0x13b2   :  { %6925 = vmatpush3.bf16.msra.mxu0 %v7826_v37 }
0x13b3   :  { %6926 = vmatprep.subr.bf16.mxu0 %v7657_v3 }
0x13b6   :  { %6928 = vmatpush3.bf16.msra.mxu0 %v7838_v40 }
0x13b7   :  { %6953 = vmatprep.subr.bf16.mxu0 %v7657_v3 }
0x146c   :  { %v1787_v43 = vpop.f32.mrb[22].mxu0 }
0x146d   :  { %v1788_v52 = vadd.f32 %v8070_v8, %v1787_v43  ;;  %v5418_v53 = vpop.f32.mrb[23].mxu0 }
0x146f   :  { %7554 = vtanh.f32 %v1788_v52 }
0x1479   :  { %v7555_v57 = vpop.eup %7554 }
0x147a   :  { %v1792_v58 = vadd.f32 %v7555_v57, %v1720_v51  ;;  %v3775_v57 = vld [vmem:[%s9017_s0 + $0x38] sm:$0xff] }
0x147c   :  { %5452 = vmatmul.mubr.f32.vlgmr.msra.gmra.mrb[22].mxu1 %v1792_v58 }
0x147d   :  { %6931 = vmatpush3.bf16.msra.mxu1 %v7752_v15  ;;  %5521 = vmatprep.mubr.msk.f32.mxu1 %vm7658_vm0, %v7659_v6 }
0x147e   :  { %6932 = vmatprep.subr.bf16.mxu1 %v7657_v3 }
0x1481   :  { %6934 = vmatpush3.bf16.msra.mxu1 %v7762_v18 }
0x1482   :  { %6935 = vmatprep.subr.bf16.mxu1 %v7657_v3 }
0x1485   :  { %6937 = vmatpush3.bf16.msra.mxu1 %v7782_v24 }
0x1486   :  { %6938 = vmatprep.subr.bf16.mxu1 %v7657_v3 }
0x1489   :  { %6940 = vmatpush3.bf16.msra.mxu1 %v7802_v30 }
0x148a   :  { %6941 = vmatprep.subr.bf16.mxu1 %v7657_v3 }
0x148d   :  { %6943 = vmatpush3.bf16.msra.mxu1 %v7822_v36 }
0x148e   :  { %6944 = vmatprep.subr.bf16.mxu1 %v7657_v3 }
0x1491   :  { %6946 = vmatpush3.bf16.msra.mxu1 %v7854_v44 }
0x1492   :  { %6947 = vmatprep.subr.bf16.mxu1 %v7657_v3 }
0x1495   :  { %6949 = vmatpush3.bf16.msra.mxu1 %v7864_v47 }
0x1496   :  { %6950 = vmatprep.subr.bf16.mxu1 %v7657_v3 }
0x1499   :  { %6952 = vmatpush3.bf16.msra.mxu1 %v7873_v50 }
0x149a   :  { %6977 = vmatprep.subr.bf16.mxu1 %v7657_v3 }
0x154f   :  { %v1859_v8 = vpop.f32.mrb[22].mxu1 }
0x1550   :  { %v1860_v61 = vadd.f32 %v8094_v20, %v1859_v8  ;;  %v5453_v63 = vpop.f32.mrb[23].mxu1  ;;  %v3774_v20 = vld [vmem:[%s9017_s0 + $0x30] sm:$0xff] }
0x1552   :  { %7556 = vtanh.f32 %v1860_v61 }
0x155c   :  { %v7557_v1 = vpop.eup %7556 }
0x155d   :  { %v1864_v2 = vadd.f32 %v7557_v1, %v1792_v58 }
0x155f   :  { %5487 = vmatmul.mubr.f32.vlgmr.msra.gmra.mrb[24].mxu0 %v1864_v2 }
0x1560   :  { %6955 = vmatpush3.bf16.msra.mxu0 %v7887_v54  ;;  %5556 = vmatprep.mubr.msk.f32.mxu0 %vm7658_vm0, %v7659_v6 }
0x1561   :  { %6956 = vmatprep.subr.bf16.mxu0 %v7657_v3 }
0x1564   :  { %6958 = vmatpush3.bf16.msra.mxu0 %v7893_v56 }
0x1565   :  { %6959 = vmatprep.subr.bf16.mxu0 %v7657_v3 }
0x1568   :  { %6961 = vmatpush3.bf16.msra.mxu0 %v7903_v59 }
0x1569   :  { %6962 = vmatprep.subr.bf16.mxu0 %v7657_v3 }
0x156c   :  { %6964 = vmatpush3.bf16.msra.mxu0 %v7913_v62 }
0x156d   :  { %6965 = vmatprep.subr.bf16.mxu0 %v7657_v3 }
0x1570   :  { %6967 = vmatpush3.bf16.msra.mxu0 %v7929_v10 }
0x1571   :  { %6968 = vmatprep.subr.bf16.mxu0 %v7657_v3 }
0x1574   :  { %6970 = vmatpush3.bf16.msra.mxu0 %v7939_v13 }
0x1575   :  { %6971 = vmatprep.subr.bf16.mxu0 %v7657_v3 }
0x1578   :  { %6973 = vmatpush3.bf16.msra.mxu0 %v7948_v19 }
0x1579   :  { %6974 = vmatprep.subr.bf16.mxu0 %v7657_v3 }
0x157c   :  { %6976 = vmatpush3.bf16.msra.mxu0 %v7958_v23 }
0x157d   :  { %7001 = vmatprep.subr.bf16.mxu0 %v7657_v3 }
0x1632   :  { %v1933_v9 = vpop.f32.mrb[24].mxu0 }
0x1633   :  { %v1937_v11 = vadd.f32 %v3774_v20, %v1933_v9  ;;  %v5488_v12 = vpop.f32.mrb[25].mxu0 }
0x1635   :  { %7558 = vtanh.f32 %v1937_v11 }
0x163f   :  { %v7559_v16 = vpop.eup %7558 }
0x1640   :  { %5522 = vmatmul.mubr.f32.vlgmr.msra.gmra.mrb[24].mxu1 %v7559_v16 }
0x1641   :  { %6979 = vmatpush3.bf16.msra.mxu1 %v7972_v29  ;;  %5591 = vmatprep.mubr.msk.f32.mxu1 %vm7658_vm0, %v7659_v6 }
0x1642   :  { %6980 = vmatprep.subr.bf16.mxu1 %v7657_v3 }
0x1645   :  { %6982 = vmatpush3.bf16.msra.mxu1 %v7978_v32 }
0x1646   :  { %6983 = vmatprep.subr.bf16.mxu1 %v7657_v3 }
0x1649   :  { %6985 = vmatpush3.bf16.msra.mxu1 %v7988_v38 }
0x164a   :  { %6986 = vmatprep.subr.bf16.mxu1 %v7657_v3 }
0x164d   :  { %6988 = vmatpush3.bf16.msra.mxu1 %v7998_v42 }
0x164e   :  { %6989 = vmatprep.subr.bf16.mxu1 %v7657_v3 }
0x1651   :  { %6991 = vmatpush3.bf16.msra.mxu1 %v8033_v55 }
0x1652   :  { %6992 = vmatprep.subr.bf16.mxu1 %v7657_v3 }
0x1655   :  { %6994 = vmatpush3.bf16.msra.mxu1 %v8043_v60 }
0x1656   :  { %6995 = vmatprep.subr.bf16.mxu1 %v7657_v3 }
0x1659   :  { %6997 = vmatpush3.bf16.msra.mxu1 %v8052_v0 }
0x165a   :  { %6998 = vmatprep.subr.bf16.mxu1 %v7657_v3 }
0x165d   :  { %7000 = vmatpush3.bf16.msra.mxu1 %v8062_v5 }
0x165e   :  { %7025 = vmatprep.subr.bf16.mxu1 %v7657_v3 }
0x1713   :  { %v2005_v17 = vpop.f32.mrb[24].mxu1 }
0x1714   :  { %v2006_v25 = vadd.f32 %v8529_v22, %v2005_v17  ;;  %v5523_v26 = vpop.f32.mrb[25].mxu1 }
0x1716   :  { %7560 = vtanh.f32 %v2006_v25 }
0x1720   :  { %v7561_v28 = vpop.eup %7560 }
0x1721   :  { %v2010_v31 = vadd.f32 %v7561_v28, %v7559_v16 }
0x1723   :  { %5557 = vmatmul.mubr.f32.vlgmr.msra.gmra.mrb[26].mxu0 %v2010_v31 }
0x1724   :  { %7003 = vmatpush3.bf16.msra.mxu0 %v7717_v4  ;;  %5626 = vmatprep.mubr.msk.f32.mxu0 %vm7658_vm0, %v7659_v6 }
0x1725   :  { %7004 = vmatprep.subr.bf16.mxu0 %v7657_v3 }
0x1728   :  { %7006 = vmatpush3.bf16.msra.mxu0 %v7728_v7 }
0x1729   :  { %7007 = vmatprep.subr.bf16.mxu0 %v7657_v3 }
0x172c   :  { %7009 = vmatpush3.bf16.msra.mxu0 %v7750_v14 }
0x172d   :  { %7010 = vmatprep.subr.bf16.mxu0 %v7657_v3 }
0x1730   :  { %7012 = vmatpush3.bf16.msra.mxu0 %v7772_v21 }
0x1731   :  { %7013 = vmatprep.subr.bf16.mxu0 %v7657_v3 }
0x1734   :  { %7015 = vmatpush3.bf16.msra.mxu0 %v7792_v27 }
0x1735   :  { %7016 = vmatprep.subr.bf16.mxu0 %v7657_v3 }
0x1738   :  { %7018 = vmatpush3.bf16.msra.mxu0 %v7812_v33 }
0x1739   :  { %7019 = vmatprep.subr.bf16.mxu0 %v7657_v3 }
0x173c   :  { %7021 = vmatpush3.bf16.msra.mxu0 %v7826_v37 }
0x173d   :  { %7022 = vmatprep.subr.bf16.mxu0 %v7657_v3 }
0x1740   :  { %7024 = vmatpush3.bf16.msra.mxu0 %v7838_v40 }
0x1741   :  { %7049 = vmatprep.subr.bf16.mxu0 %v7657_v3 }
0x17f6   :  { %v2077_v34 = vpop.f32.mrb[26].mxu0 }
0x17f7   :  { %v2078_v39 = vadd.f32 %v8553_v35, %v2077_v34  ;;  %v5558_v41 = vpop.f32.mrb[27].mxu0 }
0x17f9   :  { %7562 = vtanh.f32 %v2078_v39 }
0x1803   :  { %v7563_v45 = vpop.eup %7562 }
0x1804   :  { %v2082_v46 = vadd.f32 %v7563_v45, %v2010_v31  ;;  %v3776_v45 = vld [vmem:[%s9017_s0 + $0x40] sm:$0xff] }
0x1806   :  { %5592 = vmatmul.mubr.f32.vlgmr.msra.gmra.mrb[26].mxu1 %v2082_v46 }
0x1807   :  { %7027 = vmatpush3.bf16.msra.mxu1 %v7752_v15  ;;  %5661 = vmatprep.mubr.msk.f32.mxu1 %vm7658_vm0, %v7659_v6 }
0x1808   :  { %7028 = vmatprep.subr.bf16.mxu1 %v7657_v3 }
0x180b   :  { %7030 = vmatpush3.bf16.msra.mxu1 %v7762_v18 }
0x180c   :  { %7031 = vmatprep.subr.bf16.mxu1 %v7657_v3 }
0x180f   :  { %7033 = vmatpush3.bf16.msra.mxu1 %v7782_v24 }
0x1810   :  { %7034 = vmatprep.subr.bf16.mxu1 %v7657_v3 }
0x1813   :  { %7036 = vmatpush3.bf16.msra.mxu1 %v7802_v30 }
0x1814   :  { %7037 = vmatprep.subr.bf16.mxu1 %v7657_v3 }
0x1817   :  { %7039 = vmatpush3.bf16.msra.mxu1 %v7822_v36 }
0x1818   :  { %7040 = vmatprep.subr.bf16.mxu1 %v7657_v3 }
0x181b   :  { %7042 = vmatpush3.bf16.msra.mxu1 %v7854_v44 }
0x181c   :  { %7043 = vmatprep.subr.bf16.mxu1 %v7657_v3 }
0x181f   :  { %7045 = vmatpush3.bf16.msra.mxu1 %v7864_v47 }
0x1820   :  { %7046 = vmatprep.subr.bf16.mxu1 %v7657_v3 }
0x1823   :  { %7048 = vmatpush3.bf16.msra.mxu1 %v7873_v50 }
0x1824   :  { %7073 = vmatprep.subr.bf16.mxu1 %v7657_v3 }
0x18d9   :  { %v2149_v48 = vpop.f32.mrb[26].mxu1 }
0x18da   :  { %v2150_v51 = vadd.f32 %v8577_v49, %v2149_v48  ;;  %v5593_v43 = vpop.f32.mrb[27].mxu1 }
0x18dc   :  { %7564 = vtanh.f32 %v2150_v51 }
0x18e6   :  { %v7565_v52 = vpop.eup %7564 }
0x18e7   :  { %v2154_v53 = vadd.f32 %v7565_v52, %v2082_v46 }
0x18e9   :  { %5627 = vmatmul.mubr.f32.vlgmr.msra.gmra.mrb[28].mxu0 %v2154_v53 }
0x18ea   :  { %7051 = vmatpush3.bf16.msra.mxu0 %v7887_v54  ;;  %5696 = vmatprep.mubr.msk.f32.mxu0 %vm7658_vm0, %v7659_v6 }
0x18eb   :  { %7052 = vmatprep.subr.bf16.mxu0 %v7657_v3 }
0x18ee   :  { %7054 = vmatpush3.bf16.msra.mxu0 %v7893_v56 }
0x18ef   :  { %7055 = vmatprep.subr.bf16.mxu0 %v7657_v3 }
0x18f2   :  { %7057 = vmatpush3.bf16.msra.mxu0 %v7903_v59 }
0x18f3   :  { %7058 = vmatprep.subr.bf16.mxu0 %v7657_v3 }
0x18f6   :  { %7060 = vmatpush3.bf16.msra.mxu0 %v7913_v62 }
0x18f7   :  { %7061 = vmatprep.subr.bf16.mxu0 %v7657_v3 }
0x18fa   :  { %7063 = vmatpush3.bf16.msra.mxu0 %v7929_v10 }
0x18fb   :  { %7064 = vmatprep.subr.bf16.mxu0 %v7657_v3 }
0x18fe   :  { %7066 = vmatpush3.bf16.msra.mxu0 %v7939_v13 }
0x18ff   :  { %7067 = vmatprep.subr.bf16.mxu0 %v7657_v3 }
0x1902   :  { %7069 = vmatpush3.bf16.msra.mxu0 %v7948_v19 }
0x1903   :  { %7070 = vmatprep.subr.bf16.mxu0 %v7657_v3 }
0x1906   :  { %7072 = vmatpush3.bf16.msra.mxu0 %v7958_v23 }
0x1907   :  { %7097 = vmatprep.subr.bf16.mxu0 %v7657_v3 }
0x19bc   :  { %v2223_v58 = vpop.f32.mrb[28].mxu0 }
0x19bd   :  { %v2227_v8 = vadd.f32 %v3775_v57, %v2223_v58  ;;  %v5628_v61 = vpop.f32.mrb[29].mxu0 }
0x19bf   :  { %7566 = vtanh.f32 %v2227_v8 }
0x19c9   :  { %v7567_v63 = vpop.eup %7566 }
0x19ca   :  { %5662 = vmatmul.mubr.f32.vlgmr.msra.gmra.mrb[28].mxu1 %v7567_v63 }
0x19cb   :  { %7075 = vmatpush3.bf16.msra.mxu1 %v7972_v29  ;;  %5731 = vmatprep.mubr.msk.f32.mxu1 %vm7658_vm0, %v7659_v6 }
0x19cc   :  { %7076 = vmatprep.subr.bf16.mxu1 %v7657_v3 }
0x19cf   :  { %7078 = vmatpush3.bf16.msra.mxu1 %v7978_v32 }
0x19d0   :  { %7079 = vmatprep.subr.bf16.mxu1 %v7657_v3 }
0x19d3   :  { %7081 = vmatpush3.bf16.msra.mxu1 %v7988_v38 }
0x19d4   :  { %7082 = vmatprep.subr.bf16.mxu1 %v7657_v3 }
0x19d7   :  { %7084 = vmatpush3.bf16.msra.mxu1 %v7998_v42 }
0x19d8   :  { %7085 = vmatprep.subr.bf16.mxu1 %v7657_v3 }
0x19db   :  { %7087 = vmatpush3.bf16.msra.mxu1 %v8033_v55 }
0x19dc   :  { %7088 = vmatprep.subr.bf16.mxu1 %v7657_v3 }
0x19df   :  { %7090 = vmatpush3.bf16.msra.mxu1 %v8043_v60 }
0x19e0   :  { %7091 = vmatprep.subr.bf16.mxu1 %v7657_v3 }
0x19e3   :  { %7093 = vmatpush3.bf16.msra.mxu1 %v8052_v0 }
0x19e4   :  { %7094 = vmatprep.subr.bf16.mxu1 %v7657_v3 }
0x19e7   :  { %7096 = vmatpush3.bf16.msra.mxu1 %v8062_v5 }
0x19e8   :  { %7121 = vmatprep.subr.bf16.mxu1 %v7657_v3 }
0x1a9d   :  { %v2295_v1 = vpop.f32.mrb[28].mxu1 }
0x1a9e   :  { %v2296_v2 = vadd.f32 %v8529_v22, %v2295_v1  ;;  %v5663_v20 = vpop.f32.mrb[29].mxu1 }
0x1aa0   :  { %7568 = vtanh.f32 %v2296_v2 }
0x1aaa   :  { %v7569_v9 = vpop.eup %7568 }
0x1aab   :  { %v2300_v11 = vadd.f32 %v7569_v9, %v7567_v63 }
0x1aad   :  { %5697 = vmatmul.mubr.f32.vlgmr.msra.gmra.mrb[30].mxu0 %v2300_v11 }
0x1aae   :  { %7099 = vmatpush3.bf16.msra.mxu0 %v7717_v4  ;;  %5766 = vmatprep.mubr.msk.f32.mxu0 %vm7658_vm0, %v7659_v6 }
0x1aaf   :  { %7100 = vmatprep.subr.bf16.mxu0 %v7657_v3 }
0x1ab2   :  { %7102 = vmatpush3.bf16.msra.mxu0 %v7728_v7 }
0x1ab3   :  { %7103 = vmatprep.subr.bf16.mxu0 %v7657_v3 }
0x1ab6   :  { %7105 = vmatpush3.bf16.msra.mxu0 %v7750_v14 }
0x1ab7   :  { %7106 = vmatprep.subr.bf16.mxu0 %v7657_v3 }
0x1aba   :  { %7108 = vmatpush3.bf16.msra.mxu0 %v7772_v21 }
0x1abb   :  { %7109 = vmatprep.subr.bf16.mxu0 %v7657_v3 }
0x1abe   :  { %7111 = vmatpush3.bf16.msra.mxu0 %v7792_v27 }
0x1abf   :  { %7112 = vmatprep.subr.bf16.mxu0 %v7657_v3 }
0x1ac2   :  { %7114 = vmatpush3.bf16.msra.mxu0 %v7812_v33 }
0x1ac3   :  { %7115 = vmatprep.subr.bf16.mxu0 %v7657_v3 }
0x1ac6   :  { %7117 = vmatpush3.bf16.msra.mxu0 %v7826_v37 }
0x1ac7   :  { %7118 = vmatprep.subr.bf16.mxu0 %v7657_v3 }
0x1aca   :  { %7120 = vmatpush3.bf16.msra.mxu0 %v7838_v40 }
0x1acb   :  { %7145 = vmatprep.subr.bf16.mxu0 %v7657_v3 }
0x1b80   :  { %v2367_v12 = vpop.f32.mrb[30].mxu0 }
0x1b81   :  { %v2368_v16 = vadd.f32 %v8553_v35, %v2367_v12  ;;  %v5698_v17 = vpop.f32.mrb[31].mxu0 }
0x1b83   :  { %7570 = vtanh.f32 %v2368_v16 }
0x1b8d   :  { %v7571_v25 = vpop.eup %7570 }
0x1b8e   :  { %v2372_v26 = vadd.f32 %v7571_v25, %v2300_v11  ;;  %v3777_v25 = vld [vmem:[%s9017_s0 + $0x48] sm:$0xff] }
0x1b90   :  { %5732 = vmatmul.mubr.f32.vlgmr.msra.gmra.mrb[30].mxu1 %v2372_v26 }
0x1b91   :  { %7123 = vmatpush3.bf16.msra.mxu1 %v7752_v15  ;;  %5801 = vmatprep.mubr.msk.f32.mxu1 %vm7658_vm0, %v7659_v6 }
0x1b92   :  { %7124 = vmatprep.subr.bf16.mxu1 %v7657_v3 }
0x1b95   :  { %7126 = vmatpush3.bf16.msra.mxu1 %v7762_v18 }
0x1b96   :  { %7127 = vmatprep.subr.bf16.mxu1 %v7657_v3 }
0x1b99   :  { %7129 = vmatpush3.bf16.msra.mxu1 %v7782_v24 }
0x1b9a   :  { %7130 = vmatprep.subr.bf16.mxu1 %v7657_v3 }
0x1b9d   :  { %7132 = vmatpush3.bf16.msra.mxu1 %v7802_v30 }
0x1b9e   :  { %7133 = vmatprep.subr.bf16.mxu1 %v7657_v3 }
0x1ba1   :  { %7135 = vmatpush3.bf16.msra.mxu1 %v7822_v36 }
0x1ba2   :  { %7136 = vmatprep.subr.bf16.mxu1 %v7657_v3 }
0x1ba5   :  { %7138 = vmatpush3.bf16.msra.mxu1 %v7854_v44 }
0x1ba6   :  { %7139 = vmatprep.subr.bf16.mxu1 %v7657_v3 }
0x1ba9   :  { %7141 = vmatpush3.bf16.msra.mxu1 %v7864_v47 }
0x1baa   :  { %7142 = vmatprep.subr.bf16.mxu1 %v7657_v3 }
0x1bad   :  { %7144 = vmatpush3.bf16.msra.mxu1 %v7873_v50 }
0x1bae   :  { %7169 = vmatprep.subr.bf16.mxu1 %v7657_v3 }
0x1c63   :  { %v2439_v28 = vpop.f32.mrb[30].mxu1 }
0x1c64   :  { %v2440_v31 = vadd.f32 %v8577_v49, %v2439_v28  ;;  %v5733_v34 = vpop.f32.mrb[31].mxu1 }
0x1c66   :  { %7572 = vtanh.f32 %v2440_v31 }
0x1c70   :  { %v7573_v39 = vpop.eup %7572 }
0x1c71   :  { %v2444_v41 = vadd.f32 %v7573_v39, %v2372_v26 }
0x1c73   :  { %5767 = vmatmul.mubr.f32.vlgmr.msra.gmra.mrb[32].mxu0 %v2444_v41 }
0x1c74   :  { %7147 = vmatpush3.bf16.msra.mxu0 %v7887_v54  ;;  %5836 = vmatprep.mubr.msk.f32.mxu0 %vm7658_vm0, %v7659_v6 }
0x1c75   :  { %7148 = vmatprep.subr.bf16.mxu0 %v7657_v3 }
0x1c78   :  { %7150 = vmatpush3.bf16.msra.mxu0 %v7893_v56 }
0x1c79   :  { %7151 = vmatprep.subr.bf16.mxu0 %v7657_v3 }
0x1c7c   :  { %7153 = vmatpush3.bf16.msra.mxu0 %v7903_v59 }
0x1c7d   :  { %7154 = vmatprep.subr.bf16.mxu0 %v7657_v3 }
0x1c80   :  { %7156 = vmatpush3.bf16.msra.mxu0 %v7913_v62 }
0x1c81   :  { %7157 = vmatprep.subr.bf16.mxu0 %v7657_v3 }
0x1c84   :  { %7159 = vmatpush3.bf16.msra.mxu0 %v7929_v10 }
0x1c85   :  { %7160 = vmatprep.subr.bf16.mxu0 %v7657_v3 }
0x1c88   :  { %7162 = vmatpush3.bf16.msra.mxu0 %v7939_v13 }
0x1c89   :  { %7163 = vmatprep.subr.bf16.mxu0 %v7657_v3 }
0x1c8c   :  { %7165 = vmatpush3.bf16.msra.mxu0 %v7948_v19 }
0x1c8d   :  { %7166 = vmatprep.subr.bf16.mxu0 %v7657_v3 }
0x1c90   :  { %7168 = vmatpush3.bf16.msra.mxu0 %v7958_v23 }
0x1c91   :  { %7193 = vmatprep.subr.bf16.mxu0 %v7657_v3 }
0x1d46   :  { %v2513_v46 = vpop.f32.mrb[32].mxu0 }
0x1d47   :  { %v2517_v48 = vadd.f32 %v3776_v45, %v2513_v46  ;;  %v5768_v51 = vpop.f32.mrb[33].mxu0 }
0x1d49   :  { %7574 = vtanh.f32 %v2517_v48 }
0x1d53   :  { %v7575_v43 = vpop.eup %7574 }
0x1d54   :  { %5802 = vmatmul.mubr.f32.vlgmr.msra.gmra.mrb[32].mxu1 %v7575_v43 }
0x1d55   :  { %7171 = vmatpush3.bf16.msra.mxu1 %v7972_v29  ;;  %5871 = vmatprep.mubr.msk.f32.mxu1 %vm7658_vm0, %v7659_v6 }
0x1d56   :  { %7172 = vmatprep.subr.bf16.mxu1 %v7657_v3 }
0x1d59   :  { %7174 = vmatpush3.bf16.msra.mxu1 %v7978_v32 }
0x1d5a   :  { %7175 = vmatprep.subr.bf16.mxu1 %v7657_v3 }
0x1d5d   :  { %7177 = vmatpush3.bf16.msra.mxu1 %v7988_v38 }
0x1d5e   :  { %7178 = vmatprep.subr.bf16.mxu1 %v7657_v3 }
0x1d61   :  { %7180 = vmatpush3.bf16.msra.mxu1 %v7998_v42 }
0x1d62   :  { %7181 = vmatprep.subr.bf16.mxu1 %v7657_v3 }
0x1d65   :  { %7183 = vmatpush3.bf16.msra.mxu1 %v8033_v55 }
0x1d66   :  { %7184 = vmatprep.subr.bf16.mxu1 %v7657_v3 }
0x1d69   :  { %7186 = vmatpush3.bf16.msra.mxu1 %v8043_v60 }
0x1d6a   :  { %7187 = vmatprep.subr.bf16.mxu1 %v7657_v3 }
0x1d6d   :  { %7189 = vmatpush3.bf16.msra.mxu1 %v8052_v0 }
0x1d6e   :  { %7190 = vmatprep.subr.bf16.mxu1 %v7657_v3 }
0x1d71   :  { %7192 = vmatpush3.bf16.msra.mxu1 %v8062_v5 }
0x1d72   :  { %7217 = vmatprep.subr.bf16.mxu1 %v7657_v3 }
0x1e27   :  { %v2585_v52 = vpop.f32.mrb[32].mxu1 }
0x1e28   :  { %v2586_v53 = vadd.f32 %v8529_v22, %v2585_v52  ;;  %v5803_v57 = vpop.f32.mrb[33].mxu1 }
0x1e2a   :  { %7576 = vtanh.f32 %v2586_v53 }
0x1e34   :  { %v7577_v58 = vpop.eup %7576 }
0x1e35   :  { %v2590_v8 = vadd.f32 %v7577_v58, %v7575_v43 }
0x1e37   :  { %5837 = vmatmul.mubr.f32.vlgmr.msra.gmra.mrb[34].mxu0 %v2590_v8 }
0x1e38   :  { %7195 = vmatpush3.bf16.msra.mxu0 %v7717_v4  ;;  %5906 = vmatprep.mubr.msk.f32.mxu0 %vm7658_vm0, %v7659_v6 }
0x1e39   :  { %7196 = vmatprep.subr.bf16.mxu0 %v7657_v3 }
0x1e3c   :  { %7198 = vmatpush3.bf16.msra.mxu0 %v7728_v7 }
0x1e3d   :  { %7199 = vmatprep.subr.bf16.mxu0 %v7657_v3 }
0x1e40   :  { %7201 = vmatpush3.bf16.msra.mxu0 %v7750_v14 }
0x1e41   :  { %7202 = vmatprep.subr.bf16.mxu0 %v7657_v3 }
0x1e44   :  { %7204 = vmatpush3.bf16.msra.mxu0 %v7772_v21 }
0x1e45   :  { %7205 = vmatprep.subr.bf16.mxu0 %v7657_v3 }
0x1e48   :  { %7207 = vmatpush3.bf16.msra.mxu0 %v7792_v27 }
0x1e49   :  { %7208 = vmatprep.subr.bf16.mxu0 %v7657_v3 }
0x1e4c   :  { %7210 = vmatpush3.bf16.msra.mxu0 %v7812_v33 }
0x1e4d   :  { %7211 = vmatprep.subr.bf16.mxu0 %v7657_v3 }
0x1e50   :  { %7213 = vmatpush3.bf16.msra.mxu0 %v7826_v37 }
0x1e51   :  { %7214 = vmatprep.subr.bf16.mxu0 %v7657_v3 }
0x1e54   :  { %7216 = vmatpush3.bf16.msra.mxu0 %v7838_v40 }
0x1e55   :  { %7241 = vmatprep.subr.bf16.mxu0 %v7657_v3 }
0x1f0a   :  { %v2657_v61 = vpop.f32.mrb[34].mxu0 }
0x1f0b   :  { %v2658_v63 = vadd.f32 %v8553_v35, %v2657_v61  ;;  %v5838_v1 = vpop.f32.mrb[35].mxu0 }
0x1f0d   :  { %7578 = vtanh.f32 %v2658_v63 }
0x1f17   :  { %v7579_v2 = vpop.eup %7578 }
0x1f18   :  { %v2662_v20 = vadd.f32 %v7579_v2, %v2590_v8  ;;  %v3778_v2 = vld [vmem:[%s9017_s0 + $0x50] sm:$0xff] }
0x1f1a   :  { %5872 = vmatmul.mubr.f32.vlgmr.msra.gmra.mrb[34].mxu1 %v2662_v20 }
0x1f1b   :  { %7219 = vmatpush3.bf16.msra.mxu1 %v7752_v15  ;;  %5941 = vmatprep.mubr.msk.f32.mxu1 %vm7658_vm0, %v7659_v6 }
0x1f1c   :  { %7220 = vmatprep.subr.bf16.mxu1 %v7657_v3 }
0x1f1f   :  { %7222 = vmatpush3.bf16.msra.mxu1 %v7762_v18 }
0x1f20   :  { %7223 = vmatprep.subr.bf16.mxu1 %v7657_v3 }
0x1f23   :  { %7225 = vmatpush3.bf16.msra.mxu1 %v7782_v24 }
0x1f24   :  { %7226 = vmatprep.subr.bf16.mxu1 %v7657_v3 }
0x1f27   :  { %7228 = vmatpush3.bf16.msra.mxu1 %v7802_v30 }
0x1f28   :  { %7229 = vmatprep.subr.bf16.mxu1 %v7657_v3 }
0x1f2b   :  { %7231 = vmatpush3.bf16.msra.mxu1 %v7822_v36 }
0x1f2c   :  { %7232 = vmatprep.subr.bf16.mxu1 %v7657_v3 }
0x1f2f   :  { %7234 = vmatpush3.bf16.msra.mxu1 %v7854_v44 }
0x1f30   :  { %7235 = vmatprep.subr.bf16.mxu1 %v7657_v3 }
0x1f33   :  { %7237 = vmatpush3.bf16.msra.mxu1 %v7864_v47 }
0x1f34   :  { %7238 = vmatprep.subr.bf16.mxu1 %v7657_v3 }
0x1f37   :  { %7240 = vmatpush3.bf16.msra.mxu1 %v7873_v50 }
0x1f38   :  { %7265 = vmatprep.subr.bf16.mxu1 %v7657_v3 }
0x1fed   :  { %v2729_v9 = vpop.f32.mrb[34].mxu1 }
0x1fee   :  { %v2730_v11 = vadd.f32 %v8577_v49, %v2729_v9  ;;  %v5873_v12 = vpop.f32.mrb[35].mxu1 }
0x1ff0   :  { %7580 = vtanh.f32 %v2730_v11 }
0x1ffa   :  { %v7581_v16 = vpop.eup %7580 }
0x1ffb   :  { %v2734_v17 = vadd.f32 %v7581_v16, %v2662_v20 }
0x1ffd   :  { %5907 = vmatmul.mubr.f32.vlgmr.msra.gmra.mrb[36].mxu0 %v2734_v17 }
0x1ffe   :  { %7243 = vmatpush3.bf16.msra.mxu0 %v7887_v54  ;;  %5976 = vmatprep.mubr.msk.f32.mxu0 %vm7658_vm0, %v7659_v6 }
0x1fff   :  { %7244 = vmatprep.subr.bf16.mxu0 %v7657_v3 }
0x2002   :  { %7246 = vmatpush3.bf16.msra.mxu0 %v7893_v56 }
0x2003   :  { %7247 = vmatprep.subr.bf16.mxu0 %v7657_v3 }
0x2006   :  { %7249 = vmatpush3.bf16.msra.mxu0 %v7903_v59 }
0x2007   :  { %7250 = vmatprep.subr.bf16.mxu0 %v7657_v3 }
0x200a   :  { %7252 = vmatpush3.bf16.msra.mxu0 %v7913_v62 }
0x200b   :  { %7253 = vmatprep.subr.bf16.mxu0 %v7657_v3 }
0x200e   :  { %7255 = vmatpush3.bf16.msra.mxu0 %v7929_v10 }
0x200f   :  { %7256 = vmatprep.subr.bf16.mxu0 %v7657_v3 }
0x2012   :  { %7258 = vmatpush3.bf16.msra.mxu0 %v7939_v13 }
0x2013   :  { %7259 = vmatprep.subr.bf16.mxu0 %v7657_v3 }
0x2016   :  { %7261 = vmatpush3.bf16.msra.mxu0 %v7948_v19 }
0x2017   :  { %7262 = vmatprep.subr.bf16.mxu0 %v7657_v3 }
0x201a   :  { %7264 = vmatpush3.bf16.msra.mxu0 %v7958_v23 }
0x201b   :  { %7289 = vmatprep.subr.bf16.mxu0 %v7657_v3 }
0x20d0   :  { %v2803_v26 = vpop.f32.mrb[36].mxu0 }
0x20d1   :  { %v2807_v28 = vadd.f32 %v3777_v25, %v2803_v26  ;;  %v5908_v31 = vpop.f32.mrb[37].mxu0 }
0x20d3   :  { %7582 = vtanh.f32 %v2807_v28 }
0x20dd   :  { %v7583_v34 = vpop.eup %7582 }
0x20de   :  { %5942 = vmatmul.mubr.f32.vlgmr.msra.gmra.mrb[36].mxu1 %v7583_v34 }
0x20df   :  { %7267 = vmatpush3.bf16.msra.mxu1 %v7972_v29  ;;  %6011 = vmatprep.mubr.msk.f32.mxu1 %vm7658_vm0, %v7659_v6 }
0x20e0   :  { %7268 = vmatprep.subr.bf16.mxu1 %v7657_v3 }
0x20e3   :  { %7270 = vmatpush3.bf16.msra.mxu1 %v7978_v32 }
0x20e4   :  { %7271 = vmatprep.subr.bf16.mxu1 %v7657_v3 }
0x20e7   :  { %7273 = vmatpush3.bf16.msra.mxu1 %v7988_v38 }
0x20e8   :  { %7274 = vmatprep.subr.bf16.mxu1 %v7657_v3 }
0x20eb   :  { %7276 = vmatpush3.bf16.msra.mxu1 %v7998_v42 }
0x20ec   :  { %7277 = vmatprep.subr.bf16.mxu1 %v7657_v3 }
0x20ef   :  { %7279 = vmatpush3.bf16.msra.mxu1 %v8033_v55 }
0x20f0   :  { %7280 = vmatprep.subr.bf16.mxu1 %v7657_v3 }
0x20f3   :  { %7282 = vmatpush3.bf16.msra.mxu1 %v8043_v60 }
0x20f4   :  { %7283 = vmatprep.subr.bf16.mxu1 %v7657_v3 }
0x20f7   :  { %7285 = vmatpush3.bf16.msra.mxu1 %v8052_v0 }
0x20f8   :  { %7286 = vmatprep.subr.bf16.mxu1 %v7657_v3 }
0x20fb   :  { %7288 = vmatpush3.bf16.msra.mxu1 %v8062_v5 }
0x20fc   :  { %7313 = vmatprep.subr.bf16.mxu1 %v7657_v3 }
0x21b1   :  { %v2875_v39 = vpop.f32.mrb[36].mxu1 }
0x21b2   :  { %v2876_v41 = vadd.f32 %v8529_v22, %v2875_v39  ;;  %v5943_v45 = vpop.f32.mrb[37].mxu1 }
0x21b3   :  { %v3619_v45 = vld [vmem:[%s9022_s5 + $0x48] sm:$0xff] }
0x21b4   :  { %7584 = vtanh.f32 %v2876_v41  ;;  %v3618_v41 = vld [vmem:[%s9022_s5 + $0x40] sm:$0xff] }
0x21be   :  { %v7585_v46 = vpop.eup %7584 }
0x21bf   :  { %v2880_v48 = vadd.f32 %v7585_v46, %v7583_v34  ;;  %v7494_v46 = vpack.c.bf16 %v3619_v45, %v3618_v41 }
0x21c1   :  { %5977 = vmatmul.mubr.f32.vlgmr.msra.gmra.mrb[38].mxu0 %v2880_v48 }
0x21c2   :  { %7291 = vmatpush3.bf16.msra.mxu0 %v7717_v4  ;;  %6046 = vmatprep.mubr.msk.f32.mxu0 %vm7658_vm0, %v7659_v6 }
0x21c3   :  { %7292 = vmatprep.subr.bf16.mxu0 %v7657_v3 }
0x21c6   :  { %7294 = vmatpush3.bf16.msra.mxu0 %v7728_v7 }
0x21c7   :  { %7295 = vmatprep.subr.bf16.mxu0 %v7657_v3 }
0x21ca   :  { %7297 = vmatpush3.bf16.msra.mxu0 %v7750_v14 }
0x21cb   :  { %7298 = vmatprep.subr.bf16.mxu0 %v7657_v3 }
0x21ce   :  { %7300 = vmatpush3.bf16.msra.mxu0 %v7772_v21 }
0x21cf   :  { %7301 = vmatprep.subr.bf16.mxu0 %v7657_v3 }
0x21d2   :  { %7303 = vmatpush3.bf16.msra.mxu0 %v7792_v27 }
0x21d3   :  { %7304 = vmatprep.subr.bf16.mxu0 %v7657_v3 }
0x21d6   :  { %7306 = vmatpush3.bf16.msra.mxu0 %v7812_v33 }
0x21d7   :  { %7307 = vmatprep.subr.bf16.mxu0 %v7657_v3 }
0x21da   :  { %7309 = vmatpush3.bf16.msra.mxu0 %v7826_v37 }
0x21db   :  { %7310 = vmatprep.subr.bf16.mxu0 %v7657_v3 }
0x21de   :  { %7312 = vmatpush3.bf16.msra.mxu0 %v7838_v40 }
0x21df   :  { %7337 = vmatprep.subr.bf16.mxu0 %v7657_v3 }
0x2294   :  { %v2947_v51 = vpop.f32.mrb[38].mxu0 }
0x2295   :  { %v2948_v43 = vadd.f32 %v8553_v35, %v2947_v51  ;;  %v5978_v52 = vpop.f32.mrb[39].mxu0 }
0x2296   :  { %v3623_v52 = vld [vmem:[%s9022_s5 + $0x68] sm:$0xff] }
0x2297   :  { %7586 = vtanh.f32 %v2948_v43  ;;  %v3622_v43 = vld [vmem:[%s9022_s5 + $0x60] sm:$0xff] }
0x22a1   :  { %v7587_v53 = vpop.eup %7586 }
0x22a2   :  { %v2952_v57 = vadd.f32 %v7587_v53, %v2880_v48  ;;  %v3621_v48 = vld [vmem:[%s9022_s5 + $0x58] sm:$0xff]  ;;  %v7500_v53 = vpack.c.bf16 %v3623_v52, %v3622_v43 }
0x22a4   :  { %6012 = vmatmul.mubr.f32.vlgmr.msra.gmra.mrb[38].mxu1 %v2952_v57 }
0x22a5   :  { %7315 = vmatpush3.bf16.msra.mxu1 %v7752_v15  ;;  %6081 = vmatprep.mubr.msk.f32.mxu1 %vm7658_vm0, %v7659_v6 }
0x22a6   :  { %7316 = vmatprep.subr.bf16.mxu1 %v7657_v3 }
0x22a9   :  { %7318 = vmatpush3.bf16.msra.mxu1 %v7762_v18 }
0x22aa   :  { %7319 = vmatprep.subr.bf16.mxu1 %v7657_v3 }
0x22ad   :  { %7321 = vmatpush3.bf16.msra.mxu1 %v7782_v24 }
0x22ae   :  { %7322 = vmatprep.subr.bf16.mxu1 %v7657_v3 }
0x22b1   :  { %7324 = vmatpush3.bf16.msra.mxu1 %v7802_v30 }
0x22b2   :  { %7325 = vmatprep.subr.bf16.mxu1 %v7657_v3 }
0x22b5   :  { %7327 = vmatpush3.bf16.msra.mxu1 %v7822_v36 }
0x22b6   :  { %7328 = vmatprep.subr.bf16.mxu1 %v7657_v3 }
0x22b9   :  { %7330 = vmatpush3.bf16.msra.mxu1 %v7854_v44 }
0x22ba   :  { %7331 = vmatprep.subr.bf16.mxu1 %v7657_v3 }
0x22bd   :  { %7333 = vmatpush3.bf16.msra.mxu1 %v7864_v47 }
0x22be   :  { %7334 = vmatprep.subr.bf16.mxu1 %v7657_v3 }
0x22c1   :  { %7336 = vmatpush3.bf16.msra.mxu1 %v7873_v50 }
0x22c2   :  { %7361 = vmatprep.subr.bf16.mxu1 %v7657_v3 }
0x2377   :  { %v3019_v58 = vpop.f32.mrb[38].mxu1 }
0x2378   :  { %v3020_v8 = vadd.f32 %v8577_v49, %v3019_v58  ;;  %v6013_v61 = vpop.f32.mrb[39].mxu1  ;;  %v3625_v58 = vld [vmem:[%s9022_s5 + $0x78] sm:$0xff] }
0x237a   :  { %7588 = vtanh.f32 %v3020_v8 }
0x2384   :  { %v7589_v63 = vpop.eup %7588 }
0x2385   :  { %v3024_v1 = vadd.f32 %v7589_v63, %v2952_v57  ;;  %v3624_v57 = vld [vmem:[%s9022_s5 + $0x70] sm:$0xff] }
0x2386   :  { %v7503_v8 = vpack.c.bf16 %v3625_v58, %v3624_v57 }
0x2387   :  { %6047 = vmatmul.mubr.f32.vlgmr.msra.gmra.mrb[40].mxu0 %v3024_v1 }
0x2388   :  { %7339 = vmatpush3.bf16.msra.mxu0 %v7887_v54  ;;  %6116 = vmatprep.mubr.msk.f32.mxu0 %vm7658_vm0, %v7659_v6 }
0x2389   :  { %7340 = vmatprep.subr.bf16.mxu0 %v7657_v3 }
0x238c   :  { %7342 = vmatpush3.bf16.msra.mxu0 %v7893_v56 }
0x238d   :  { %7343 = vmatprep.subr.bf16.mxu0 %v7657_v3 }
0x2390   :  { %7345 = vmatpush3.bf16.msra.mxu0 %v7903_v59 }
0x2391   :  { %7346 = vmatprep.subr.bf16.mxu0 %v7657_v3 }
0x2394   :  { %7348 = vmatpush3.bf16.msra.mxu0 %v7913_v62 }
0x2395   :  { %7349 = vmatprep.subr.bf16.mxu0 %v7657_v3 }
0x2398   :  { %7351 = vmatpush3.bf16.msra.mxu0 %v7929_v10 }
0x2399   :  { %7352 = vmatprep.subr.bf16.mxu0 %v7657_v3 }
0x239c   :  { %7354 = vmatpush3.bf16.msra.mxu0 %v7939_v13 }
0x239d   :  { %7355 = vmatprep.subr.bf16.mxu0 %v7657_v3 }
0x23a0   :  { %7357 = vmatpush3.bf16.msra.mxu0 %v7948_v19 }
0x23a1   :  { %7358 = vmatprep.subr.bf16.mxu0 %v7657_v3 }
0x23a4   :  { %7360 = vmatpush3.bf16.msra.mxu0 %v7958_v23 }
0x23a5   :  { %7385 = vmatprep.subr.bf16.mxu0 %v7657_v3 }
0x245a   :  { %v3093_v20 = vpop.f32.mrb[40].mxu0 }
0x245b   :  { %v3097_v9 = vadd.f32 %v3778_v2, %v3093_v20  ;;  %v6048_v11 = vpop.f32.mrb[41].mxu0 }
0x245d   :  { %7590 = vtanh.f32 %v3097_v9 }
0x2467   :  { %v7591_v12 = vpop.eup %7590 }
0x2468   :  { %6082 = vmatmul.mubr.f32.vlgmr.msra.gmra.mrb[40].mxu1 %v7591_v12 }
0x2469   :  { %7363 = vmatpush3.bf16.msra.mxu1 %v7972_v29  ;;  %6151 = vmatprep.mubr.msk.f32.mxu1 %vm7658_vm0, %v7659_v6 }
0x246a   :  { %7364 = vmatprep.subr.bf16.mxu1 %v7657_v3 }
0x246d   :  { %7366 = vmatpush3.bf16.msra.mxu1 %v7978_v32 }
0x246e   :  { %7367 = vmatprep.subr.bf16.mxu1 %v7657_v3 }
0x2471   :  { %7369 = vmatpush3.bf16.msra.mxu1 %v7988_v38 }
0x2472   :  { %7370 = vmatprep.subr.bf16.mxu1 %v7657_v3 }
0x2475   :  { %7372 = vmatpush3.bf16.msra.mxu1 %v7998_v42 }
0x2476   :  { %7373 = vmatprep.subr.bf16.mxu1 %v7657_v3 }
0x2479   :  { %7375 = vmatpush3.bf16.msra.mxu1 %v8033_v55 }
0x247a   :  { %7376 = vmatprep.subr.bf16.mxu1 %v7657_v3 }
0x247d   :  { %7378 = vmatpush3.bf16.msra.mxu1 %v8043_v60 }
0x247e   :  { %7379 = vmatprep.subr.bf16.mxu1 %v7657_v3 }
0x2481   :  { %7381 = vmatpush3.bf16.msra.mxu1 %v8052_v0 }
0x2482   :  { %7382 = vmatprep.subr.bf16.mxu1 %v7657_v3 }
0x2485   :  { %7384 = vmatpush3.bf16.msra.mxu1 %v8062_v5 }
0x2486   :  { %7409 = vmatprep.subr.bf16.mxu1 %v7657_v3 }
0x253b   :  { %v3165_v16 = vpop.f32.mrb[40].mxu1 }
0x253c   :  { %v3166_v17 = vadd.f32 %v8529_v22, %v3165_v16  ;;  %v6083_v25 = vpop.f32.mrb[41].mxu1 }
0x253e   :  { %7592 = vtanh.f32 %v3166_v17 }
0x2548   :  { %v7593_v26 = vpop.eup %7592 }
0x2549   :  { %v3170_v28 = vadd.f32 %v7593_v26, %v7591_v12 }
0x254b   :  { %6117 = vmatmul.mubr.f32.vlgmr.msra.gmra.mrb[42].mxu0 %v3170_v28 }
0x254c   :  { %7387 = vmatpush3.bf16.msra.mxu0 %v7717_v4  ;;  %6186 = vmatprep.mubr.msk.f32.mxu0 %vm7658_vm0, %v7659_v6 }
0x254d   :  { %7388 = vmatprep.subr.bf16.mxu0 %v7657_v3 }
0x2550   :  { %7390 = vmatpush3.bf16.msra.mxu0 %v7728_v7 }
0x2551   :  { %7391 = vmatprep.subr.bf16.mxu0 %v7657_v3 }
0x2554   :  { %7393 = vmatpush3.bf16.msra.mxu0 %v7750_v14 }
0x2555   :  { %7394 = vmatprep.subr.bf16.mxu0 %v7657_v3 }
0x2558   :  { %7396 = vmatpush3.bf16.msra.mxu0 %v7772_v21 }
0x2559   :  { %7397 = vmatprep.subr.bf16.mxu0 %v7657_v3 }
0x255c   :  { %7399 = vmatpush3.bf16.msra.mxu0 %v7792_v27 }
0x255d   :  { %7400 = vmatprep.subr.bf16.mxu0 %v7657_v3 }
0x2560   :  { %7402 = vmatpush3.bf16.msra.mxu0 %v7812_v33 }
0x2561   :  { %7403 = vmatprep.subr.bf16.mxu0 %v7657_v3 }
0x2564   :  { %7405 = vmatpush3.bf16.msra.mxu0 %v7826_v37 }
0x2565   :  { %7406 = vmatprep.subr.bf16.mxu0 %v7657_v3 }
0x2568   :  { %7408 = vmatpush3.bf16.msra.mxu0 %v7838_v40 }
0x2569   :  { %7433 = vmatprep.subr.bf16.mxu0 %v7657_v3 }
0x261e   :  { %v3237_v4 = vpop.f32.mrb[42].mxu0 }
0x261f   :  { %v3238_v7 = vadd.f32 %v8553_v35, %v3237_v4  ;;  %v6118_v14 = vpop.f32.mrb[43].mxu0 }
0x2621   :  { %7594 = vtanh.f32 %v3238_v7 }
0x262b   :  { %v7595_v21 = vpop.eup %7594 }
0x262c   :  { %v3242_v27 = vadd.f32 %v7595_v21, %v3170_v28 }
0x262e   :  { %6152 = vmatmul.mubr.f32.vlgmr.msra.gmra.mrb[42].mxu1 %v3242_v27 }
0x262f   :  { %7411 = vmatpush3.bf16.msra.mxu1 %v7752_v15  ;;  %6221 = vmatprep.mubr.msk.f32.mxu1 %vm7658_vm0, %v7659_v6 }
0x2630   :  { %7412 = vmatprep.subr.bf16.mxu1 %v7657_v3 }
0x2633   :  { %7414 = vmatpush3.bf16.msra.mxu1 %v7762_v18 }
0x2634   :  { %7415 = vmatprep.subr.bf16.mxu1 %v7657_v3 }
0x2637   :  { %7417 = vmatpush3.bf16.msra.mxu1 %v7782_v24 }
0x2638   :  { %7418 = vmatprep.subr.bf16.mxu1 %v7657_v3 }
0x263b   :  { %7420 = vmatpush3.bf16.msra.mxu1 %v7802_v30 }
0x263c   :  { %7421 = vmatprep.subr.bf16.mxu1 %v7657_v3 }
0x263f   :  { %7423 = vmatpush3.bf16.msra.mxu1 %v7822_v36  ;;  %v3779_v36 = vld [vmem:[%s9017_s0 + $0x58] sm:$0xff] }
0x2640   :  { %7424 = vmatprep.subr.bf16.mxu1 %v7657_v3 }
0x2643   :  { %7426 = vmatpush3.bf16.msra.mxu1 %v7854_v44 }
0x2644   :  { %7427 = vmatprep.subr.bf16.mxu1 %v7657_v3 }
0x2647   :  { %7429 = vmatpush3.bf16.msra.mxu1 %v7864_v47 }
0x2648   :  { %7430 = vmatprep.subr.bf16.mxu1 %v7657_v3 }
0x264b   :  { %7432 = vmatpush3.bf16.msra.mxu1 %v7873_v50 }
0x264c   :  { %7457 = vmatprep.subr.bf16.mxu1 %v7657_v3 }
0x2701   :  { %v3309_v15 = vpop.f32.mrb[42].mxu1 }
0x2702   :  { %v3310_v18 = vadd.f32 %v8577_v49, %v3309_v15  ;;  %v6153_v24 = vpop.f32.mrb[43].mxu1 }
0x2704   :  { %7596 = vtanh.f32 %v3310_v18 }
0x270e   :  { %v7597_v30 = vpop.eup %7596 }
0x270f   :  { %v3314_v33 = vadd.f32 %v7597_v30, %v3242_v27 }
0x2711   :  { %6187 = vmatmul.mubr.f32.vlgmr.msra.gmra.mrb[44].mxu0 %v3314_v33 }
0x2712   :  { %7435 = vmatpush3.bf16.msra.mxu0 %v7887_v54  ;;  %6256 = vmatprep.mubr.msk.f32.mxu0 %vm7658_vm0, %v7659_v6 }
0x2713   :  { %7436 = vmatprep.subr.bf16.mxu0 %v7657_v3 }
0x2716   :  { %7438 = vmatpush3.bf16.msra.mxu0 %v7893_v56 }
0x2717   :  { %7439 = vmatprep.subr.bf16.mxu0 %v7657_v3 }
0x271a   :  { %7441 = vmatpush3.bf16.msra.mxu0 %v7903_v59 }
0x271b   :  { %7442 = vmatprep.subr.bf16.mxu0 %v7657_v3 }
0x271e   :  { %7444 = vmatpush3.bf16.msra.mxu0 %v7913_v62 }
0x271f   :  { %7445 = vmatprep.subr.bf16.mxu0 %v7657_v3 }
0x2722   :  { %7447 = vmatpush3.bf16.msra.mxu0 %v7929_v10  ;;  %v3610_v10 = vld [vmem:[%s9022_s5] sm:$0xff] }
0x2723   :  { %7448 = vmatprep.subr.bf16.mxu0 %v7657_v3 }
0x2726   :  { %7450 = vmatpush3.bf16.msra.mxu0 %v7939_v13  ;;  %v3611_v13 = vld [vmem:[%s9022_s5 + $0x8] sm:$0xff] }
0x2727   :  { %7451 = vmatprep.subr.bf16.mxu0 %v7657_v3 }
0x272a   :  { %7453 = vmatpush3.bf16.msra.mxu0 %v7948_v19  ;;  %v3612_v19 = vld [vmem:[%s9022_s5 + $0x10] sm:$0xff] }
0x272b   :  { %7454 = vmatprep.subr.bf16.mxu0 %v7657_v3 }
0x272e   :  { %7456 = vmatpush3.bf16.msra.mxu0 %v7958_v23  ;;  %v7482_v23 = vpack.c.bf16 %v3611_v13, %v3610_v10 }
0x272f   :  { %7481 = vmatprep.subr.bf16.mxu0 %v7657_v3 }
0x27e4   :  { %v3383_v37 = vpop.f32.mrb[44].mxu0 }
0x27e5   :  { %v3387_v40 = vadd.f32 %v3779_v36, %v3383_v37  ;;  %v6188_v44 = vpop.f32.mrb[45].mxu0 }
0x27e7   :  { %7598 = vtanh.f32 %v3387_v40 }
0x27f1   :  { %v7599_v47 = vpop.eup %7598 }
0x27f2   :  { %6222 = vmatmul.mubr.f32.vlgmr.msra.gmra.mrb[44].mxu1 %v7599_v47 }
0x27f3   :  { %7459 = vmatpush3.bf16.msra.mxu1 %v7972_v29  ;;  %6291 = vmatprep.mubr.msk.f32.mxu1 %vm7658_vm0, %v7659_v6  ;;  %v3613_v29 = vld [vmem:[%s9022_s5 + $0x18] sm:$0xff] }
0x27f4   :  { %7460 = vmatprep.subr.bf16.mxu1 %v7657_v3 }
0x27f7   :  { %7462 = vmatpush3.bf16.msra.mxu1 %v7978_v32  ;;  %v7485_v32 = vpack.c.bf16 %v3613_v29, %v3612_v19 }
0x27f8   :  { %7463 = vmatprep.subr.bf16.mxu1 %v7657_v3 }
0x27fb   :  { %7465 = vmatpush3.bf16.msra.mxu1 %v7988_v38  ;;  %v3615_v38 = vld [vmem:[%s9022_s5 + $0x28] sm:$0xff] }
0x27fc   :  { %7466 = vmatprep.subr.bf16.mxu1 %v7657_v3 }
0x27ff   :  { %7468 = vmatpush3.bf16.msra.mxu1 %v7998_v42 }
0x2800   :  { %7469 = vmatprep.subr.bf16.mxu1 %v7657_v3 }
0x2803   :  { %7471 = vmatpush3.bf16.msra.mxu1 %v8033_v55  ;;  %v3616_v55 = vld [vmem:[%s9022_s5 + $0x30] sm:$0xff] }
0x2804   :  { %7472 = vmatprep.subr.bf16.mxu1 %v7657_v3 }
0x2807   :  { %7474 = vmatpush3.bf16.msra.mxu1 %v8043_v60  ;;  %v3617_v60 = vld [vmem:[%s9022_s5 + $0x38] sm:$0xff] }
0x2808   :  { %7475 = vmatprep.subr.bf16.mxu1 %v7657_v3 }
0x280b   :  { %7477 = vmatpush3.bf16.msra.mxu1 %v8052_v0  ;;  %v7491_v0 = vpack.c.bf16 %v3617_v60, %v3616_v55 }
0x280c   :  { %7478 = vmatprep.subr.bf16.mxu1 %v7657_v3 }
0x280f   :  { %7480 = vmatpush3.bf16.msra.mxu1 %v8062_v5 }
0x28c5   :  { %v3455_v50 = vpop.f32.mrb[44].mxu1 }
0x28c6   :  { %v3456_v54 = vadd.f32 %v8529_v22, %v3455_v50  ;;  %v6223_v56 = vpop.f32.mrb[45].mxu1 }
0x28c8   :  { %7600 = vtanh.f32 %v3456_v54 }
0x28d2   :  { %v7601_v59 = vpop.eup %7600 }
0x28d3   :  { %v3460_v62 = vadd.f32 %v7601_v59, %v7599_v47 }
0x28d5   :  { %6257 = vmatmul.mubr.f32.vlgmr.msra.gmra.mrb[46].mxu0 %v3460_v62 }
0x28d6   :  { %6326 = vmatprep.mubr.msk.f32.mxu0 %vm7658_vm0, %v7659_v6  ;;  %7483 = vmatpush3.bf16.msra.mxu0 %v7482_v23  ;;  %v3614_v6 = vld [vmem:[%s9022_s5 + $0x20] sm:$0xff] }
0x28d7   :  { %7484 = vmatprep.subr.bf16.mxu0 %v7657_v3  ;;  %v7488_v42 = vpack.c.bf16 %v3615_v38, %v3614_v6 }
0x28da   :  { %7486 = vmatpush3.bf16.msra.mxu0 %v7485_v32 }
0x28db   :  { %7487 = vmatprep.subr.bf16.mxu0 %v7657_v3 }
0x28de   :  { %7489 = vmatpush3.bf16.msra.mxu0 %v7488_v42 }
0x28df   :  { %7490 = vmatprep.subr.bf16.mxu0 %v7657_v3 }
0x28e2   :  { %7492 = vmatpush3.bf16.msra.mxu0 %v7491_v0 }
0x28e3   :  { %7493 = vmatprep.subr.bf16.mxu0 %v7657_v3 }
0x28e6   :  { %7495 = vmatpush3.bf16.msra.mxu0 %v7494_v46 }
0x28e7   :  { %7496 = vmatprep.subr.bf16.mxu0 %v7657_v3 }
0x29a8   :  { %v3527_v5 = vpop.f32.mrb[46].mxu0 }
0x29a9   :  { %v3528_v22 = vadd.f32 %v8553_v35, %v3527_v5  ;;  %v6258_v31 = vpop.f32.mrb[47].mxu0  ;;  %v3620_v35 = vld [vmem:[%s9022_s5 + $0x50] sm:$0xff] }
0x29aa   :  { %v7497_v51 = vpack.c.bf16 %v3621_v48, %v3620_v35 }
0x29ab   :  { %7602 = vtanh.f32 %v3528_v22 }
0x29ac   :  { %7498 = vmatpush3.bf16.msra.mxu0 %v7497_v51 }
0x29ad   :  { %7499 = vmatprep.subr.bf16.mxu0 %v7657_v3 }
0x29b0   :  { %7501 = vmatpush3.bf16.msra.mxu0 %v7500_v53 }
0x29b1   :  { %7502 = vmatprep.subr.bf16.mxu0 %v7657_v3 }
0x29b4   :  { %7504 = vmatpush3.bf16.msra.mxu0 %v7503_v8 }
0x29b5   :  { %v7603_v34 = vpop.eup %7602 }
0x29b6   :  { %v3532_v39 = vadd.f32 %v7603_v34, %v3460_v62 }
0x29b8   :  { %6292 = vmatmul.mubr.f32.vlgmr.msra.gmra.mrb[46].mxu1 %v3532_v39 }
0x2a8b   :  { %v3599_v61 = vpop.f32.mrb[46].mxu1 }
0x2a8c   :  { %v3600_v63 = vadd.f32 %v8577_v49, %v3599_v61  ;;  %v6293_v1 = vpop.f32.mrb[47].mxu1 }
0x2a8e   :  { %7604 = vtanh.f32 %v3600_v63 }
0x2a98   :  { %v7605_v2 = vpop.eup %7604 }
0x2a99   :  { %v3604_v20 = vadd.f32 %v7605_v2, %v3532_v39 }
0x2a9b   :  { %6327 = vmatmul.mubr.f32.vlgmr.msra.gmra.mrb[48].mxu0 %v3604_v20  ;;  %3609 = vst [vmem:[#allocation5] sm:$0xff] %v3604_v20 }
0x2a9c   :  { %7620 = shalt.err (!%p7617_p4)
}
0x2a9d   :  { %s7621_s12 = scalar_lea.hbm %s9025_s8, 128 }
0x2a9e   :  { %p7622_p5 = scmp.ne.s32.totalorder %s9025_s8, %s7621_s12  ;;  %p7625_p6 = scmp.lt.u32.totalorder %s7621_s12, %s9025_s8 }
0x2aa0   :  { %p7627_p7 = pnand %p7625_p6, %p7622_p5 }
0x2aa2   :  { %7630 = shalt.err (!%p7627_p7)
}
0x2aa3   :  { %3723 = dma.vmem_to_hbm [thread:$0]  %s3721_s9, 128, %s9025_s8, [#allocation6]   ;;  %v3780_v3 = vld [vmem:[%s9023_s6] ss:$0 sm:$0xff] }
0x2aa4   :  { %s7661_s1 = smov [#allocation3]  }
0x2aa5   :  { %s3710_s19 = sshll.u32 %s7661_s1, 4  ;;  %s3711_s19 = int_to_ptr.vmem [resolvable:$true] %s3710_s19 }
0x2aa6   :  { %s7631_s20 = scalar_lea.vmem %s3711_s19, 128  ;;  %p7636_p9 = scmp.lt.s32.totalorder %s3711_s19, %s3711_s19 }
0x2aa7   :  { %p7632_p8 = scmp.ne.s32.totalorder %s3711_s19, %s7631_s20  ;;  %p7637_p10 = scmp.lt.s32.totalorder %s7631_s20, %s7631_s20 }
0x2aa9   :  { %p7638_p11 = por %p7637_p10, %p7636_p9 }
0x2aab   :  { %p7639_p12 = pnand %p7638_p11, %p7632_p8 }
0x2b6e   :  { %v3699_v49 = vpop.f32.mrb[48].mxu0 }
0x2b6f   :  { %v3700_v9 = vadd.f32 %v3780_v3, %v3699_v49  ;;  %v6328_v11 = vpop.f32.mrb[49].mxu0 }
0x2b71   :  { %3703 = vst [vmem:[#allocation3] sm:$0xff] %v3700_v9 }
0x2b72   :  { %7642 = shalt.err (!%p7639_p12)
}
0x2b73   :  { %s7643_s22 = scalar_lea.hbm %s9024_s7, 128 }
0x2b74   :  { %p7644_p13 = scmp.ne.s32.totalorder %s9024_s7, %s7643_s22  ;;  %p7647_p0 = scmp.lt.u32.totalorder %s7643_s22, %s9024_s7 }
0x2b76   :  { %p7649_p1 = pnand %p7647_p0, %p7644_p13 }
0x2b78   :  { %7652 = shalt.err (!%p7649_p1)
}
0x2b79   :  { %3713 = dma.vmem_to_hbm [thread:$0]  %s3711_s19, 128, %s9024_s7, [#allocation4]  }
0x2b7a   :  { %7653 = dma.done.wait [#allocation4], 128  }
0x2b7b   :  { %7654 = vsyncadd [#allocation4], 4294967168 }
0x2b7c   :  { %7655 = dma.done.wait [#allocation6], 128  }
0x2b7d   :  { %7656 = vsyncadd [#allocation6], 4294967168 }
0x2b7e   :  { %3730 = vsyncpa [#allocation4], 1 }
0x2b7f   :  { %3731 = vsyncpa [#allocation6], 1 }

</bundles_post_ra>
